<compile_context>
chip_gen: v7x
topology: tpu7x:2x2x1
jax: 0.10.0
libtpu: 0.0.40
codegen_flags: <defaults>
</compile_context>

<pallas_src>
import functools

import jax
import jax.numpy as jnp
from jax.experimental import pallas as pl
from jax.experimental.pallas import tpu as pltpu


# --------------------------------------------------------------------------
# Phase 1: conv (one matmul per tap) + per-image BN partial statistics
# --------------------------------------------------------------------------
def _conv_stats_kernel(x_ref, w_ref, y_ref, st_ref, *, k, H1, W1):
    # x_ref : (1, Hp, Wp, Cin)   bf16  — one image per grid step (grid over N)
    # w_ref : (k*k, Cin, Cpad)   bf16  — taps ordered (dh, dw), channels zero-padded
    # y_ref : (1, H1*W1, Cpad)   bf16  — lane-dense conv output (intermediate)
    # st_ref: (1, 2, Cpad)       f32   — per-image [sum, sum-of-squares]
    Cin = x_ref.shape[-1]
    Cpad = y_ref.shape[-1]
    rows = H1 * W1
    x = x_ref[0]                                        # (Hp, Wp, Cin)

    acc = jnp.zeros((rows, Cpad), jnp.float32)
    for dh in range(k):                                 # static unroll: k*k taps
        for dw in range(k):
            # Shifted window for this tap, flattened to a single long-M 2-D
            # matmul (no NH weight replication, no batched einsum).
            xs = x[dh:dh + H1, dw:dw + W1, :].reshape(rows, Cin)
            acc = acc + jnp.dot(xs, w_ref[dh * k + dw],
                                preferred_element_type=jnp.float32)
            # TODO(synk): a mini im2col (single (rows, k*k*Cin) matmul) would
            # raise MXU contraction depth, but minor-dim concatenation of
            # 4-wide pieces is layout-hostile on current Mosaic; keep per-tap.

    y_ref[0] = acc.astype(y_ref.dtype)
    st_ref[0] = jnp.concatenate(
        [jnp.sum(acc, axis=0, keepdims=True),
         jnp.sum(acc * acc, axis=0, keepdims=True)], axis=0)


# --------------------------------------------------------------------------
# Phase 2: finalize BN stats (cross-tile reduction) + normalize + SiLU
# --------------------------------------------------------------------------
def _bn_silu_kernel(y_ref, st_ref, g_ref, b_ref, o_ref, *, count, eps,
                    apply_bn, apply_act):
    # y_ref : (1, rows, Cpad) bf16 conv output tile
    # st_ref: (N, 2, Cpad)    f32  partial stats (full array, tiny)
    # g_ref, b_ref : (1, Cpad) f32
    y = y_ref[0].astype(jnp.float32)            # keep VPU/EUP epilogue math f32
    if apply_bn:
        st = st_ref[...]                        # (N, 2, Cpad)
        s = jnp.sum(st[:, 0, :], axis=0, keepdims=True)      # (1, Cpad)
        sq = jnp.sum(st[:, 1, :], axis=0, keepdims=True)
        inv_n = 1.0 / count
        mean = s * inv_n
        var = sq * inv_n - mean * mean          # single-pass biased variance
        scale = g_ref[...] * jax.lax.rsqrt(var + eps)
        shift = b_ref[...] - mean * scale
        y = y * scale + shift                   # folded affine: one FMA
    if apply_act:
        # SiLU: exp and approximate reciprocal both land on the EUP slot.
        y = y * pl.reciprocal(1.0 + jnp.exp(-y), approx=True)
    o_ref[0] = y.astype(o_ref.dtype)


# --------------------------------------------------------------------------
# Public wrapper (NCHW in / NCHW out, PyTorch conventions)
# --------------------------------------------------------------------------
def conv_bn_act(x, w, gamma=None, beta=None, *, stride=1, padding=0, groups=1,
                bn=True, act=True, eps=1e-5):
    N, Cin, H, W = x.shape
    Cout, Cin_w, kh, kw = w.shape
    assert kh == kw, "square kernels only"
    k = kh
    assert Cin_w == Cin, "weight/input channel mismatch"
    assert groups == 1, "groups > 1 not implemented in the Pallas kernel"
    # TODO(synk): stride > 1 would need strided window slices in the kernel.
    assert stride == 1, "stride > 1 not implemented in the Pallas kernel"
    # TODO(synk): conv bias not implemented (module default bias=False).

    H1 = (H + 2 * padding - k) // stride + 1
    W1 = (W + 2 * padding - k) // stride + 1
    rows = H1 * W1
    Cpad = ((Cout + 127) // 128) * 128           # lane-dense channel axis
    Hp, Wp = H + 2 * padding, W + 2 * padding

    # ---- glue: layout / dtype packing only (no compute hoisted) ----
    x_nhwc = jnp.transpose(x, (0, 2, 3, 1))
    xp = jnp.pad(x_nhwc, ((0, 0), (padding, padding), (padding, padding), (0, 0)))
    xp = xp.astype(jnp.bfloat16)                 # bf16 MXU inputs, f32 accumulation

    # (Cout, Cin, k, k) -> (k*k, Cin, Cpad), taps ordered (dh, dw)
    wt = jnp.transpose(w, (2, 3, 1, 0)).reshape(k * k, Cin, Cout)
    wt = jnp.pad(wt, ((0, 0), (0, 0), (0, Cpad - Cout))).astype(jnp.bfloat16)

    if gamma is None:
        gamma = jnp.ones((Cout,), jnp.float32)
    if beta is None:
        beta = jnp.zeros((Cout,), jnp.float32)
    g2 = jnp.pad(gamma.astype(jnp.float32), (0, Cpad - Cout)).reshape(1, Cpad)
    b2 = jnp.pad(beta.astype(jnp.float32), (0, Cpad - Cout)).reshape(1, Cpad)

    # ---- phase 1: conv + per-image partial stats (grid over N, parallel) ----
    conv_out, stats = pl.pallas_call(
        functools.partial(_conv_stats_kernel, k=k, H1=H1, W1=W1),
        grid=(N,),
        in_specs=[
            pl.BlockSpec((1, Hp, Wp, Cin), lambda i: (i, 0, 0, 0)),
            pl.BlockSpec((k * k, Cin, Cpad), lambda i: (0, 0, 0)),
        ],
        out_specs=(
            pl.BlockSpec((1, rows, Cpad), lambda i: (i, 0, 0)),
            pl.BlockSpec((1, 2, Cpad), lambda i: (i, 0, 0)),
        ),
        out_shape=(
            jax.ShapeDtypeStruct((N, rows, Cpad), jnp.bfloat16),
            jax.ShapeDtypeStruct((N, 2, Cpad), jnp.float32),
        ),
        compiler_params=pltpu.CompilerParams(dimension_semantics=("parallel",)),
    )(xp, wt)

    # module semantics: BN only if conv output spatial dims > 1 (static check)
    apply_bn = bool(bn) and (H1 > 1 and W1 > 1)

    # ---- phase 2: BN (global train-mode stats) + SiLU (grid over N, parallel) ----
    out3 = pl.pallas_call(
        functools.partial(_bn_silu_kernel, count=float(N * rows), eps=eps,
                          apply_bn=apply_bn, apply_act=bool(act)),
        grid=(N,),
        in_specs=[
            pl.BlockSpec((1, rows, Cpad), lambda i: (i, 0, 0)),
            pl.BlockSpec((N, 2, Cpad), lambda i: (0, 0, 0)),
            pl.BlockSpec((1, Cpad), lambda i: (0, 0)),
            pl.BlockSpec((1, Cpad), lambda i: (0, 0)),
        ],
        out_specs=pl.BlockSpec((1, rows, Cpad), lambda i: (i, 0, 0)),
        out_shape=jax.ShapeDtypeStruct((N, rows, Cpad), jnp.float32),
        compiler_params=pltpu.CompilerParams(dimension_semantics=("parallel",)),
    )(conv_out, stats, g2, b2)

    # glue: drop padded channels, restore NCHW
    out = out3[:, :, :Cout].reshape(N, H1, W1, Cout)
    return jnp.transpose(out, (0, 3, 1, 2))


# --------------------------------------------------------------------------
# Pure-JAX reference (PyTorch ConvBnAct forward, training-mode BN)
# --------------------------------------------------------------------------
def reference(x, w, gamma, beta, *, stride, padding, eps):
    dn = ('NCHW', 'OIHW', 'NCHW')
    y = jax.lax.conv_general_dilated(
        x, w, window_strides=(stride, stride),
        padding=((padding, padding), (padding, padding)),
        dimension_numbers=dn, precision=jax.lax.Precision.HIGHEST)
    if y.shape[-1] > 1 and y.shape[-2] > 1:
        mean = y.mean(axis=(0, 2, 3), keepdims=True)
        var = ((y - mean) ** 2).mean(axis=(0, 2, 3), keepdims=True)
        y = (y - mean) * jax.lax.rsqrt(var + eps)
        y = y * gamma[None, :, None, None] + beta[None, :, None, None]
    return y * jax.nn.sigmoid(y)


if __name__ == "__main__":
    N, Cin, Cout = 2, 4, 8
    H = W = 16
    k, stride, padding = 3, 1, 0          # ConvBnAct defaults: stride=1, padding=0, bias=False
    eps = 1e-5

    key = jax.random.PRNGKey(0)
    ks = jax.random.split(key, 4)
    x = jax.random.normal(ks[0], (N, Cin, H, W), jnp.float32)
    w = 0.2 * jax.random.normal(ks[1], (Cout, Cin, k, k), jnp.float32)   # conv.weight
    gamma = 1.0 + 0.1 * jax.random.normal(ks[2], (Cout,), jnp.float32)   # bn.weight
    beta = 0.1 * jax.random.normal(ks[3], (Cout,), jnp.float32)          # bn.bias

    out = conv_bn_act(x, w, gamma, beta, stride=stride, padding=padding, eps=eps)
    out = jax.block_until_ready(out)

    ref = reference(x, w, gamma, beta, stride=stride, padding=padding, eps=eps)
    assert out.shape == ref.shape == (N, Cout, H - k + 1, W - k + 1)
    err = float(jnp.max(jnp.abs(out - ref)))
    # bf16 MXU inputs + approx-reciprocal sigmoid vs a pure-f32 reference.
    assert err < 1e-1, f"max abs err {err}"
    print("KERNEL_OK")
</pallas_src>

<mosaic_0001>
module attributes {stable_mosaic.version = 11 : i64} {
  func.func @_conv_stats_kernel(%arg0: i32, %arg1: memref<1x16x16x4xbf16, #tpu.memory_space<vmem>>, %arg2: memref<9x4x128xbf16, #tpu.memory_space<vmem>>, %arg3: memref<1x196x128xbf16, #tpu.memory_space<vmem>>, %arg4: memref<1x2x128xf32, #tpu.memory_space<vmem>>) attributes {dimension_semantics = [#tpu.dimension_semantics<parallel>], iteration_bounds = array<i64: 2>, scalar_prefetch = 0 : i64, scratch_operands = 0 : i64, tpu.core_type = #tpu.core_type<tc>, window_params = [{transform_indices = @transform_0, window_bounds = array<i64: 1, 16, 16, 4>}, {pipeline_mode = #tpu.pipeline_mode<synchronous>, transform_indices = @transform_1, window_bounds = array<i64: 9, 4, 128>}, {transform_indices = @transform_2, window_bounds = array<i64: 1, 196, 128>}, {transform_indices = @transform_3, window_bounds = array<i64: 1, 2, 128>}]} {
    %c0 = arith.constant 0 : index
    %c0_0 = arith.constant 0 : index
    %c0_1 = arith.constant 0 : index
    %c0_2 = arith.constant 0 : index
    %0 = vector.load %arg1[%c0, %c0_0, %c0_1, %c0_2] : memref<1x16x16x4xbf16, #tpu.memory_space<vmem>>, vector<1x16x16x4xbf16>
    %1 = vector.shape_cast %0 : vector<1x16x16x4xbf16> to vector<16x16x4xbf16>
    %cst = arith.constant 0.000000e+00 : f32
    %2 = vector.broadcast %cst : f32 to vector<196x128xf32>
    %3 = vector.extract_strided_slice %1 {offsets = [0, 0, 0], sizes = [14, 14, 4], strides = [1, 1, 1]} : vector<16x16x4xbf16> to vector<14x14x4xbf16>
    %4 = vector.shape_cast %3 : vector<14x14x4xbf16> to vector<196x4xbf16>
    %c0_3 = arith.constant 0 : index
    %c0_4 = arith.constant 0 : index
    %c0_5 = arith.constant 0 : index
    %5 = vector.load %arg2[%c0_3, %c0_4, %c0_5] : memref<9x4x128xbf16, #tpu.memory_space<vmem>>, vector<1x4x128xbf16>
    %6 = vector.shape_cast %5 : vector<1x4x128xbf16> to vector<4x128xbf16>
    %cst_6 = arith.constant dense<0.000000e+00> : vector<196x128xf32>
    %7 = tpu.matmul %4, %6, %cst_6 {dimension_numbers = #tpu.dot_dimension_numbers<[1], [0], [0], [1], [0, 0, 1, 1], [], []>} : vector<196x4xbf16>, vector<4x128xbf16>, vector<196x128xf32> -> vector<196x128xf32>
    %8 = arith.addf %2, %7 : vector<196x128xf32>
    %9 = vector.extract_strided_slice %1 {offsets = [0, 1, 0], sizes = [14, 14, 4], strides = [1, 1, 1]} : vector<16x16x4xbf16> to vector<14x14x4xbf16>
    %10 = vector.shape_cast %9 : vector<14x14x4xbf16> to vector<196x4xbf16>
    %c1 = arith.constant 1 : index
    %c0_7 = arith.constant 0 : index
    %c0_8 = arith.constant 0 : index
    %11 = vector.load %arg2[%c1, %c0_7, %c0_8] : memref<9x4x128xbf16, #tpu.memory_space<vmem>>, vector<1x4x128xbf16>
    %12 = vector.shape_cast %11 : vector<1x4x128xbf16> to vector<4x128xbf16>
    %cst_9 = arith.constant dense<0.000000e+00> : vector<196x128xf32>
    %13 = tpu.matmul %10, %12, %cst_9 {dimension_numbers = #tpu.dot_dimension_numbers<[1], [0], [0], [1], [0, 0, 1, 1], [], []>} : vector<196x4xbf16>, vector<4x128xbf16>, vector<196x128xf32> -> vector<196x128xf32>
    %14 = arith.addf %8, %13 : vector<196x128xf32>
    %15 = vector.extract_strided_slice %1 {offsets = [0, 2, 0], sizes = [14, 14, 4], strides = [1, 1, 1]} : vector<16x16x4xbf16> to vector<14x14x4xbf16>
    %16 = vector.shape_cast %15 : vector<14x14x4xbf16> to vector<196x4xbf16>
    %c2 = arith.constant 2 : index
    %c0_10 = arith.constant 0 : index
    %c0_11 = arith.constant 0 : index
    %17 = vector.load %arg2[%c2, %c0_10, %c0_11] : memref<9x4x128xbf16, #tpu.memory_space<vmem>>, vector<1x4x128xbf16>
    %18 = vector.shape_cast %17 : vector<1x4x128xbf16> to vector<4x128xbf16>
    %cst_12 = arith.constant dense<0.000000e+00> : vector<196x128xf32>
    %19 = tpu.matmul %16, %18, %cst_12 {dimension_numbers = #tpu.dot_dimension_numbers<[1], [0], [0], [1], [0, 0, 1, 1], [], []>} : vector<196x4xbf16>, vector<4x128xbf16>, vector<196x128xf32> -> vector<196x128xf32>
    %20 = arith.addf %14, %19 : vector<196x128xf32>
    %21 = vector.extract_strided_slice %1 {offsets = [1, 0, 0], sizes = [14, 14, 4], strides = [1, 1, 1]} : vector<16x16x4xbf16> to vector<14x14x4xbf16>
    %22 = vector.shape_cast %21 : vector<14x14x4xbf16> to vector<196x4xbf16>
    %c3 = arith.constant 3 : index
    %c0_13 = arith.constant 0 : index
    %c0_14 = arith.constant 0 : index
    %23 = vector.load %arg2[%c3, %c0_13, %c0_14] : memref<9x4x128xbf16, #tpu.memory_space<vmem>>, vector<1x4x128xbf16>
    %24 = vector.shape_cast %23 : vector<1x4x128xbf16> to vector<4x128xbf16>
    %cst_15 = arith.constant dense<0.000000e+00> : vector<196x128xf32>
    %25 = tpu.matmul %22, %24, %cst_15 {dimension_numbers = #tpu.dot_dimension_numbers<[1], [0], [0], [1], [0, 0, 1, 1], [], []>} : vector<196x4xbf16>, vector<4x128xbf16>, vector<196x128xf32> -> vector<196x128xf32>
    %26 = arith.addf %20, %25 : vector<196x128xf32>
    %27 = vector.extract_strided_slice %1 {offsets = [1, 1, 0], sizes = [14, 14, 4], strides = [1, 1, 1]} : vector<16x16x4xbf16> to vector<14x14x4xbf16>
    %28 = vector.shape_cast %27 : vector<14x14x4xbf16> to vector<196x4xbf16>
    %c4 = arith.constant 4 : index
    %c0_16 = arith.constant 0 : index
    %c0_17 = arith.constant 0 : index
    %29 = vector.load %arg2[%c4, %c0_16, %c0_17] : memref<9x4x128xbf16, #tpu.memory_space<vmem>>, vector<1x4x128xbf16>
    %30 = vector.shape_cast %29 : vector<1x4x128xbf16> to vector<4x128xbf16>
    %cst_18 = arith.constant dense<0.000000e+00> : vector<196x128xf32>
    %31 = tpu.matmul %28, %30, %cst_18 {dimension_numbers = #tpu.dot_dimension_numbers<[1], [0], [0], [1], [0, 0, 1, 1], [], []>} : vector<196x4xbf16>, vector<4x128xbf16>, vector<196x128xf32> -> vector<196x128xf32>
    %32 = arith.addf %26, %31 : vector<196x128xf32>
    %33 = vector.extract_strided_slice %1 {offsets = [1, 2, 0], sizes = [14, 14, 4], strides = [1, 1, 1]} : vector<16x16x4xbf16> to vector<14x14x4xbf16>
    %34 = vector.shape_cast %33 : vector<14x14x4xbf16> to vector<196x4xbf16>
    %c5 = arith.constant 5 : index
    %c0_19 = arith.constant 0 : index
    %c0_20 = arith.constant 0 : index
    %35 = vector.load %arg2[%c5, %c0_19, %c0_20] : memref<9x4x128xbf16, #tpu.memory_space<vmem>>, vector<1x4x128xbf16>
    %36 = vector.shape_cast %35 : vector<1x4x128xbf16> to vector<4x128xbf16>
    %cst_21 = arith.constant dense<0.000000e+00> : vector<196x128xf32>
    %37 = tpu.matmul %34, %36, %cst_21 {dimension_numbers = #tpu.dot_dimension_numbers<[1], [0], [0], [1], [0, 0, 1, 1], [], []>} : vector<196x4xbf16>, vector<4x128xbf16>, vector<196x128xf32> -> vector<196x128xf32>
    %38 = arith.addf %32, %37 : vector<196x128xf32>
    %39 = vector.extract_strided_slice %1 {offsets = [2, 0, 0], sizes = [14, 14, 4], strides = [1, 1, 1]} : vector<16x16x4xbf16> to vector<14x14x4xbf16>
    %40 = vector.shape_cast %39 : vector<14x14x4xbf16> to vector<196x4xbf16>
    %c6 = arith.constant 6 : index
    %c0_22 = arith.constant 0 : index
    %c0_23 = arith.constant 0 : index
    %41 = vector.load %arg2[%c6, %c0_22, %c0_23] : memref<9x4x128xbf16, #tpu.memory_space<vmem>>, vector<1x4x128xbf16>
    %42 = vector.shape_cast %41 : vector<1x4x128xbf16> to vector<4x128xbf16>
    %cst_24 = arith.constant dense<0.000000e+00> : vector<196x128xf32>
    %43 = tpu.matmul %40, %42, %cst_24 {dimension_numbers = #tpu.dot_dimension_numbers<[1], [0], [0], [1], [0, 0, 1, 1], [], []>} : vector<196x4xbf16>, vector<4x128xbf16>, vector<196x128xf32> -> vector<196x128xf32>
    %44 = arith.addf %38, %43 : vector<196x128xf32>
    %45 = vector.extract_strided_slice %1 {offsets = [2, 1, 0], sizes = [14, 14, 4], strides = [1, 1, 1]} : vector<16x16x4xbf16> to vector<14x14x4xbf16>
    %46 = vector.shape_cast %45 : vector<14x14x4xbf16> to vector<196x4xbf16>
    %c7 = arith.constant 7 : index
    %c0_25 = arith.constant 0 : index
    %c0_26 = arith.constant 0 : index
    %47 = vector.load %arg2[%c7, %c0_25, %c0_26] : memref<9x4x128xbf16, #tpu.memory_space<vmem>>, vector<1x4x128xbf16>
    %48 = vector.shape_cast %47 : vector<1x4x128xbf16> to vector<4x128xbf16>
    %cst_27 = arith.constant dense<0.000000e+00> : vector<196x128xf32>
    %49 = tpu.matmul %46, %48, %cst_27 {dimension_numbers = #tpu.dot_dimension_numbers<[1], [0], [0], [1], [0, 0, 1, 1], [], []>} : vector<196x4xbf16>, vector<4x128xbf16>, vector<196x128xf32> -> vector<196x128xf32>
    %50 = arith.addf %44, %49 : vector<196x128xf32>
    %51 = vector.extract_strided_slice %1 {offsets = [2, 2, 0], sizes = [14, 14, 4], strides = [1, 1, 1]} : vector<16x16x4xbf16> to vector<14x14x4xbf16>
    %52 = vector.shape_cast %51 : vector<14x14x4xbf16> to vector<196x4xbf16>
    %c8 = arith.constant 8 : index
    %c0_28 = arith.constant 0 : index
    %c0_29 = arith.constant 0 : index
    %53 = vector.load %arg2[%c8, %c0_28, %c0_29] : memref<9x4x128xbf16, #tpu.memory_space<vmem>>, vector<1x4x128xbf16>
    %54 = vector.shape_cast %53 : vector<1x4x128xbf16> to vector<4x128xbf16>
    %cst_30 = arith.constant dense<0.000000e+00> : vector<196x128xf32>
    %55 = tpu.matmul %52, %54, %cst_30 {dimension_numbers = #tpu.dot_dimension_numbers<[1], [0], [0], [1], [0, 0, 1, 1], [], []>} : vector<196x4xbf16>, vector<4x128xbf16>, vector<196x128xf32> -> vector<196x128xf32>
    %56 = arith.addf %50, %55 : vector<196x128xf32>
    %57 = arith.truncf %56 : vector<196x128xf32> to vector<196x128xbf16>
    %c0_31 = arith.constant 0 : index
    %c0_32 = arith.constant 0 : index
    %c0_33 = arith.constant 0 : index
    %58 = vector.load %arg3[%c0_31, %c0_32, %c0_33] : memref<1x196x128xbf16, #tpu.memory_space<vmem>>, vector<1x196x128xbf16>
    %59 = vector.shape_cast %58 : vector<1x196x128xbf16> to vector<196x128xbf16>
    %60 = vector.shape_cast %57 : vector<196x128xbf16> to vector<1x196x128xbf16>
    tpu.vector_store %arg3[%c0_31, %c0_32, %c0_33], %60 {strides = array<i32>} : memref<1x196x128xbf16, #tpu.memory_space<vmem>>, vector<1x196x128xbf16>,
    %cst_34 = arith.constant dense<0.000000e+00> : vector<128xf32>
    %61 = vector.multi_reduction <add>, %56, %cst_34 [0] : vector<196x128xf32> to vector<128xf32>
    %62 = vector.shape_cast %61 : vector<128xf32> to vector<1x128xf32>
    %63 = arith.mulf %56, %56 : vector<196x128xf32>
    %cst_35 = arith.constant dense<0.000000e+00> : vector<128xf32>
    %64 = vector.multi_reduction <add>, %63, %cst_35 [0] : vector<196x128xf32> to vector<128xf32>
    %65 = vector.shape_cast %64 : vector<128xf32> to vector<1x128xf32>
    %66 = tpu.concatenate %62, %65 in 0 : vector<1x128xf32>, vector<1x128xf32> -> vector<2x128xf32>
    %c0_36 = arith.constant 0 : index
    %c0_37 = arith.constant 0 : index
    %c0_38 = arith.constant 0 : index
    %67 = vector.load %arg4[%c0_36, %c0_37, %c0_38] : memref<1x2x128xf32, #tpu.memory_space<vmem>>, vector<1x2x128xf32>
    %68 = vector.shape_cast %67 : vector<1x2x128xf32> to vector<2x128xf32>
    %69 = vector.shape_cast %66 : vector<2x128xf32> to vector<1x2x128xf32>
    tpu.vector_store %arg4[%c0_36, %c0_37, %c0_38], %69 {strides = array<i32>} : memref<1x2x128xf32, #tpu.memory_space<vmem>>, vector<1x2x128xf32>,
    return
  }
  func.func @transform_0(%arg0: i32) -> (i32, i32, i32, i32) {
    %c0_i32 = arith.constant 0 : i32
    %c0_i32_0 = arith.constant 0 : i32
    %c0_i32_1 = arith.constant 0 : i32
    %c0_i32_2 = arith.constant 0 : i32
    return %arg0, %c0_i32, %c0_i32_0, %c0_i32_1 : i32, i32, i32, i32
  }
  func.func @transform_1(%arg0: i32) -> (i32, i32, i32) {
    %c0_i32 = arith.constant 0 : i32
    %c0_i32_0 = arith.constant 0 : i32
    %c0_i32_1 = arith.constant 0 : i32
    %c0_i32_2 = arith.constant 0 : i32
    return %c0_i32, %c0_i32_0, %c0_i32_1 : i32, i32, i32
  }
  func.func @transform_2(%arg0: i32) -> (i32, i32, i32) {
    %c0_i32 = arith.constant 0 : i32
    %c0_i32_0 = arith.constant 0 : i32
    %c0_i32_1 = arith.constant 0 : i32
    return %arg0, %c0_i32, %c0_i32_0 : i32, i32, i32
  }
  func.func @transform_3(%arg0: i32) -> (i32, i32, i32) {
    %c0_i32 = arith.constant 0 : i32
    %c0_i32_0 = arith.constant 0 : i32
    %c0_i32_1 = arith.constant 0 : i32
    return %arg0, %c0_i32, %c0_i32_0 : i32, i32, i32
  }
}

</mosaic_0001>

<bundles_post_ra>
// kernel: tpu_custom_call.1
= control target key start
LH: loop header
LB: loop body
LE: loop exit
PB: predicated region body
PF: predicated region fallthrough
CT: control target
= control target key end

     0   :  { %9 = vsyncpa [#allocation3], 0  ;;  %s12456_s0 = inlined_call_operand.vmem [shape: bf16[2,16,16,4], index: 0, kind: input, shape index: {}]   ;;  %s12457_s1 = inlined_call_operand.vmem [shape: bf16[9,4,128], index: 1, kind: input, shape index: {}]   ;;  %s12458_s2 = inlined_call_operand.vmem [shape: bf16[2,196,128], index: 2, kind: output, shape index: {0}]   ;;  %s12459_s3 = inlined_call_operand.hbm [shape: f32[2,2,128], index: 3, kind: output, shape index: {1}]  }
   0x1   :  { %11 = vsyncpa [#allocation3 + $0x1], 0  ;;  %s9328_s12 = smov 0   ;;  %s9330_s13 = smov 0  }
   0x2   :  { %s9332_s14 = smov 0   ;;  %s9334_s15 = smov 0  }
   0x3 LB: > { %s9349_s16 = sadd.s32 4294967295, %s9302_s15   ;;  %s7760_s17 = sadd.s32 4294967294, %s9302_s15   ;;  %s9302_s15 = sphi %s9334_s15, %s13236_s15   ;;  %s9298_s14 = sphi %s9332_s14, %s13235_s14   ;;  %s9294_s13 = sphi %s9330_s13, %s13234_s13   ;;  %s9290_s12 = sphi %s9328_s12, %s13233_s12  }
   0x4   : > { %s9353_s18 = sadd.s32 1, %s9302_s15   ;;  %s97_s19 = sadd.s32 1, %s9298_s14 }
   0x5   : > { %s94_s20 = ssub.s32 %s9302_s15, %s9353_s18  ;;  %p107_p0 = scmp.ne.s32.totalorder %s9298_s14, %s9294_s13 }
   0x6   : > { %p95_p1 = scmp.eq.s32.totalorder %s94_s20, 0  ;;  %p108_p2 = scmp.eq.s32.totalorder %s9349_s16, 1 }
   0x7   : > { %p113_p3 = scmp.ne.s32.totalorder %s9294_s13, %s9290_s12  ;;  %p114_p4 = scmp.eq.s32.totalorder %s7760_s17, 1 }
   0x8   : > { %s9364_s21 = scalar_select %p95_p1, %s9298_s14, %s97_s19  }
   0x9   : > { %p9366_p5 = por %p108_p2, %p107_p0  ;;  %p9370_p6 = por %p114_p4, %p113_p3 }
   0xa   : > { %p7763_p7 = scmp.ge.s32.totalorder %s9302_s15, 1  ;;  %p143_p8 = scmp.lt.s32.totalorder %s9302_s15, 3 }
   0xc   : > { %p144_p9 = pnand %p7763_p7, %p143_p8 }
   0xe   : > { %147 = sbr.rel (%p144_p9) target bundleno = 847 (0x34f), region = 28 }
  0x15   : > { %vm2374_vm0 = vcmask 1041408   ;;  %v7979_v0 = vld [vmem:[%s12457_s1 + $0x8] sm:$0x3]  ;;  %v7894_v1 = vld [vmem:[%s12457_s1 + $0x2] sm:$0x3]  ;;  %v254_v2 = vlaneseq  ;;  %v12462_v3 = vmov 0.0  }
  0x16   : > { %8536 = vmatprep.subr.bf16.mxu0 %v12462_v3  ;;  %8320 = vmatprep.subr.bf16.mxu1 %v12462_v3  ;;  %v9385_v4 = vsel %vm2374_vm0, %v7979_v0, 0  ;;  %v2376_v5 = vsel %vm2374_vm0, %v7894_v1, 0  ;;  %p172_p10 = scmp.lt.s32.totalorder %s9349_s16, 1  ;;  %v9305_v6 = vmov 1966171168   ;;  %vm9306_vm3 = vmmov 0  }
  0x17   : > { %12741 = vst [vmem:[#allocation5_spill] sm:$0xff] %v9385_v4  ;;  %8537 = vmatpush3.bf16.msra.mxu0 %v9385_v4  ;;  %8321 = vmatpush3.bf16.msra.mxu1 %v2376_v5  ;;  %v252_v7 = vunpack.c.l.s4 %v9305_v6  ;;  %v255_v8 = vshrl.u32 %v254_v2, 7  ;;  %vm916_vm1 = vsmask.f32 256  ;;  %vm917_vm2 = vsmask.f32 1284 }
  0x18   : > { %8322 = vmatprep.mubr.msk.bf16.mxu1 %vm9306_vm3, %v12462_v3  ;;  %8538 = vmatprep.mubr.msk.bf16.mxu0 %vm9306_vm3, %v12462_v3  ;;  %s9395_s28 = scalar_select %p172_p10, %s9349_s16, 1  ;;  %vm918_vm4 = vmor %vm916_vm1, %vm917_vm2  ;;  %vm919_vm5 = vsmask.f32 2312  ;;  %vm921_vm6 = vsmask.f32 3340  ;;  %v12749_v24 = vmov 0 }
  0x19   : > { %8590 = vmatprep.subr.bf16.mxu0 %v12462_v3  ;;  %v253_v9 = vunpack.c.0.s8 %v252_v7  ;;  %vm920_vm7 = vmor %vm918_vm4, %vm919_vm5  ;;  %vm923_vm8 = vsmask.f32 4368  ;;  %vm925_vm9 = vsmask.f32 5396  ;;  %8374 = vmatprep.subr.bf16.mxu1 %v12462_v3  ;;  %vm927_vm11 = vsmask.f32 6424 }
  0x1a   : > { %s8097_s29 = sshll.u32 %s9395_s28, 7  ;;  %vm922_vm10 = vmor %vm920_vm7, %vm921_vm6  ;;  %vm929_vm15 = vsmask.f32 7452  ;;  %v901_v43 = vld [vmem:[%s12457_s1] sm:$0x3]  ;;  %vm2334_vm2 = vcmask 31744  }
  0x1b   : > { %s9403_s5 = scalar_lea.vmem %s12456_s0, %s8097_s29  ;;  %v9405_v10 = vsub.s32 %v253_v9, %v255_v8  ;;  %vm924_vm12 = vmor %vm922_vm10, %vm923_vm8  ;;  %v3157_v57 = vsel %vm2374_vm0, %v901_v43, 0  ;;  %s9197_s30 = smul.u32 100, %s9395_s28 }
  0x1c   : > { %v7768_v11 = vld.sshfl [vmem:[%s9403_s5] sm:$0x33 pattern:$0x75316420]  ;;  %vm926_vm13 = vmor %vm924_vm12, %vm925_vm9  ;;  %s169_s28 = sand.u32 1, %s9294_s13   ;;  %s8094_s8 = sshll.u32 %s9349_s16, 5 }
  0x1d   : > { %v7769_v12 = vld.sshfl [vmem:[%s9403_s5 + $0x4] sm:$0x33 pattern:$0x75316420]  ;;  %v250_v13 = vcombine.high %v7768_v11, %v7768_v11  ;;  %v9410_v14 = vrot.slane %v7768_v11, %v9405_v10  ;;  %vm928_vm14 = vmor %vm926_vm13, %vm927_vm11  ;;  %s12388_s6 = scalar_lea.vmem %s12458_s2, %s9197_s30  ;;  %s7764_s7 = sshll.u32 %s169_s28, 1 }
  0x1e   : > { %v7770_v15 = vld.sshfl [vmem:[%s9403_s5 + $0x8] sm:$0x33 pattern:$0x75316420]  ;;  %v274_v16 = vcombine.high %v7769_v12, %v7769_v12  ;;  %v9414_v17 = vrot.slane %v7769_v12, %v9405_v10  ;;  %vm9433_vm1 = vmor %vm928_vm14, %vm929_vm15  ;;  %s171_s9 = scalar_lea.vmem [#allocation2], %s7764_s7  ;;  %s12414_s19 = scalar_lea.hbm %s12459_s3, %s8094_s8 }
  0x1f   : > { %12742 = vst [vmem:[#allocation6_spill] sm:$0xff] %v9410_v14  ;;  %v9417_v18 = vrot.slane %v250_v13, %v9405_v10  ;;  %v9421_v19 = vcombine.high %v9410_v14, %v9410_v14  ;;  %v297_v20 = vcombine.high %v7770_v15, %v7770_v15  ;;  %v9424_v21 = vrot.slane %v7770_v15, %v9405_v10  ;;  %v7771_v52 = vld.sshfl [vmem:[%s9403_s5 + $0xc] sm:$0x33 pattern:$0x75316420]  ;;  %s7676_s10 = sshll.u32 %s171_s9, 4  ;;  %s12416_s10 = int_to_ptr.vmem [resolvable:$true] %s7676_s10 }
  0x20   : > { %12743 = vst [vmem:[#allocation7_spill] sm:$0xff] %v9414_v17  ;;  %v9427_v22 = vrot.slane %v274_v16, %v9405_v10  ;;  %v9431_v23 = vcombine.high %v9414_v17, %v9414_v17  ;;  %v12750_v24 = vsel %vm9433_vm1, 4294967295, %v12749_v24  ;;  %v932_v25 = vshrl.u32 %v9410_v14, 16  ;;  %s7660_s20 = scalar_lea.sflag [#allocation3], %s169_s28  ;;  %s9240_s24 = scalar_lea.vmem %s12416_s10, 32 }
  0x21   : > { %12744 = vst [vmem:[#allocation8_spill] sm:$0xff] %v9417_v18  ;;  %12745 = vst [vmem:[#allocation9_spill] sm:$0xff] %v9421_v19  ;;  %v961_v26 = vshll.u32 %v9414_v17, 16  ;;  %v9441_v27 = vcombine.high %v9417_v18, %v9417_v18  ;;  %v9444_v28 = vrot.slane %v297_v20, %v9405_v10  ;;  %v937_v29 = vshll.u32 %v9417_v18, 16  ;;  %p9241_p11 = scmp.ne.s32.totalorder %s12416_s10, %s9240_s24  ;;  %s9307_s16 = smov [#allocation2]  }
  0x22   : > { %12746 = vst [vmem:[#allocation10_spill] sm:$0xff] %v9424_v21  ;;  %12747 = vst [vmem:[#allocation11_spill] sm:$0xff] %v9427_v22  ;;  %v940_v30 = vshrl.u32 %v9417_v18, 16  ;;  %v9450_v31 = vcombine.high %v9427_v22, %v9427_v22  ;;  %v945_v32 = vshll.u32 %v9421_v19, 16  ;;  %v948_v33 = vshrl.u32 %v9421_v19, 16  ;;  %s9244_s25 = sshll.u32 %s9307_s16, 4  ;;  %s9245_s25 = int_to_ptr.vmem [resolvable:$false] %s9244_s25 }
  0x23   : > { %12748 = vst [vmem:[#allocation12_spill] sm:$0xff] %v9431_v23  ;;  %12751 = vst [vmem:[#allocation13_spill] sm:$0xff] %v12750_v24  ;;  %v964_v34 = vshrl.u32 %v9414_v17, 16  ;;  %v939_v35 = vsel %vm9433_vm1, %v932_v25, %v937_v29  ;;  %v953_v36 = vshll.u32 %v9441_v27, 16  ;;  %v956_v37 = vshrl.u32 %v9441_v27, 16  ;;  %p9242_p12 = pnand %p9241_p11, %p9366_p5  ;;  %s9246_s26 = scalar_lea.vmem %s9245_s25, 64 }
  0x24   : > { %12752 = vst [vmem:[#allocation14_spill] sm:$0xff] %v9441_v27  ;;  %12753 = vst [vmem:[#allocation15_spill] sm:$0xff] %v9444_v28  ;;  %v969_v38 = vshll.u32 %v9427_v22, 16  ;;  %v947_v39 = vsel %vm9433_vm1, %v940_v30, %v945_v32  ;;  %v972_v40 = vshrl.u32 %v9427_v22, 16  ;;  %v977_v41 = vshll.u32 %v9431_v23, 16  ;;  %p9247_p0 = scmp.lt.s32.totalorder %s12416_s10, %s9245_s25  ;;  %p9248_p1 = scmp.lt.s32.totalorder %s9246_s26, %s9240_s24 }
  0x25   : > { %12754 = vst [vmem:[#allocation16_spill] sm:$0xff] %v9450_v31  ;;  %v980_v42 = vshrl.u32 %v9431_v23, 16  ;;  %v955_v44 = vsel %vm9433_vm1, %v948_v33, %v953_v36  ;;  %v963_v45 = vsel %vm9433_vm1, %v956_v37, %v961_v26  ;;  %v985_v47 = vshll.u32 %v9450_v31, 16  ;;  %p9243_p13 = pneg %p9242_p12 }
  0x26   : > { %v971_v46 = vsel %vm9433_vm1, %v964_v34, %v969_v38  ;;  %v979_v48 = vsel %vm9433_vm1, %v972_v40, %v977_v41  ;;  %v989_v49 = vshrl.u32 %v9424_v21, 16  ;;  %v994_v50 = vshll.u32 %v9444_v28, 16  ;;  %v7772_v56 = vld.sshfl [vmem:[%s9403_s5 + $0x10] sm:$0x33 pattern:$0x75316420]  ;;  %p9249_p2 = por %p9248_p1, %p9247_p0 }
  0x27   : > { %v1731_v51 = vcombine.low %v939_v35, %v947_v39  ;;  %v987_v53 = vsel %vm9433_vm1, %v980_v42, %v985_v47  ;;  %v1732_v54 = vcombine.low %v955_v44, %v963_v45  ;;  %v1733_v55 = vcombine.low %v971_v46, %v979_v48  ;;  %v7993_v44 = vld [vmem:[%s12457_s1 + $0xa] sm:$0x3] }
  0x28   : > { %v996_v58 = vsel %vm9433_vm1, %v989_v49, %v994_v50  ;;  %v9489_v60 = vcombine.high %v9424_v21, %v9424_v21  ;;  %v9493_v61 = vcombine.high %v9444_v28, %v9444_v28  ;;  %v321_v1 = vcombine.high %v7771_v52, %v7771_v52  ;;  %p9250_p3 = pnand %p9249_p2, %p9243_p13 }
  0x29   : > { %v1741_v59 = vrot.slane %v1731_v51, %v9405_v10  ;;  %v1734_v62 = vcombine.low %v987_v53, %v996_v58  ;;  %v1748_v63 = vrot.slane %v1732_v54, %v9405_v10  ;;  %v1755_v0 = vrot.slane %v1733_v55, %v9405_v10 }
  0x2a   : > { %v9498_v2 = vrot.slane %v7771_v52, %v9405_v10  ;;  %v344_v5 = vcombine.high %v7772_v56, %v7772_v56  ;;  %v9501_v6 = vrot.slane %v7772_v56, %v9405_v10  ;;  %v997_v7 = vshrl.u32 %v9444_v28, 16 }
  0x2b   : > { %v1762_v8 = vrot.slane %v1734_v62, %v9405_v10  ;;  %v1763_v9 = vcombine.low %v1741_v59, %v1748_v63  ;;  %v9506_v11 = vrot.slane %v321_v1, %v9405_v10  ;;  %v1002_v12 = vshll.u32 %v9489_v60, 16  ;;  %v7773_v59 = vld.sshfl [vmem:[%s9403_s5 + $0x14] sm:$0x33 pattern:$0x75316420] }
  0x2c   : > { %12755 = vst [vmem:[#allocation17_spill] sm:$0xff] %v9498_v2  ;;  %v9511_v13 = vcombine.high %v9498_v2, %v9498_v2  ;;  %v9514_v15 = vrot.slane %v344_v5, %v9405_v10  ;;  %v1005_v16 = vshrl.u32 %v9489_v60, 16  ;;  %v1010_v20 = vshll.u32 %v9493_v61, 16 }
  0x2d   : > { %12756 = vst [vmem:[#allocation18_spill] sm:$0xff] %v9506_v11  ;;  %v1764_v25 = vcombine.low %v1755_v0, %v1762_v8  ;;  %v1771_v26 = vrot.slane %v1763_v9, %v9405_v10  ;;  %v9521_v29 = vcombine.high %v9506_v11, %v9506_v11  ;;  %v1004_v30 = vsel %vm9433_vm1, %v997_v7, %v1002_v12 }
  0x2e   : > { %12757 = vst [vmem:[#allocation19_spill] sm:$0xff] %v9511_v13  ;;  %v1012_v32 = vsel %vm9433_vm1, %v1005_v16, %v1010_v20  ;;  %v1013_v33 = vshrl.u32 %v9493_v61, 16  ;;  %v1018_v34 = vshll.u32 %v9498_v2, 16  ;;  %v1021_v35 = vshrl.u32 %v9498_v2, 16 }
  0x2f   : > { %v1778_v36 = vrot.slane %v1764_v25, %v9405_v10  ;;  %v1026_v37 = vshll.u32 %v9506_v11, 16  ;;  %v1029_v38 = vshrl.u32 %v9506_v11, 16  ;;  %v1034_v39 = vshll.u32 %v9511_v13, 16 }
  0x30   : > { %v1020_v40 = vsel %vm9433_vm1, %v1013_v33, %v1018_v34  ;;  %v1037_v41 = vshrl.u32 %v9511_v13, 16  ;;  %v1042_v42 = vshll.u32 %v9521_v29, 16  ;;  %v1046_v43 = vshrl.u32 %v9501_v6, 16 }
  0x31   : > { %v1779_v45 = vcombine.low %v1771_v26, %v1778_v36  ;;  %v1028_v46 = vsel %vm9433_vm1, %v1021_v35, %v1026_v37  ;;  %v1036_v47 = vsel %vm9433_vm1, %v1029_v38, %v1034_v39  ;;  %v1051_v48 = vshll.u32 %v9514_v15, 16  ;;  %v7774_v16 = vld.sshfl [vmem:[%s9403_s5 + $0x18] sm:$0x33 pattern:$0x75316420] }
  0x32   : > { %v1044_v49 = vsel %vm9433_vm1, %v1037_v41, %v1042_v42  ;;  %v4764_v50 = vcombine.low %v996_v58, %v1004_v30  ;;  %v4765_v51 = vcombine.low %v1012_v32, %v1020_v40  ;;  %v4766_v52 = vcombine.low %v1028_v46, %v1036_v47 }
  0x33   : > { %8323 = vmatmul.mubr.msk.bf16.vlgmr.msra.gmra.mrb[0].mxu1 %vm2334_vm2, %v1779_v45  ;;  %v1053_v53 = vsel %vm9433_vm1, %v1046_v43, %v1051_v48  ;;  %v5871_v54 = vsel %vm2374_vm0, %v7993_v44, 0  ;;  %v9555_v55 = vcombine.high %v9501_v6, %v9501_v6  ;;  %v1054_v56 = vshrl.u32 %v9514_v15, 16 }
  0x34   : > { %v4767_v62 = vcombine.low %v1044_v49, %v1053_v53  ;;  %v4774_v58 = vrot.slane %v4764_v50, %v9405_v10  ;;  %v4781_v63 = vrot.slane %v4765_v51, %v9405_v10  ;;  %v4788_v0 = vrot.slane %v4766_v52, %v9405_v10  ;;  %8326 = vmatprep.mubr.msk.bf16.mxu1 %vm9306_vm3, %v12462_v3 }
  0x35   : > { %12758 = vst [vmem:[#allocation20_spill] sm:$0xff] %v9555_v55  ;;  %v1059_v1 = vshll.u32 %v9555_v55, 16  ;;  %v1780_v5 = vcombine.low %v1004_v30, %v1012_v32  ;;  %v1781_v7 = vcombine.low %v1020_v40, %v1028_v46  ;;  %v1782_v8 = vcombine.low %v1036_v47, %v1044_v49  ;;  %8375 = vmatpush3.bf16.msra.mxu1 %v3157_v57 }
  0x36   : > { %v4795_v9 = vrot.slane %v4767_v62, %v9405_v10  ;;  %v4796_v12 = vcombine.low %v4774_v58, %v4781_v63  ;;  %v9569_v20 = vcombine.high %v9514_v15, %v9514_v15  ;;  %v368_v25 = vcombine.high %v7773_v59, %v7773_v59  ;;  %8428 = vmatprep.subr.bf16.mxu1 %v12462_v3 }
  0x37   : > { %v1061_v26 = vsel %vm9433_vm1, %v1054_v56, %v1059_v1  ;;  %v1790_v33 = vrot.slane %v1780_v5, %v9405_v10  ;;  %v1797_v30 = vrot.slane %v1781_v7, %v9405_v10  ;;  %v1804_v57 = vrot.slane %v1782_v8, %v9405_v10 }
  0x38   : > { %12759 = vst [vmem:[#allocation21_spill] sm:$0xff] %v9569_v20  ;;  %v4797_v32 = vcombine.low %v4788_v0, %v4795_v9  ;;  %v4804_v34 = vrot.slane %v4796_v12, %v9405_v10  ;;  %v1783_v35 = vcombine.low %v1053_v53, %v1061_v26  ;;  %v9579_v36 = vrot.slane %v7773_v59, %v9405_v10 }
  0x39   : > { %v1812_v37 = vcombine.low %v1790_v33, %v1797_v30  ;;  %v9582_v38 = vrot.slane %v368_v25, %v9405_v10  ;;  %v391_v39 = vcombine.high %v7774_v16, %v7774_v16  ;;  %v9585_v40 = vrot.slane %v7774_v16, %v9405_v10 }
  0x3a   : > { %12760 = vst [vmem:[#allocation22_spill] sm:$0xff] %v9579_v36  ;;  %v4811_v41 = vrot.slane %v4797_v32, %v9405_v10  ;;  %v9589_v42 = vrot.slane %v1783_v35, %v9405_v10  ;;  %v9593_v43 = vcombine.high %v9579_v36, %v9579_v36  ;;  %v1062_v44 = vshrl.u32 %v9555_v55, 16 }
  0x3b   : > { %12761 = vst [vmem:[#allocation23_spill] sm:$0xff] %v9582_v38  ;;  %12762 = vst [vmem:[#allocation24_spill] sm:$0xff] %v9585_v40  ;;  %v1820_v45 = vrot.slane %v1812_v37, %v9405_v10  ;;  %v9598_v46 = vrot.slane %v391_v39, %v9405_v10  ;;  %v9602_v47 = vcombine.high %v9585_v40, %v9585_v40  ;;  %v1067_v51 = vshll.u32 %v9569_v20, 16 }
  0x3c   : > { %12763 = vst [vmem:[#allocation25_spill] sm:$0xff] %v9589_v42  ;;  %12764 = vst [vmem:[#allocation26_spill] sm:$0xff] %v9593_v43  ;;  %v9606_v48 = vcombine.high %v9582_v38, %v9582_v38  ;;  %v4812_v49 = vcombine.low %v4804_v34, %v4811_v41  ;;  %v1813_v50 = vcombine.low %v1804_v57, %v9589_v42  ;;  %v1070_v52 = vshrl.u32 %v9569_v20, 16 }
  0x3d   : > { %12765 = vst [vmem:[#allocation27_spill] sm:$0xff] %v9598_v46  ;;  %v1075_v53 = vshll.u32 %v9579_v36, 16  ;;  %v1078_v56 = vshrl.u32 %v9579_v36, 16  ;;  %v1083_v59 = vshll.u32 %v9582_v38, 16  ;;  %v1086_v62 = vshrl.u32 %v9582_v38, 16 }
  0x3e   : > { %12766 = vst [vmem:[#allocation28_spill] sm:$0xff] %v9606_v48  ;;  %8539 = vmatmul.mubr.msk.bf16.vlgmr.msra.gmra.mrb[0].mxu0 %vm2334_vm2, %v4812_v49  ;;  %v1827_v58 = vrot.slane %v1813_v50, %v9405_v10  ;;  %v1069_v63 = vsel %vm9433_vm1, %v1062_v44, %v1067_v51  ;;  %v1091_v0 = vshll.u32 %v9593_v43, 16  ;;  %v1094_v1 = vshrl.u32 %v9593_v43, 16 }
  0x3f   : > { %8591 = vmatpush3.bf16.msra.mxu0 %v5871_v54  ;;  %8542 = vmatprep.mubr.msk.bf16.mxu0 %vm9306_vm3, %v12462_v3  ;;  %v1077_v5 = vsel %vm9433_vm1, %v1070_v52, %v1075_v53  ;;  %v1085_v7 = vsel %vm9433_vm1, %v1078_v56, %v1083_v59  ;;  %v1099_v8 = vshll.u32 %v9606_v48, 16  ;;  %v1103_v9 = vshrl.u32 %v9585_v40, 16  ;;  %v7775_v41 = vld.sshfl [vmem:[%s9403_s5 + $0x1c] sm:$0x33 pattern:$0x75316420] }
  0x40   : > { %v1828_v12 = vcombine.low %v1820_v45, %v1827_v58  ;;  %v1093_v16 = vsel %vm9433_vm1, %v1086_v62, %v1091_v0  ;;  %v1108_v54 = vshll.u32 %v9598_v46, 16  ;;  %v1111_v25 = vshrl.u32 %v9598_v46, 16  ;;  %8644 = vmatprep.subr.bf16.mxu0 %v12462_v3  ;;  %v7778_v20 = vld.sshfl [vmem:[%s9403_s5 + $0x28] sm:$0x33 pattern:$0x75316420] }
  0x41   : > { %v1101_v33 = vsel %vm9433_vm1, %v1094_v1, %v1099_v8  ;;  %v1116_v30 = vshll.u32 %v9602_v47, 16  ;;  %v4813_v57 = vcombine.low %v1061_v26, %v1069_v63  ;;  %v4814_v32 = vcombine.low %v1077_v5, %v1085_v7 }
  0x42   : > { %8327 = vmatmul.mubr.msk.bf16.gmra.mrb[4].mxu1 %vm2334_vm2, %v1828_v12  ;;  %v1110_v34 = vsel %vm9433_vm1, %v1103_v9, %v1108_v54  ;;  %v4815_v35 = vcombine.low %v1093_v16, %v1101_v33  ;;  %v9642_v37 = vcombine.high %v9598_v46, %v9598_v46  ;;  %v1119_v39 = vshrl.u32 %v9602_v47, 16 }
  0x43   : > { %v1118_v44 = vsel %vm9433_vm1, %v1111_v25, %v1116_v30  ;;  %v4823_v26 = vrot.slane %v4813_v57, %v9405_v10  ;;  %v4830_v45 = vrot.slane %v4814_v32, %v9405_v10  ;;  %8330 = vmatprep.mubr.msk.bf16.mxu1 %vm9306_vm3, %v12462_v3  ;;  %v1829_v49 = vcombine.low %v1069_v63, %v1077_v5  ;;  %v7776_v63 = vld.sshfl [vmem:[%s9403_s5 + $0x20] sm:$0x33 pattern:$0x75316420] }
  0x44   : > { %v4816_v50 = vcombine.low %v1110_v34, %v1118_v44  ;;  %v4837_v51 = vrot.slane %v4815_v35, %v9405_v10  ;;  %v1124_v52 = vshll.u32 %v9642_v37, 16  ;;  %v1830_v53 = vcombine.low %v1085_v7, %v1093_v16  ;;  %v7777_v30 = vld.sshfl [vmem:[%s9403_s5 + $0x24] sm:$0x33 pattern:$0x75316420] }
  0x45   : > { %v4845_v56 = vcombine.low %v4823_v26, %v4830_v45  ;;  %v1831_v59 = vcombine.low %v1101_v33, %v1110_v34  ;;  %v9655_v62 = vrot.slane %v1829_v49, %v9405_v10  ;;  %v415_v58 = vcombine.high %v7775_v41, %v7775_v41 }
  0x46   : > { %v4844_v0 = vrot.slane %v4816_v50, %v9405_v10  ;;  %v1126_v1 = vsel %vm9433_vm1, %v1119_v39, %v1124_v52  ;;  %v9661_v8 = vrot.slane %v1830_v53, %v9405_v10  ;;  %v9665_v5 = vrot.slane %v7775_v41, %v9405_v10 }
  0x47   : > { %12767 = vst [vmem:[#allocation29_spill] sm:$0xff] %v9655_v62  ;;  %v1832_v9 = vcombine.low %v1118_v44, %v1126_v1  ;;  %v9668_v7 = vrot.slane %v1831_v59, %v9405_v10  ;;  %v4853_v54 = vrot.slane %v4845_v56, %v9405_v10  ;;  %v9676_v33 = vrot.slane %v415_v58, %v9405_v10 }
  0x48   : > { %12768 = vst [vmem:[#allocation30_spill] sm:$0xff] %v9661_v8  ;;  %12769 = vst [vmem:[#allocation31_spill] sm:$0xff] %v9665_v5  ;;  %v4846_v16 = vcombine.low %v4837_v51, %v4844_v0  ;;  %v1861_v25 = vcombine.low %v9655_v62, %v9661_v8  ;;  %v438_v34 = vcombine.high %v7776_v63, %v7776_v63  ;;  %v1127_v50 = vshrl.u32 %v9642_v37, 16 }
  0x49   : > { %12770 = vst [vmem:[#allocation32_spill] sm:$0xff] %v9668_v7  ;;  %12771 = vst [vmem:[#allocation33_spill] sm:$0xff] %v9676_v33  ;;  %v9681_v57 = vrot.slane %v1832_v9, %v9405_v10  ;;  %v9688_v39 = vcombine.high %v9665_v5, %v9665_v5  ;;  %v9691_v41 = vrot.slane %v7776_v63, %v9405_v10  ;;  %v1132_v53 = vshll.u32 %v9665_v5, 16 }
  0x4a   : > { %v4860_v35 = vrot.slane %v4846_v16, %v9405_v10  ;;  %v9695_v44 = vcombine.high %v9676_v33, %v9676_v33  ;;  %v1869_v45 = vrot.slane %v1861_v25, %v9405_v10  ;;  %v9701_v49 = vrot.slane %v438_v34, %v9405_v10 }
  0x4b   : > { %12772 = vst [vmem:[#allocation34_spill] sm:$0xff] %v9681_v57  ;;  %12773 = vst [vmem:[#allocation35_spill] sm:$0xff] %v9688_v39  ;;  %v1862_v26 = vcombine.low %v9668_v7, %v9681_v57  ;;  %v9706_v52 = vcombine.high %v9691_v41, %v9691_v41  ;;  %v1135_v56 = vshrl.u32 %v9665_v5, 16  ;;  %v1140_v0 = vshll.u32 %v9676_v33, 16 }
  0x4c   : > { %12774 = vst [vmem:[#allocation36_spill] sm:$0xff] %v9691_v41  ;;  %12775 = vst [vmem:[#allocation37_spill] sm:$0xff] %v9701_v49  ;;  %v4861_v51 = vcombine.low %v4853_v54, %v4860_v35  ;;  %v9713_v58 = vcombine.high %v9701_v49, %v9701_v49  ;;  %v1143_v63 = vshrl.u32 %v9676_v33, 16  ;;  %v1134_v9 = vsel %vm9433_vm1, %v1127_v50, %v1132_v53 }
  0x4d   : > { %12776 = vst [vmem:[#allocation38_spill] sm:$0xff] %v9706_v52  ;;  %v1876_v59 = vrot.slane %v1862_v26, %v9405_v10  ;;  %v1148_v16 = vshll.u32 %v9688_v39, 16  ;;  %v1151_v54 = vshrl.u32 %v9688_v39, 16  ;;  %v1156_v25 = vshll.u32 %v9695_v44, 16 }
  0x4e   : > { %12777 = vst [vmem:[#allocation39_spill] sm:$0xff] %v9713_v58  ;;  %8543 = vmatmul.mubr.msk.bf16.gmra.mrb[4].mxu0 %vm2334_vm2, %v4861_v51  ;;  %v1142_v35 = vsel %vm9433_vm1, %v1135_v56, %v1140_v0  ;;  %v1160_v26 = vshrl.u32 %v9691_v41, 16  ;;  %v1165_v51 = vshll.u32 %v9701_v49, 16  ;;  %v1168_v32 = vshrl.u32 %v9701_v49, 16 }
  0x4f   : > { %8546 = vmatprep.mubr.msk.bf16.mxu0 %vm9306_vm3, %v12462_v3  ;;  %v1877_v34 = vcombine.low %v1869_v45, %v1876_v59  ;;  %v1150_v50 = vsel %vm9433_vm1, %v1143_v63, %v1148_v16  ;;  %v1158_v53 = vsel %vm9433_vm1, %v1151_v54, %v1156_v25  ;;  %v1173_v12 = vshll.u32 %v9706_v52, 16 }
  0x50   : > { %v1167_v45 = vsel %vm9433_vm1, %v1160_v26, %v1165_v51  ;;  %v1176_v56 = vshrl.u32 %v9706_v52, 16  ;;  %v1181_v59 = vshll.u32 %v9713_v58, 16  ;;  %v4862_v0 = vcombine.low %v1126_v1, %v1134_v9 }
  0x51   : > { %8331 = vmatmul.mubr.msk.bf16.gmra.mrb[8].mxu1 %vm2334_vm2, %v1877_v34  ;;  %v1175_v63 = vsel %vm9433_vm1, %v1168_v32, %v1173_v12  ;;  %v4863_v16 = vcombine.low %v1142_v35, %v1150_v50  ;;  %v4864_v54 = vcombine.low %v1158_v53, %v1167_v45  ;;  %v9746_v25 = vrot.slane %v7777_v30, %v9405_v10 }
  0x52   : > { %8334 = vmatprep.mubr.msk.bf16.mxu1 %vm9306_vm3, %v12462_v3  ;;  %v1183_v34 = vsel %vm9433_vm1, %v1176_v56, %v1181_v59  ;;  %v4872_v26 = vrot.slane %v4862_v0, %v9405_v10  ;;  %v1184_v1 = vshrl.u32 %v9713_v58, 16  ;;  %v1878_v51 = vcombine.low %v1134_v9, %v1142_v35  ;;  %v7779_v35 = vld.sshfl [vmem:[%s9403_s5 + $0x2c] sm:$0x33 pattern:$0x75316420] }
  0x53   : > { %12778 = vst [vmem:[#allocation40_spill] sm:$0xff] %v9746_v25  ;;  %v4865_v4 = vcombine.low %v1175_v63, %v1183_v34  ;;  %v4879_v12 = vrot.slane %v4863_v16, %v9405_v10  ;;  %v4886_v32 = vrot.slane %v4864_v54, %v9405_v10  ;;  %v1189_v57 = vshll.u32 %v9746_v25, 16 }
  0x54   : > { %v1879_v3 = vcombine.low %v1150_v50, %v1158_v53  ;;  %v1880_v52 = vcombine.low %v1167_v45, %v1175_v63  ;;  %v9756_v48 = vrot.slane %v1878_v51, %v9405_v10  ;;  %v462_v56 = vcombine.high %v7777_v30, %v7777_v30 }
  0x55   : > { %v4893_v59 = vrot.slane %v4865_v4, %v9405_v10  ;;  %v4894_v0 = vcombine.low %v4872_v26, %v4879_v12  ;;  %v1191_v9 = vsel %vm9433_vm1, %v1184_v1, %v1189_v57  ;;  %v9765_v16 = vcombine.high %v9746_v25, %v9746_v25 }
  0x56   : > { %12779 = vst [vmem:[#allocation41_spill] sm:$0xff] %v9756_v48  ;;  %v1881_v54 = vcombine.low %v1183_v34, %v1191_v9  ;;  %v9768_v50 = vrot.slane %v1879_v3, %v9405_v10  ;;  %v9771_v53 = vrot.slane %v1880_v52, %v9405_v10  ;;  %v9774_v30 = vrot.slane %v462_v56, %v9405_v10 }
  0x57   : > { %12780 = vst [vmem:[#allocation42_spill] sm:$0xff] %v9765_v16  ;;  %v4895_v4 = vcombine.low %v4886_v32, %v4893_v59  ;;  %v4902_v45 = vrot.slane %v4894_v0, %v9405_v10  ;;  %v485_v63 = vcombine.high %v7778_v20, %v7778_v20  ;;  %v9778_v57 = vrot.slane %v7778_v20, %v9405_v10 }
  0x58   : > { %12781 = vst [vmem:[#allocation43_spill] sm:$0xff] %v9768_v50  ;;  %12782 = vst [vmem:[#allocation44_spill] sm:$0xff] %v9771_v53  ;;  %v9781_v26 = vrot.slane %v1881_v54, %v9405_v10  ;;  %v1910_v3 = vcombine.low %v9756_v48, %v9768_v50  ;;  %v9786_v34 = vrot.slane %v7779_v35, %v9405_v10  ;;  %v1192_v12 = vshrl.u32 %v9746_v25, 16 }
  0x59   : > { %12783 = vst [vmem:[#allocation45_spill] sm:$0xff] %v9774_v30  ;;  %12784 = vst [vmem:[#allocation46_spill] sm:$0xff] %v9778_v57  ;;  %v9790_v52 = vcombine.high %v9774_v30, %v9774_v30  ;;  %v4909_v1 = vrot.slane %v4895_v4, %v9405_v10  ;;  %v9794_v51 = vrot.slane %v485_v63, %v9405_v10  ;;  %v1197_v59 = vshll.u32 %v9774_v30, 16 }
  0x5a   : > { %12785 = vst [vmem:[#allocation47_spill] sm:$0xff] %v9781_v26  ;;  %12786 = vst [vmem:[#allocation48_spill] sm:$0xff] %v9786_v34  ;;  %v9798_v20 = vcombine.high %v9778_v57, %v9778_v57  ;;  %v1911_v32 = vcombine.low %v9771_v53, %v9781_v26  ;;  %v1918_v56 = vrot.slane %v1910_v3, %v9405_v10  ;;  %v1200_v0 = vshrl.u32 %v9774_v30, 16 }
  0x5b   : > { %12787 = vst [vmem:[#allocation49_spill] sm:$0xff] %v9790_v52  ;;  %12788 = vst [vmem:[#allocation50_spill] sm:$0xff] %v9794_v51  ;;  %v4910_v54 = vcombine.low %v4902_v45, %v4909_v1  ;;  %v9808_v4 = vcombine.high %v9794_v51, %v9794_v51  ;;  %v1205_v63 = vshll.u32 %v9765_v16, 16  ;;  %v1208_v50 = vshrl.u32 %v9765_v16, 16 }
  0x5c   : > { %v1925_v48 = vrot.slane %v1911_v32, %v9405_v10  ;;  %v1199_v26 = vsel %vm9433_vm1, %v1192_v12, %v1197_v59  ;;  %v1213_v3 = vshll.u32 %v9790_v52, 16  ;;  %v1217_v53 = vshrl.u32 %v9778_v57, 16 }
  0x5d   : > { %8547 = vmatmul.mubr.msk.bf16.gmra.mrb[8].mxu0 %vm2334_vm2, %v4910_v54  ;;  %v1207_v45 = vsel %vm9433_vm1, %v1200_v0, %v1205_v63  ;;  %v1222_v1 = vshll.u32 %v9794_v51, 16  ;;  %v1225_v58 = vshrl.u32 %v9794_v51, 16  ;;  %v1230_v55 = vshll.u32 %v9798_v20, 16 }
  0x5e   : > { %v12789_v27 = vmov 0.0   ;;  %v1926_v32 = vcombine.low %v1918_v56, %v1925_v48  ;;  %v1215_v12 = vsel %vm9433_vm1, %v1208_v50, %v1213_v3  ;;  %v1233_v59 = vshrl.u32 %v9798_v20, 16 }
  0x5f   : > { %8550 = vmatprep.mubr.msk.bf16.mxu0 %vm9306_vm3, %v12789_v27  ;;  %v1238_v54 = vshll.u32 %v9808_v4, 16  ;;  %v1224_v0 = vsel %vm9433_vm1, %v1217_v53, %v1222_v1  ;;  %v1232_v63 = vsel %vm9433_vm1, %v1225_v58, %v1230_v55  ;;  %v1241_v52 = vshrl.u32 %v9808_v4, 16  ;;  %v7780_v1 = vld.sshfl [vmem:[%s9403_s5 + $0x30] sm:$0x33 pattern:$0x75316420] }
  0x60   : > { %v1246_v19 = vshll.u32 %v9786_v34, 16  ;;  %8335 = vmatmul.mubr.msk.bf16.gmra.mrb[12].mxu1 %vm2334_vm2, %v1926_v32  ;;  %v4911_v50 = vcombine.low %v1191_v9, %v1199_v26  ;;  %v4912_v56 = vcombine.low %v1207_v45, %v1215_v12  ;;  %v4913_v3 = vcombine.low %v1224_v0, %v1232_v63 }
  0x61   : > { %v1240_v48 = vsel %vm9433_vm1, %v1233_v59, %v1238_v54  ;;  %8338 = vmatprep.mubr.msk.bf16.mxu1 %vm9306_vm3, %v12789_v27  ;;  %v509_v55 = vcombine.high %v7779_v35, %v7779_v35  ;;  %v1249_v58 = vshrl.u32 %v9786_v34, 16  ;;  %v1927_v53 = vcombine.low %v1199_v26, %v1207_v45  ;;  %v7781_v35 = vld.sshfl [vmem:[%s9403_s5 + $0x34] sm:$0x33 pattern:$0x75316420] }
  0x62   : > { %v1248_v31 = vsel %vm9433_vm1, %v1241_v52, %v1246_v19  ;;  %v4921_v32 = vrot.slane %v4911_v50, %v9405_v10  ;;  %v4928_v59 = vrot.slane %v4912_v56, %v9405_v10  ;;  %v4935_v9 = vrot.slane %v4913_v3, %v9405_v10 }
  0x63   : > { %v4914_v7 = vcombine.low %v1240_v48, %v1248_v31  ;;  %v9848_v54 = vrot.slane %v509_v55, %v9405_v10  ;;  %v1928_v8 = vcombine.low %v1215_v12, %v1224_v0  ;;  %v1929_v19 = vcombine.low %v1232_v63, %v1240_v48 }
  0x64   : > { %v9851_v52 = vrot.slane %v1927_v53, %v9405_v10  ;;  %v4943_v26 = vcombine.low %v4921_v32, %v4928_v59  ;;  %v9857_v45 = vcombine.high %v9786_v34, %v9786_v34  ;;  %v532_v50 = vcombine.high %v7780_v1, %v7780_v1 }
  0x65   : > { %12790 = vst [vmem:[#allocation51_spill] sm:$0xff] %v9848_v54  ;;  %v4942_v62 = vrot.slane %v4914_v7, %v9405_v10  ;;  %v1254_v56 = vshll.u32 %v9848_v54, 16  ;;  %v9861_v3 = vrot.slane %v1928_v8, %v9405_v10  ;;  %v9864_v12 = vrot.slane %v1929_v19, %v9405_v10 }
  0x66   : > { %12791 = vst [vmem:[#allocation52_spill] sm:$0xff] %v9851_v52  ;;  %12792 = vst [vmem:[#allocation53_spill] sm:$0xff] %v9857_v45  ;;  %v9867_v0 = vrot.slane %v7780_v1, %v9405_v10  ;;  %v4951_v7 = vrot.slane %v4943_v26, %v9405_v10  ;;  %v9871_v48 = vrot.slane %v532_v50, %v9405_v10  ;;  %v1257_v50 = vshrl.u32 %v9848_v54, 16 }
  0x67   : > { %12793 = vst [vmem:[#allocation54_spill] sm:$0xff] %v9861_v3  ;;  %12794 = vst [vmem:[#allocation55_spill] sm:$0xff] %v9864_v12  ;;  %v4944_v63 = vcombine.low %v4935_v9, %v4942_v62  ;;  %v556_v55 = vcombine.high %v7781_v35, %v7781_v35  ;;  %v1256_v53 = vsel %vm9433_vm1, %v1249_v58, %v1254_v56 }
  0x68   : > { %12795 = vst [vmem:[#allocation56_spill] sm:$0xff] %v9867_v0  ;;  %12796 = vst [vmem:[#allocation57_spill] sm:$0xff] %v9871_v48  ;;  %v1959_v8 = vcombine.low %v9851_v52, %v9861_v3  ;;  %v9879_v32 = vcombine.high %v9867_v0, %v9867_v0  ;;  %v9882_v1 = vrot.slane %v7781_v35, %v9405_v10  ;;  %v1262_v35 = vshll.u32 %v9857_v45, 16 }
  0x69   : > { %v4958_v62 = vrot.slane %v4944_v63, %v9405_v10  ;;  %v1930_v59 = vcombine.low %v1248_v31, %v1256_v53  ;;  %v9887_v9 = vcombine.high %v9871_v48, %v9871_v48  ;;  %v9890_v19 = vrot.slane %v556_v55, %v9405_v10 }
  0x6a   : > { %12797 = vst [vmem:[#allocation58_spill] sm:$0xff] %v9879_v32  ;;  %12798 = vst [vmem:[#allocation59_spill] sm:$0xff] %v9882_v1  ;;  %v1967_v58 = vrot.slane %v1959_v8, %v9405_v10  ;;  %v9895_v26 = vcombine.high %v9848_v54, %v9848_v54  ;;  %v1265_v63 = vshrl.u32 %v9857_v45, 16  ;;  %v1274_v3 = vshrl.u32 %v9867_v0, 16 }
  0x6b   : > { %12799 = vst [vmem:[#allocation60_spill] sm:$0xff] %v9887_v9  ;;  %12800 = vst [vmem:[#allocation61_spill] sm:$0xff] %v9890_v19  ;;  %v4959_v56 = vcombine.low %v4951_v7, %v4958_v62  ;;  %v9900_v31 = vrot.slane %v1930_v59, %v9405_v10  ;;  %v1264_v55 = vsel %vm9433_vm1, %v1257_v50, %v1262_v35  ;;  %v1279_v52 = vshll.u32 %v9871_v48, 16 }
  0x6c   : > { %v1270_v8 = vshll.u32 %v9895_v26, 16  ;;  %v1282_v42 = vshrl.u32 %v9871_v48, 16  ;;  %v1287_v62 = vshll.u32 %v9879_v32, 16  ;;  %v1290_v59 = vshrl.u32 %v9879_v32, 16 }
  0x6d   : > { %12801 = vst [vmem:[#allocation62_spill] sm:$0xff] %v9900_v31  ;;  %8551 = vmatmul.mubr.msk.bf16.gmra.mrb[12].mxu0 %vm2334_vm2, %v4959_v56  ;;  %v1960_v7 = vcombine.low %v9864_v12, %v9900_v31  ;;  %v1295_v16 = vshll.u32 %v9887_v9, 16  ;;  %v1281_v35 = vsel %vm9433_vm1, %v1274_v3, %v1279_v52  ;;  %v1298_v56 = vshrl.u32 %v9887_v9, 16 }
  0x6e   : > { %8554 = vmatprep.mubr.msk.bf16.mxu0 %vm9306_vm3, %v12789_v27  ;;  %v1272_v50 = vsel %vm9433_vm1, %v1265_v63, %v1270_v8  ;;  %v1303_v31 = vshll.u32 %v9882_v1, 16  ;;  %v1289_v32 = vsel %vm9433_vm1, %v1282_v42, %v1287_v62  ;;  %v1306_v43 = vshrl.u32 %v9882_v1, 16  ;;  %v7782_v62 = vld.sshfl [vmem:[%s9403_s5 + $0x38] sm:$0x33 pattern:$0x75316420] }
  0x6f   : > { %v1974_v12 = vrot.slane %v1960_v7, %v9405_v10  ;;  %v1297_v57 = vsel %vm9433_vm1, %v1290_v59, %v1295_v16  ;;  %v1311_v8 = vshll.u32 %v9890_v19, 16  ;;  %v4960_v52 = vcombine.low %v1256_v53, %v1264_v55 }
  0x70   : > { %v1305_v63 = vsel %vm9433_vm1, %v1298_v56, %v1303_v31  ;;  %v4961_v3 = vcombine.low %v1272_v50, %v1281_v35  ;;  %v4962_v40 = vcombine.low %v1289_v32, %v1297_v57  ;;  %v9934_v7 = vcombine.high %v9882_v1, %v9882_v1 }
  0x71   : > { %v1975_v9 = vcombine.low %v1967_v58, %v1974_v12  ;;  %v1314_v42 = vshrl.u32 %v9890_v19, 16  ;;  %v1313_v16 = vsel %vm9433_vm1, %v1306_v43, %v1311_v8  ;;  %v4970_v59 = vrot.slane %v4960_v52, %v9405_v10  ;;  %v7783_v8 = vld.sshfl [vmem:[%s9403_s5 + $0x3c] sm:$0x33 pattern:$0x75316420] }
  0x72   : > { %12802 = vst [vmem:[#allocation63_spill] sm:$0xff] %v9934_v7  ;;  %v4977_v31 = vrot.slane %v4961_v3, %v9405_v10  ;;  %v1976_v56 = vcombine.low %v1264_v55, %v1272_v50  ;;  %v4963_v12 = vcombine.low %v1305_v63, %v1313_v16  ;;  %v4984_v53 = vrot.slane %v4962_v40, %v9405_v10 }
  0x73   : > { %8339 = vmatmul.mubr.msk.bf16.gmra.mrb[16].mxu1 %vm2334_vm2, %v1975_v9  ;;  %v1319_v58 = vshll.u32 %v9934_v7, 16  ;;  %v1977_v23 = vcombine.low %v1281_v35, %v1289_v32  ;;  %v1978_v17 = vcombine.low %v1297_v57, %v1305_v63  ;;  %v579_v52 = vcombine.high %v7782_v62, %v7782_v62 }
  0x74   : > { %v4992_v21 = vcombine.low %v4970_v59, %v4977_v31  ;;  %8342 = vmatprep.mubr.msk.bf16.mxu1 %vm9306_vm3, %v12789_v27  ;;  %v9948_v43 = vrot.slane %v1976_v56, %v9405_v10  ;;  %v4991_v55 = vrot.slane %v4963_v12, %v9405_v10  ;;  %v9958_v32 = vrot.slane %v7782_v62, %v9405_v10 }
  0x75   : > { %v1321_v9 = vsel %vm9433_vm1, %v1314_v42, %v1319_v58  ;;  %v9955_v40 = vrot.slane %v1977_v23, %v9405_v10  ;;  %v9962_v57 = vrot.slane %v1978_v17, %v9405_v10  ;;  %v9965_v63 = vrot.slane %v579_v52, %v9405_v10 }
  0x76   : > { %12803 = vst [vmem:[#allocation64_spill] sm:$0xff] %v9948_v43  ;;  %12805 = vst [vmem:[#allocation66_spill] sm:$0xff] %v9958_v32  ;;  %v5000_v50 = vrot.slane %v4992_v21, %v9405_v10  ;;  %v1979_v35 = vcombine.low %v1313_v16, %v1321_v9  ;;  %v4993_v3 = vcombine.low %v4984_v53, %v4991_v55  ;;  %v1322_v53 = vshrl.u32 %v9934_v7, 16 }
  0x77   : > { %12804 = vst [vmem:[#allocation65_spill] sm:$0xff] %v9955_v40  ;;  %12806 = vst [vmem:[#allocation67_spill] sm:$0xff] %v9962_v57  ;;  %v2008_v59 = vcombine.low %v9948_v43, %v9955_v40  ;;  %v9971_v23 = vcombine.high %v9958_v32, %v9958_v32  ;;  %v603_v42 = vcombine.high %v7783_v8, %v7783_v8  ;;  %v1331_v55 = vshrl.u32 %v9958_v32, 16 }
  0x78   : > { %12807 = vst [vmem:[#allocation68_spill] sm:$0xff] %v9965_v63  ;;  %v9974_v62 = vrot.slane %v1979_v35, %v9405_v10  ;;  %v9978_v21 = vcombine.high %v9965_v63, %v9965_v63  ;;  %v9981_v17 = vrot.slane %v7783_v8, %v9405_v10  ;;  %v9985_v16 = vcombine.high %v9890_v19, %v9890_v19  ;;  %v7784_v32 = vld.sshfl [vmem:[%s9403_s5 + $0x40] sm:$0x33 pattern:$0x75316420] }
  0x79   : > { %v5007_v31 = vrot.slane %v4993_v3, %v9405_v10  ;;  %v2016_v56 = vrot.slane %v2008_v59, %v9405_v10  ;;  %v9990_v12 = vrot.slane %v603_v42, %v9405_v10  ;;  %v1336_v3 = vshll.u32 %v9965_v63, 16 }
  0x7a   : > { %12808 = vst [vmem:[#allocation69_spill] sm:$0xff] %v9974_v62  ;;  %12809 = vst [vmem:[#allocation70_spill] sm:$0xff] %v9978_v21  ;;  %v2009_v58 = vcombine.low %v9962_v57, %v9974_v62  ;;  %v9997_v8 = vcombine.high %v9981_v17, %v9981_v17  ;;  %v1327_v52 = vshll.u32 %v9985_v16, 16  ;;  %v1339_v59 = vshrl.u32 %v9965_v63, 16 }
  0x7b   : > { %12810 = vst [vmem:[#allocation71_spill] sm:$0xff] %v9981_v17  ;;  %12811 = vst [vmem:[#allocation72_spill] sm:$0xff] %v9985_v16  ;;  %v5008_v35 = vcombine.low %v5000_v50, %v5007_v31  ;;  %v1344_v42 = vshll.u32 %v9971_v23, 16  ;;  %v1347_v57 = vshrl.u32 %v9971_v23, 16  ;;  %v1352_v43 = vshll.u32 %v9978_v21, 16 }
  0x7c   : > { %12812 = vst [vmem:[#allocation73_spill] sm:$0xff] %v9990_v12  ;;  %12813 = vst [vmem:[#allocation74_spill] sm:$0xff] %v9997_v8  ;;  %v2023_v40 = vrot.slane %v2009_v58, %v9405_v10  ;;  %v1329_v62 = vsel %vm9433_vm1, %v1322_v53, %v1327_v52  ;;  %v1338_v50 = vsel %vm9433_vm1, %v1331_v55, %v1336_v3  ;;  %v1355_v16 = vshrl.u32 %v9978_v21, 16 }
  0x7d   : > { %8555 = vmatmul.mubr.msk.bf16.gmra.mrb[16].mxu0 %vm2334_vm2, %v5008_v35  ;;  %v1346_v31 = vsel %vm9433_vm1, %v1339_v59, %v1344_v42  ;;  %v1360_v58 = vshll.u32 %v9981_v17, 16  ;;  %v1354_v52 = vsel %vm9433_vm1, %v1347_v57, %v1352_v43  ;;  %v1363_v35 = vshrl.u32 %v9981_v17, 16 }
  0x7e   : > { %8558 = vmatprep.mubr.msk.bf16.mxu0 %vm9306_vm3, %v12789_v27  ;;  %v2024_v53 = vcombine.low %v2016_v56, %v2023_v40  ;;  %v1368_v7 = vshll.u32 %v9990_v12, 16  ;;  %v1371_v3 = vshrl.u32 %v9990_v12, 16  ;;  %v1376_v59 = vshll.u32 %v9997_v8, 16 }
  0x7f   : > { %v1362_v55 = vsel %vm9433_vm1, %v1355_v16, %v1360_v58  ;;  %v5009_v42 = vcombine.low %v1321_v9, %v1329_v62  ;;  %v5010_v56 = vcombine.low %v1338_v50, %v1346_v31  ;;  %v10031_v57 = vcombine.high %v9990_v12, %v9990_v12 }
  0x80   : > { %8343 = vmatmul.mubr.msk.bf16.gmra.mrb[20].mxu1 %vm2334_vm2, %v2024_v53  ;;  %v1370_v40 = vsel %vm9433_vm1, %v1363_v35, %v1368_v7  ;;  %v5011_v43 = vcombine.low %v1354_v52, %v1362_v55  ;;  %v1378_v16 = vsel %vm9433_vm1, %v1371_v3, %v1376_v59  ;;  %v1379_v9 = vshrl.u32 %v9997_v8, 16  ;;  %v7785_v3 = vld.sshfl [vmem:[%s9403_s5 + $0x44] sm:$0x33 pattern:$0x75316420] }
  0x81   : > { %12814 = vst [vmem:[#allocation75_spill] sm:$0xff] %v10031_v57  ;;  %v5019_v58 = vrot.slane %v5009_v42, %v9405_v10  ;;  %8346 = vmatprep.mubr.msk.bf16.mxu1 %vm9306_vm3, %v12789_v27  ;;  %v2025_v53 = vcombine.low %v1329_v62, %v1338_v50  ;;  %v5012_v7 = vcombine.low %v1370_v40, %v1378_v16  ;;  %v1384_v14 = vshll.u32 %v10031_v57, 16 }
  0x82   : > { %v5026_v35 = vrot.slane %v5010_v56, %v9405_v10  ;;  %v5033_v22 = vrot.slane %v5011_v43, %v9405_v10  ;;  %v2026_v18 = vcombine.low %v1346_v31, %v1354_v52  ;;  %v2027_v12 = vcombine.low %v1362_v55, %v1370_v40 }
  0x83   : > { %v10044_v21 = vrot.slane %v2025_v53, %v9405_v10  ;;  %v626_v59 = vcombine.high %v7784_v32, %v7784_v32  ;;  %v5040_v42 = vrot.slane %v5012_v7, %v9405_v10  ;;  %v1386_v62 = vsel %vm9433_vm1, %v1379_v9, %v1384_v14 }
  0x84   : > { %v5041_v17 = vcombine.low %v5019_v58, %v5026_v35  ;;  %v10051_v50 = vrot.slane %v7784_v32, %v9405_v10  ;;  %v2028_v56 = vcombine.low %v1378_v16, %v1386_v62  ;;  %v10054_v43 = vrot.slane %v2026_v18, %v9405_v10 }
  0x85   : > { %12815 = vst [vmem:[#allocation76_spill] sm:$0xff] %v10044_v21  ;;  %v10057_v31 = vrot.slane %v2027_v12, %v9405_v10  ;;  %v10060_v52 = vrot.slane %v626_v59, %v9405_v10  ;;  %v5042_v55 = vcombine.low %v5033_v22, %v5040_v42  ;;  %v650_v14 = vcombine.high %v7785_v3, %v7785_v3 }
  0x86   : > { %12816 = vst [vmem:[#allocation77_spill] sm:$0xff] %v10051_v50  ;;  %12817 = vst [vmem:[#allocation78_spill] sm:$0xff] %v10054_v43  ;;  %v5049_v40 = vrot.slane %v5041_v17, %v9405_v10  ;;  %v10065_v58 = vcombine.high %v10051_v50, %v10051_v50  ;;  %v10068_v32 = vrot.slane %v2028_v56, %v9405_v10  ;;  %v1388_v9 = vshrl.u32 %v10051_v50, 16 }
  0x87   : > { %12818 = vst [vmem:[#allocation79_spill] sm:$0xff] %v10057_v31  ;;  %12819 = vst [vmem:[#allocation80_spill] sm:$0xff] %v10060_v52  ;;  %v2057_v18 = vcombine.low %v10044_v21, %v10054_v43  ;;  %v10074_v12 = vcombine.high %v10060_v52, %v10060_v52  ;;  %v10077_v16 = vrot.slane %v7785_v3, %v9405_v10  ;;  %v1393_v53 = vshll.u32 %v10060_v52, 16 }
  0x88   : > { %12820 = vst [vmem:[#allocation81_spill] sm:$0xff] %v10065_v58  ;;  %12821 = vst [vmem:[#allocation82_spill] sm:$0xff] %v10068_v32  ;;  %v5056_v22 = vrot.slane %v5042_v55, %v9405_v10  ;;  %v10081_v17 = vrot.slane %v650_v14, %v9405_v10  ;;  %v2058_v7 = vcombine.low %v10057_v31, %v10068_v32  ;;  %v1396_v3 = vshrl.u32 %v10060_v52, 16 }
  0x89   : > { %12822 = vst [vmem:[#allocation83_spill] sm:$0xff] %v10074_v12  ;;  %12823 = vst [vmem:[#allocation84_spill] sm:$0xff] %v10077_v16  ;;  %v2065_v35 = vrot.slane %v2057_v18, %v9405_v10  ;;  %v10090_v59 = vcombine.high %v10077_v16, %v10077_v16  ;;  %v1395_v55 = vsel %vm9433_vm1, %v1388_v9, %v1393_v53  ;;  %v1401_v14 = vshll.u32 %v10065_v58, 16 }
  0x8a   : > { %12824 = vst [vmem:[#allocation85_spill] sm:$0xff] %v10081_v17  ;;  %v5057_v42 = vcombine.low %v5049_v40, %v5056_v22  ;;  %v10095_v56 = vcombine.high %v10081_v17, %v10081_v17  ;;  %v2072_v32 = vrot.slane %v2058_v7, %v9405_v10  ;;  %v1404_v18 = vshrl.u32 %v10065_v58, 16 }
  0x8b   : > { %12825 = vst [vmem:[#allocation86_spill] sm:$0xff] %v10090_v59  ;;  %v1409_v43 = vshll.u32 %v10074_v12, 16  ;;  %v1412_v31 = vshrl.u32 %v10074_v12, 16  ;;  %v1403_v40 = vsel %vm9433_vm1, %v1396_v3, %v1401_v14  ;;  %v1417_v22 = vshll.u32 %v10077_v16, 16 }
  0x8c   : > { %12826 = vst [vmem:[#allocation87_spill] sm:$0xff] %v10095_v56  ;;  %8559 = vmatmul.mubr.msk.bf16.gmra.mrb[20].mxu0 %vm2334_vm2, %v5057_v42  ;;  %v1420_v9 = vshrl.u32 %v10077_v16, 16  ;;  %v1425_v53 = vshll.u32 %v10081_v17, 16  ;;  %v2073_v7 = vcombine.low %v2065_v35, %v2072_v32  ;;  %v1428_v58 = vshrl.u32 %v10081_v17, 16 }
  0x8d   : > { %8562 = vmatprep.mubr.msk.bf16.mxu0 %vm9306_vm3, %v12789_v27  ;;  %v1411_v21 = vsel %vm9433_vm1, %v1404_v18, %v1409_v43  ;;  %v1433_v42 = vshll.u32 %v10090_v59, 16  ;;  %v7786_v12 = vld.sshfl [vmem:[%s9403_s5 + $0x48] sm:$0x33 pattern:$0x75316420]  ;;  %v1419_v3 = vsel %vm9433_vm1, %v1412_v31, %v1417_v22  ;;  %v1436_v57 = vshrl.u32 %v10090_v59, 16 }
  0x8e   : > { %v1427_v14 = vsel %vm9433_vm1, %v1420_v9, %v1425_v53  ;;  %v1441_v16 = vshll.u32 %v10095_v56, 16  ;;  %8347 = vmatmul.mubr.msk.bf16.gmra.mrb[24].mxu1 %vm2334_vm2, %v2073_v7  ;;  %v5058_v32 = vcombine.low %v1386_v62, %v1395_v55  ;;  %v5059_v35 = vcombine.low %v1403_v40, %v1411_v21 }
  0x8f   : > { %v1435_v43 = vsel %vm9433_vm1, %v1428_v58, %v1433_v42  ;;  %v5060_v18 = vcombine.low %v1419_v3, %v1427_v14  ;;  %8350 = vmatprep.mubr.msk.bf16.mxu1 %vm9306_vm3, %v12789_v27  ;;  %v673_v31 = vcombine.high %v7786_v12, %v7786_v12  ;;  %v10131_v22 = vrot.slane %v7786_v12, %v9405_v10 }
  0x90   : > { %v1443_v17 = vsel %vm9433_vm1, %v1436_v57, %v1441_v16  ;;  %v2074_v9 = vcombine.low %v1395_v55, %v1403_v40  ;;  %v5068_v7 = vrot.slane %v5058_v32, %v9405_v10  ;;  %v5075_v56 = vrot.slane %v5059_v35, %v9405_v10 }
  0x91   : > { %12827 = vst [vmem:[#allocation88_spill] sm:$0xff] %v10131_v22  ;;  %v5061_v53 = vcombine.low %v1435_v43, %v1443_v17  ;;  %v5082_v62 = vrot.slane %v5060_v18, %v9405_v10  ;;  %v10137_v58 = vrot.slane %v673_v31, %v9405_v10  ;;  %v1445_v57 = vshrl.u32 %v10131_v22, 16 }
  0x92   : > { %v2075_v16 = vcombine.low %v1411_v21, %v1419_v3  ;;  %v2076_v42 = vcombine.low %v1427_v14, %v1435_v43  ;;  %v5090_v50 = vcombine.low %v5068_v7, %v5075_v56  ;;  %v10142_v12 = vrot.slane %v2074_v9, %v9405_v10  ;;  %v8017_v56 = vld [vmem:[%s12457_s1 + $0xc] sm:$0x3] }
  0x93   : > { %12828 = vst [vmem:[#allocation89_spill] sm:$0xff] %v10137_v58  ;;  %v5089_v59 = vrot.slane %v5061_v53, %v9405_v10  ;;  %v2563_v55 = vcombine.low %v9444_v28, %v9489_v60  ;;  %v1450_v40 = vshll.u32 %v10137_v58, 16  ;;  %v2564_v21 = vcombine.low %v9493_v61, %v9498_v2 }
  0x94   : > { %12829 = vst [vmem:[#allocation90_spill] sm:$0xff] %v10142_v12  ;;  %v10148_v32 = vrot.slane %v2075_v16, %v9405_v10  ;;  %v10151_v35 = vrot.slane %v2076_v42, %v9405_v10  ;;  %v5098_v14 = vrot.slane %v5090_v50, %v9405_v10  ;;  %v2565_v60 = vcombine.low %v9506_v11, %v9511_v13  ;;  %v7787_v50 = vld.sshfl [vmem:[%s9403_s5 + $0x4c] sm:$0x33 pattern:$0x75316420] }
  0x95   : > { %v5091_v3 = vcombine.low %v5082_v62, %v5089_v59  ;;  %v2573_v43 = vrot.slane %v2563_v55, %v9405_v10  ;;  %v10164_v18 = vsel %vm9433_vm1, %v1445_v57, %v1450_v40  ;;  %v2580_v61 = vrot.slane %v2564_v21, %v9405_v10  ;;  %v7788_v16 = vld.sshfl [vmem:[%s9403_s5 + $0x50] sm:$0x33 pattern:$0x75316420] }
  0x96   : > { %12830 = vst [vmem:[#allocation91_spill] sm:$0xff] %v10148_v32  ;;  %12831 = vst [vmem:[#allocation92_spill] sm:$0xff] %v10151_v35  ;;  %v2106_v31 = vcombine.low %v10142_v12, %v10148_v32  ;;  %v12833_v59 = vcombine.low %v9521_v29, %v9514_v15  ;;  %v2077_v7 = vcombine.low %v1443_v17, %v10164_v18  ;;  %v6376_v57 = vsel %vm2374_vm0, %v8017_v56, 0 }
  0x97   : > { %12832 = vst [vmem:[#allocation93_spill] sm:$0xff] %v10164_v18  ;;  %v5105_v53 = vrot.slane %v5091_v3, %v9405_v10  ;;  %v10177_v62 = vrot.slane %v2565_v60, %v9405_v10  ;;  %v2595_v55 = vcombine.low %v2573_v43, %v2580_v61  ;;  %v10184_v40 = vcombine.high %v10131_v22, %v10131_v22 }
  0x98   : > { %v5579_v9 = vrot.slane %v12833_v59, %v9405_v10  ;;  %v2114_v42 = vrot.slane %v2106_v31, %v9405_v10  ;;  %v10188_v29 = vcombine.high %v10137_v58, %v10137_v58  ;;  %v10191_v17 = vrot.slane %v2077_v7, %v9405_v10 }
  0x99   : > { %v5106_v21 = vcombine.low %v5098_v14, %v5105_v53  ;;  %v697_v60 = vcombine.high %v7787_v50, %v7787_v50  ;;  %v10195_v56 = vrot.slane %v2595_v55, %v9405_v10  ;;  %v10198_v43 = vrot.slane %v7787_v50, %v9405_v10 }
  0x9a   : > { %12834 = vst [vmem:[#allocation94_spill] sm:$0xff] %v10191_v17  ;;  %v5580_v3 = vcombine.low %v10177_v62, %v5579_v9  ;;  %v720_v31 = vcombine.high %v7788_v16, %v7788_v16  ;;  %v10201_v61 = vrot.slane %v7788_v16, %v9405_v10  ;;  %v2107_v14 = vcombine.low %v10151_v35, %v10191_v17 }
  0x9b   : > { %12835 = vst [vmem:[#allocation95_spill] sm:$0xff] %v10195_v56  ;;  %12836 = vst [vmem:[#allocation96_spill] sm:$0xff] %v10198_v43  ;;  %8563 = vmatmul.mubr.msk.bf16.gmra.mrb[24].mxu0 %vm2334_vm2, %v5106_v21  ;;  %v10208_v9 = vrot.slane %v697_v60, %v9405_v10  ;;  %v1453_v53 = vshrl.u32 %v10137_v58, 16  ;;  %v10215_v50 = vcombine.high %v10198_v43, %v10198_v43  ;;  %v1458_v55 = vshll.u32 %v10184_v40, 16 }
  0x9c   : > { %12837 = vst [vmem:[#allocation97_spill] sm:$0xff] %v10201_v61  ;;  %v5587_v59 = vrot.slane %v5580_v3, %v9405_v10  ;;  %8592 = vmatprep.mubr.msk.bf16.mxu0 %vm9306_vm3, %v12789_v27  ;;  %v10218_v7 = vrot.slane %v720_v31, %v9405_v10  ;;  %v10222_v16 = vcombine.high %v10201_v61, %v10201_v61  ;;  %v1461_v17 = vshrl.u32 %v10184_v40, 16 }
  0x9d   : > { %12838 = vst [vmem:[#allocation98_spill] sm:$0xff] %v10208_v9  ;;  %12839 = vst [vmem:[#allocation99_spill] sm:$0xff] %v10215_v50  ;;  %v2121_v21 = vrot.slane %v2107_v14, %v9405_v10  ;;  %v10229_v60 = vcombine.high %v10208_v9, %v10208_v9  ;;  %v10234_v31 = vsel %vm9433_vm1, %v1453_v53, %v1458_v55  ;;  %v1466_v32 = vshll.u32 %v10188_v29, 16 }
  0x9e   : > { %12840 = vst [vmem:[#allocation100_spill] sm:$0xff] %v10222_v16  ;;  %v5588_v3 = vcombine.low %v10195_v56, %v5587_v59  ;;  %12841 = vst [vmem:[#allocation101_spill] sm:$0xff] %v10234_v31  ;;  %v1469_v35 = vshrl.u32 %v10188_v29, 16  ;;  %v1474_v12 = vshll.u32 %v10198_v43, 16  ;;  %v1477_v14 = vshrl.u32 %v10198_v43, 16 }
  0x9f   : > { %v2122_v2 = vcombine.low %v2114_v42, %v2121_v21  ;;  %v1482_v59 = vshll.u32 %v10208_v9, 16  ;;  %v1485_v11 = vshrl.u32 %v10208_v9, 16  ;;  %v10244_v13 = vsel %vm9433_vm1, %v1461_v17, %v1466_v32 }
  0xa0   : > { %12842 = vst [vmem:[#allocation102_spill] sm:$0xff] %v10244_v13  ;;  %v10248_v53 = vsel %vm9433_vm1, %v1469_v35, %v1474_v12  ;;  %v1490_v55 = vshll.u32 %v10215_v50, 16  ;;  %v1493_v28 = vshrl.u32 %v10215_v50, 16  ;;  %v1498_v21 = vshll.u32 %v10229_v60, 16 }
  0xa1   : > { %12843 = vst [vmem:[#allocation103_spill] sm:$0xff] %v10248_v53  ;;  %8351 = vmatmul.mubr.msk.bf16.gmra.mrb[28].mxu1 %vm2334_vm2, %v2122_v2  ;;  %v10255_v42 = vsel %vm9433_vm1, %v1477_v14, %v1482_v59  ;;  %v1502_v22 = vshrl.u32 %v10201_v61, 16  ;;  %v1507_v32 = vshll.u32 %v10218_v7, 16  ;;  %v1510_v35 = vshrl.u32 %v10218_v7, 16 }
  0xa2   : > { %12844 = vst [vmem:[#allocation104_spill] sm:$0xff] %v10255_v42  ;;  %8354 = vmatprep.mubr.msk.bf16.mxu1 %vm9306_vm3, %v12789_v27  ;;  %v10264_v12 = vsel %vm9433_vm1, %v1485_v11, %v1490_v55  ;;  %v1515_v2 = vshll.u32 %v10222_v16, 16  ;;  %v2123_v17 = vcombine.low %v10234_v31, %v10244_v13  ;;  %v10273_v14 = vsel %vm9433_vm1, %v1493_v28, %v1498_v21 }
  0xa3   : > { %12845 = vst [vmem:[#allocation105_spill] sm:$0xff] %v10264_v12  ;;  %8593 = vmatmul.mubr.msk.bf16.vlgmr.msra.gmra.mrb[0].mxu0 %vm2334_vm2, %v5588_v3  ;;  %12846 = vst [vmem:[#allocation106_spill] sm:$0xff] %v10273_v14  ;;  %v10277_v59 = vsel %vm9433_vm1, %v1502_v22, %v1507_v32  ;;  %v2124_v11 = vcombine.low %v10248_v53, %v10255_v42  ;;  %v2125_v28 = vcombine.low %v10264_v12, %v10273_v14 }
  0xa4   : > { %12847 = vst [vmem:[#allocation107_spill] sm:$0xff] %v10277_v59  ;;  %8645 = vmatpush3.bf16.msra.mxu0 %v6376_v57  ;;  %8596 = vmatprep.mubr.msk.bf16.mxu0 %vm9306_vm3, %v12789_v27  ;;  %v10287_v3 = vsel %vm9433_vm1, %v1510_v35, %v1515_v2  ;;  %v10292_v22 = vrot.slane %v2123_v17, %v9405_v10  ;;  %v7790_v17 = vld.sshfl [vmem:[%s9403_s5 + $0x58] sm:$0x33 pattern:$0x75316420] }
  0xa5   : > { %12848 = vst [vmem:[#allocation108_spill] sm:$0xff] %v10287_v3  ;;  %v2126_v21 = vcombine.low %v10277_v59, %v10287_v3  ;;  %v10297_v32 = vrot.slane %v2124_v11, %v9405_v10  ;;  %8698 = vmatprep.subr.bf16.mxu0 %v12789_v27  ;;  %v10305_v2 = vrot.slane %v2125_v28, %v9405_v10  ;;  %v7789_v3 = vld.sshfl [vmem:[%s9403_s5 + $0x54] sm:$0x33 pattern:$0x75316420]  ;;  %v1518_v59 = vshrl.u32 %v10222_v16, 16 }
  0xa6   : > { %12849 = vst [vmem:[#allocation109_spill] sm:$0xff] %v10292_v22  ;;  %v7909_v55 = vcombine.high %v9501_v6, %v9514_v15  ;;  %v2613_v35 = vcombine.low %v9579_v36, %v9582_v38  ;;  %v2615_v28 = vcombine.low %v9598_v46, %v9602_v47  ;;  %v744_v42 = vcombine.high %v7789_v3, %v7789_v3 }
  0xa7   : > { %12850 = vst [vmem:[#allocation110_spill] sm:$0xff] %v10297_v32  ;;  %12851 = vst [vmem:[#allocation111_spill] sm:$0xff] %v10305_v2  ;;  %v10312_v11 = vrot.slane %v2126_v21, %v9405_v10  ;;  %v2155_v57 = vcombine.low %v10292_v22, %v10297_v32  ;;  %v7994_v32 = vcombine.high %v9579_v36, %v9582_v38 }
  0xa8   : > { %v10322_v12 = vrot.slane %v7909_v55, %v9405_v10  ;;  %v10333_v22 = vcombine.high %v10218_v7, %v10218_v7  ;;  %v10336_v47 = vrot.slane %v2613_v35, %v9405_v10  ;;  %v10339_v55 = vrot.slane %v2615_v28, %v9405_v10 }
  0xa9   : > { %12852 = vst [vmem:[#allocation112_spill] sm:$0xff] %v10312_v11  ;;  %v2156_v21 = vcombine.low %v10305_v2, %v10312_v11  ;;  %v2163_v14 = vrot.slane %v2155_v57, %v9405_v10  ;;  %v10342_v53 = vrot.slane %v7789_v3, %v9405_v10  ;;  %v5596_v57 = vrot.slane %v7994_v32, %v9405_v10 }
  0xaa   : > { %12853 = vst [vmem:[#allocation113_spill] sm:$0xff] %v10322_v12  ;;  %12854 = vst [vmem:[#allocation114_spill] sm:$0xff] %v10333_v22  ;;  %v767_v2 = vcombine.high %v7790_v17, %v7790_v17  ;;  %v10347_v13 = vrot.slane %v7790_v17, %v9405_v10  ;;  %v2644_v31 = vcombine.low %v10322_v12, %v10336_v47  ;;  %v1523_v3 = vshll.u32 %v10333_v22, 16 }
  0xab   : > { %12855 = vst [vmem:[#allocation115_spill] sm:$0xff] %v10336_v47  ;;  %12856 = vst [vmem:[#allocation116_spill] sm:$0xff] %v10342_v53  ;;  %v2170_v11 = vrot.slane %v2156_v21, %v9405_v10  ;;  %v10352_v35 = vrot.slane %v744_v42, %v9405_v10  ;;  %v10356_v28 = vcombine.high %v10342_v53, %v10342_v53 }
  0xac   : > { %12857 = vst [vmem:[#allocation117_spill] sm:$0xff] %v10347_v13  ;;  %v5597_v21 = vcombine.low %v5596_v57, %v10339_v55  ;;  %v10361_v32 = vrot.slane %v767_v2, %v9405_v10  ;;  %v10365_v17 = vcombine.high %v10347_v13, %v10347_v13  ;;  %v10368_v16 = vrot.slane %v2644_v31, %v9405_v10 }
  0xad   : > { %12858 = vst [vmem:[#allocation118_spill] sm:$0xff] %v10352_v35  ;;  %12859 = vst [vmem:[#allocation119_spill] sm:$0xff] %v10356_v28  ;;  %v2171_v18 = vcombine.low %v2163_v14, %v2170_v11  ;;  %v10372_v42 = vcombine.high %v10352_v35, %v10352_v35  ;;  %v10376_v46 = vsel %vm9433_vm1, %v1518_v59, %v1523_v3  ;;  %v1526_v14 = vshrl.u32 %v10333_v22, 16 }
  0xae   : > { %12860 = vst [vmem:[#allocation120_spill] sm:$0xff] %v10361_v32  ;;  %12861 = vst [vmem:[#allocation121_spill] sm:$0xff] %v10368_v16  ;;  %v5604_v2 = vrot.slane %v5597_v21, %v9405_v10  ;;  %v10383_v11 = vcombine.high %v10361_v32, %v10361_v32  ;;  %v1531_v31 = vshll.u32 %v10342_v53, 16  ;;  %v1534_v57 = vshrl.u32 %v10342_v53, 16 }
  0xaf   : > { %12862 = vst [vmem:[#allocation122_spill] sm:$0xff] %v10372_v42  ;;  %12863 = vst [vmem:[#allocation123_spill] sm:$0xff] %v10376_v46  ;;  %8355 = vmatmul.mubr.msk.bf16.gmra.mrb[32].mxu1 %vm2334_vm2, %v2171_v18  ;;  %v1539_v59 = vshll.u32 %v10352_v35, 16  ;;  %v1542_v3 = vshrl.u32 %v10352_v35, 16  ;;  %v1547_v22 = vshll.u32 %v10356_v28, 16  ;;  %v1550_v18 = vshrl.u32 %v10356_v28, 16 }
  0xb0   : > { %8358 = vmatprep.mubr.msk.bf16.mxu1 %vm9306_vm3, %v12789_v27  ;;  %v5605_v21 = vcombine.low %v10368_v16, %v5604_v2  ;;  %v10396_v38 = vsel %vm9433_vm1, %v1526_v14, %v1531_v31  ;;  %v1555_v36 = vshll.u32 %v10372_v42, 16  ;;  %v1559_v47 = vshrl.u32 %v10347_v13, 16 }
  0xb1   : > { %12864 = vst [vmem:[#allocation124_spill] sm:$0xff] %v10396_v38  ;;  %v10402_v12 = vsel %vm9433_vm1, %v1534_v57, %v1539_v59  ;;  %v10406_v56 = vsel %vm9433_vm1, %v1542_v3, %v1547_v22  ;;  %v1564_v28 = vshll.u32 %v10361_v32, 16  ;;  %v1567_v2 = vshrl.u32 %v10361_v32, 16 }
  0xb2   : > { %12865 = vst [vmem:[#allocation125_spill] sm:$0xff] %v10402_v12  ;;  %12866 = vst [vmem:[#allocation126_spill] sm:$0xff] %v10406_v56  ;;  %8597 = vmatmul.mubr.msk.bf16.gmra.mrb[4].mxu0 %vm2334_vm2, %v5605_v21  ;;  %v10413_v14 = vsel %vm9433_vm1, %v1550_v18, %v1555_v36  ;;  %v1572_v31 = vshll.u32 %v10365_v17, 16  ;;  %v1575_v57 = vshrl.u32 %v10365_v17, 16  ;;  %v1580_v59 = vshll.u32 %v10383_v11, 16 }
  0xb3   : > { %12867 = vst [vmem:[#allocation127_spill] sm:$0xff] %v10413_v14  ;;  %8600 = vmatprep.mubr.msk.bf16.mxu0 %vm9306_vm3, %v12789_v27  ;;  %v10422_v22 = vsel %vm9433_vm1, %v1559_v47, %v1564_v28  ;;  %v2172_v3 = vcombine.low %v10376_v46, %v10396_v38  ;;  %v2173_v36 = vcombine.low %v10402_v12, %v10406_v56  ;;  %v7791_v38 = vld.sshfl [vmem:[%s9403_s5 + $0x5c] sm:$0x33 pattern:$0x75316420] }
  0xb4   : > { %12868 = vst [vmem:[#allocation128_spill] sm:$0xff] %v10422_v22  ;;  %v2661_v18 = vcombine.low %v9642_v37, %v9665_v5  ;;  %v10432_v21 = vsel %vm9433_vm1, %v1567_v2, %v1572_v31  ;;  %v10436_v42 = vsel %vm9433_vm1, %v1575_v57, %v1580_v59  ;;  %v2174_v47 = vcombine.low %v10413_v14, %v10422_v22  ;;  %v7792_v57 = vld.sshfl [vmem:[%s9403_s5 + $0x60] sm:$0x33 pattern:$0x75316420] }
  0xb5   : > { %12869 = vst [vmem:[#allocation129_spill] sm:$0xff] %v10432_v21  ;;  %12870 = vst [vmem:[#allocation130_spill] sm:$0xff] %v10436_v42  ;;  %v2662_v28 = vcombine.low %v9676_v33, %v9688_v39  ;;  %v2175_v56 = vcombine.low %v10432_v21, %v10436_v42  ;;  %v10446_v37 = vrot.slane %v2172_v3, %v9405_v10 }
  0xb6   : > { %v10449_v2 = vrot.slane %v2173_v36, %v9405_v10  ;;  %v7910_v31 = vcombine.high %v9691_v41, %v9701_v49  ;;  %v10455_v59 = vrot.slane %v2174_v47, %v9405_v10  ;;  %v10458_v22 = vrot.slane %v2661_v18, %v9405_v10 }
  0xb7   : > { %12871 = vst [vmem:[#allocation131_spill] sm:$0xff] %v10446_v37  ;;  %v10461_v14 = vrot.slane %v2662_v28, %v9405_v10  ;;  %v5606_v3 = vcombine.low %v9695_v44, %v9701_v49  ;;  %v10466_v42 = vrot.slane %v2175_v56, %v9405_v10  ;;  %v791_v47 = vcombine.high %v7791_v38, %v7791_v38  ;;  %v10477_v28 = vld.sshfl [vmem:[%s9403_s5 + $0x64] sm:$0x33 pattern:$0x75316420] }
  0xb8   : > { %12872 = vst [vmem:[#allocation132_spill] sm:$0xff] %v10449_v2  ;;  %12873 = vst [vmem:[#allocation133_spill] sm:$0xff] %v10455_v59  ;;  %v2204_v36 = vcombine.low %v10446_v37, %v10449_v2  ;;  %v10471_v21 = vrot.slane %v7910_v31, %v9405_v10  ;;  %v10480_v46 = vrot.slane %v7791_v38, %v9405_v10 }
  0xb9   : > { %12874 = vst [vmem:[#allocation134_spill] sm:$0xff] %v10458_v22  ;;  %12875 = vst [vmem:[#allocation135_spill] sm:$0xff] %v10461_v14  ;;  %v2693_v18 = vcombine.low %v10458_v22, %v10461_v14  ;;  %v5613_v12 = vrot.slane %v5606_v3, %v9405_v10  ;;  %v814_v44 = vcombine.high %v7792_v57, %v7792_v57 }
  0xba   : > { %12876 = vst [vmem:[#allocation136_spill] sm:$0xff] %v10466_v42  ;;  %12877 = vst [vmem:[#allocation137_spill] sm:$0xff] %v10471_v21  ;;  %v2205_v56 = vcombine.low %v10455_v59, %v10466_v42  ;;  %v2212_v39 = vrot.slane %v2204_v36, %v9405_v10  ;;  %v10486_v31 = vrot.slane %v791_v47, %v9405_v10  ;;  %v1588_v42 = vshll.u32 %v10480_v46, 16 }
  0xbb   : > { %12878 = vst [vmem:[#allocation138_spill] sm:$0xff] %v10480_v46  ;;  %v10489_v2 = vrot.slane %v7792_v57, %v9405_v10  ;;  %v10492_v37 = vrot.slane %v2693_v18, %v9405_v10  ;;  %v5614_v3 = vcombine.low %v5613_v12, %v10471_v21  ;;  %v10497_v38 = vcombine.high %v10480_v46, %v10480_v46 }
  0xbc   : > { %12879 = vst [vmem:[#allocation139_spill] sm:$0xff] %v10486_v31  ;;  %v10500_v5 = vrot.slane %v814_v44, %v9405_v10  ;;  %v2219_v36 = vrot.slane %v2205_v56, %v9405_v10  ;;  %v10509_v57 = vrot.slane %v10477_v28, %v9405_v10  ;;  %v10513_v12 = vcombine.high %v10486_v31, %v10486_v31 }
  0xbd   : > { %12880 = vst [vmem:[#allocation140_spill] sm:$0xff] %v10489_v2  ;;  %12881 = vst [vmem:[#allocation141_spill] sm:$0xff] %v10492_v37  ;;  %v10505_v47 = vcombine.high %v10489_v2, %v10489_v2  ;;  %v5621_v18 = vrot.slane %v5614_v3, %v9405_v10  ;;  %v1583_v56 = vshrl.u32 %v10383_v11, 16  ;;  %v1591_v33 = vshrl.u32 %v10480_v46, 16 }
  0xbe   : > { %12882 = vst [vmem:[#allocation142_spill] sm:$0xff] %v10497_v38  ;;  %12884 = vst [vmem:[#allocation144_spill] sm:$0xff] %v10509_v57  ;;  %v10518_v44 = vcombine.high %v10500_v5, %v10500_v5  ;;  %v2220_v59 = vcombine.low %v2212_v39, %v2219_v36  ;;  %v1596_v14 = vshll.u32 %v10486_v31, 16  ;;  %v1599_v22 = vshrl.u32 %v10486_v31, 16 }
  0xbf   : > { %12883 = vst [vmem:[#allocation143_spill] sm:$0xff] %v10505_v47  ;;  %12885 = vst [vmem:[#allocation145_spill] sm:$0xff] %v10513_v12  ;;  %v5622_v13 = vcombine.low %v10492_v37, %v5621_v18  ;;  %v10528_v3 = vsel %vm9433_vm1, %v1583_v56, %v1588_v42  ;;  %v1604_v21 = vshll.u32 %v10497_v38, 16  ;;  %v1607_v16 = vshrl.u32 %v10497_v38, 16 }
  0xc0   : > { %12886 = vst [vmem:[#allocation146_spill] sm:$0xff] %v10518_v44  ;;  %12887 = vst [vmem:[#allocation147_spill] sm:$0xff] %v10528_v3  ;;  %8359 = vmatmul.mubr.msk.bf16.gmra.mrb[36].mxu1 %vm2334_vm2, %v2220_v59  ;;  %v10535_v39 = vsel %vm9433_vm1, %v1591_v33, %v1596_v14  ;;  %v1612_v36 = vshll.u32 %v10513_v12, 16  ;;  %v1616_v31 = vshrl.u32 %v10489_v2, 16  ;;  %v1621_v18 = vshll.u32 %v10500_v5, 16 }
  0xc1   : > { %12888 = vst [vmem:[#allocation148_spill] sm:$0xff] %v10535_v39  ;;  %8601 = vmatmul.mubr.msk.bf16.gmra.mrb[8].mxu0 %vm2334_vm2, %v5622_v13  ;;  %8362 = vmatprep.mubr.msk.bf16.mxu1 %vm9306_vm3, %v12789_v27  ;;  %v10545_v42 = vsel %vm9433_vm1, %v1599_v22, %v1604_v21  ;;  %v1624_v59 = vshrl.u32 %v10500_v5, 16  ;;  %v1629_v33 = vshll.u32 %v10505_v47, 16  ;;  %v1632_v14 = vshrl.u32 %v10505_v47, 16 }
  0xc2   : > { %12889 = vst [vmem:[#allocation149_spill] sm:$0xff] %v10545_v42  ;;  %8604 = vmatprep.mubr.msk.bf16.mxu0 %vm9306_vm3, %v12789_v27  ;;  %v10554_v56 = vsel %vm9433_vm1, %v1607_v16, %v1612_v36  ;;  %v10558_v13 = vsel %vm9433_vm1, %v1616_v31, %v1621_v18  ;;  %v1637_v22 = vshll.u32 %v10518_v44, 16  ;;  %v1640_v21 = vshrl.u32 %v10518_v44, 16 }
  0xc3   : > { %12890 = vst [vmem:[#allocation150_spill] sm:$0xff] %v10554_v56  ;;  %12891 = vst [vmem:[#allocation151_spill] sm:$0xff] %v10558_v13  ;;  %v10564_v37 = vsel %vm9433_vm1, %v1624_v59, %v1629_v33  ;;  %v1645_v47 = vshll.u32 %v10509_v57, 16  ;;  %v2221_v12 = vcombine.low %v10528_v3, %v10535_v39  ;;  %v2222_v16 = vcombine.low %v10545_v42, %v10554_v56 }
  0xc4   : > { %12892 = vst [vmem:[#allocation152_spill] sm:$0xff] %v10564_v37  ;;  %v10573_v31 = vsel %vm9433_vm1, %v1632_v14, %v1637_v22  ;;  %v2223_v36 = vcombine.low %v10558_v13, %v10564_v37  ;;  %v2710_v18 = vcombine.low %v9746_v25, %v9774_v30  ;;  %v2712_v59 = vcombine.low %v9794_v51, %v9798_v20  ;;  %v7794_v37 = vld.sshfl [vmem:[%s9403_s5 + $0x68] sm:$0x33 pattern:$0x75316420] }
  0xc5   : > { %12893 = vst [vmem:[#allocation153_spill] sm:$0xff] %v10573_v31  ;;  %v10583_v33 = vsel %vm9433_vm1, %v1640_v21, %v1645_v47  ;;  %v10586_v56 = vrot.slane %v2221_v12, %v9405_v10  ;;  %v10589_v14 = vrot.slane %v2222_v16, %v9405_v10  ;;  %v2713_v22 = vcombine.low %v9808_v4, %v9786_v34  ;;  %v7795_v16 = vld.sshfl [vmem:[%s9403_s5 + $0x6c] sm:$0x33 pattern:$0x75316420] }
  0xc6   : > { %12894 = vst [vmem:[#allocation154_spill] sm:$0xff] %v10583_v33  ;;  %v2224_v13 = vcombine.low %v10573_v31, %v10583_v33  ;;  %v10597_v39 = vrot.slane %v2223_v36, %v9405_v10  ;;  %v10600_v20 = vrot.slane %v2710_v18, %v9405_v10  ;;  %v10603_v47 = vrot.slane %v2712_v59, %v9405_v10 }
  0xc7   : > { %12895 = vst [vmem:[#allocation155_spill] sm:$0xff] %v10586_v56  ;;  %12896 = vst [vmem:[#allocation156_spill] sm:$0xff] %v10589_v14  ;;  %v2253_v12 = vcombine.low %v10586_v56, %v10589_v14  ;;  %v10608_v21 = vrot.slane %v2713_v22, %v9405_v10  ;;  %v7995_v4 = vcombine.high %v9746_v25, %v9774_v30 }
  0xc8   : > { %12897 = vst [vmem:[#allocation157_spill] sm:$0xff] %v10597_v39  ;;  %12898 = vst [vmem:[#allocation158_spill] sm:$0xff] %v10600_v20  ;;  %v838_v36 = vcombine.high %v10477_v28, %v10477_v28  ;;  %v10616_v33 = vrot.slane %v2224_v13, %v9405_v10  ;;  %v10620_v18 = vcombine.high %v10509_v57, %v10509_v57 }
  0xc9   : > { %12899 = vst [vmem:[#allocation159_spill] sm:$0xff] %v10603_v47  ;;  %12900 = vst [vmem:[#allocation160_spill] sm:$0xff] %v10608_v21  ;;  %v861_v59 = vcombine.high %v7794_v37, %v7794_v37  ;;  %v10623_v31 = vrot.slane %v7794_v37, %v9405_v10  ;;  %v2261_v22 = vrot.slane %v2253_v12, %v9405_v10 }
  0xca   : > { %12901 = vst [vmem:[#allocation161_spill] sm:$0xff] %v10616_v33  ;;  %12902 = vst [vmem:[#allocation162_spill] sm:$0xff] %v10620_v18  ;;  %v2743_v42 = vcombine.low %v10603_v47, %v10608_v21  ;;  %v5630_v3 = vrot.slane %v7995_v4, %v9405_v10  ;;  %v10630_v28 = vrot.slane %v838_v36, %v9405_v10  ;;  %v1661_v51 = vshll.u32 %v10620_v18, 16 }
  0xcb   : > { %12903 = vst [vmem:[#allocation163_spill] sm:$0xff] %v10623_v31  ;;  %v2254_v13 = vcombine.low %v10597_v39, %v10616_v33  ;;  %v10635_v14 = vrot.slane %v861_v59, %v9405_v10  ;;  %v10639_v37 = vcombine.high %v10623_v31, %v10623_v31  ;;  %v885_v56 = vcombine.high %v7795_v16, %v7795_v16 }
  0xcc   : > { %12904 = vst [vmem:[#allocation164_spill] sm:$0xff] %v10630_v28  ;;  %v10642_v12 = vrot.slane %v2743_v42, %v9405_v10  ;;  %v5631_v44 = vcombine.low %v10600_v20, %v5630_v3  ;;  %v10646_v4 = vrot.slane %v7795_v16, %v9405_v10  ;;  %v10650_v36 = vcombine.high %v10630_v28, %v10630_v28 }
  0xcd   : > { %12905 = vst [vmem:[#allocation165_spill] sm:$0xff] %v10635_v14  ;;  %v2268_v59 = vrot.slane %v2254_v13, %v9405_v10  ;;  %v10655_v33 = vcombine.high %v10635_v14, %v10635_v14  ;;  %v10658_v39 = vrot.slane %v885_v56, %v9405_v10  ;;  %v1648_v42 = vshrl.u32 %v10509_v57, 16 }
  0xce   : > { %12906 = vst [vmem:[#allocation166_spill] sm:$0xff] %v10646_v4  ;;  %12907 = vst [vmem:[#allocation167_spill] sm:$0xff] %v10650_v36  ;;  %v5638_v3 = vrot.slane %v5631_v44, %v9405_v10  ;;  %v1653_v16 = vshll.u32 %v10630_v28, 16  ;;  %v1656_v34 = vshrl.u32 %v10630_v28, 16  ;;  %v1664_v13 = vshrl.u32 %v10620_v18, 16 }
  0xcf   : > { %12908 = vst [vmem:[#allocation168_spill] sm:$0xff] %v10658_v39  ;;  %v2269_v30 = vcombine.low %v2261_v22, %v2268_v59  ;;  %v1669_v25 = vshll.u32 %v10650_v36, 16  ;;  %v1673_v21 = vshrl.u32 %v10623_v31, 16  ;;  %v1678_v20 = vshll.u32 %v10635_v14, 16 }
  0xd0   : > { %v5639_v56 = vcombine.low %v5638_v3, %v10642_v12  ;;  %v10671_v47 = vsel %vm9433_vm1, %v1648_v42, %v1653_v16  ;;  %v10675_v44 = vsel %vm9433_vm1, %v1656_v34, %v1661_v51  ;;  %v1681_v59 = vshrl.u32 %v10635_v14, 16 }
  0xd1   : > { %12909 = vst [vmem:[#allocation169_spill] sm:$0xff] %v10671_v47  ;;  %12910 = vst [vmem:[#allocation170_spill] sm:$0xff] %v10675_v44  ;;  %8363 = vmatmul.mubr.msk.bf16.gmra.mrb[40].mxu1 %vm2334_vm2, %v2269_v30  ;;  %v10681_v22 = vsel %vm9433_vm1, %v1664_v13, %v1669_v25  ;;  %v1686_v3 = vshll.u32 %v10639_v37, 16  ;;  %v1689_v36 = vshrl.u32 %v10639_v37, 16  ;;  %v10691_v34 = vsel %vm9433_vm1, %v1673_v21, %v1678_v20 }
  0xd2   : > { %12911 = vst [vmem:[#allocation171_spill] sm:$0xff] %v10681_v22  ;;  %8605 = vmatmul.mubr.msk.bf16.gmra.mrb[12].mxu0 %vm2334_vm2, %v5639_v56  ;;  %8366 = vmatprep.mubr.msk.bf16.mxu1 %vm9306_vm3, %v12789_v27  ;;  %12912 = vst [vmem:[#allocation172_spill] sm:$0xff] %v10691_v34  ;;  %v1694_v30 = vshll.u32 %v10655_v33, 16  ;;  %v1697_v25 = vshrl.u32 %v10655_v33, 16  ;;  %v1702_v51 = vshll.u32 %v10646_v4, 16  ;;  %v1705_v16 = vshrl.u32 %v10646_v4, 16 }
  0xd3   : > { %8608 = vmatprep.mubr.msk.bf16.mxu0 %vm9306_vm3, %v12789_v27  ;;  %v10700_v42 = vsel %vm9433_vm1, %v1681_v59, %v1686_v3  ;;  %v1710_v13 = vshll.u32 %v10658_v39, 16  ;;  %v2270_v20 = vcombine.low %v10671_v47, %v10675_v44  ;;  %v2271_v18 = vcombine.low %v10681_v22, %v10691_v34 }
  0xd4   : > { %12913 = vst [vmem:[#allocation173_spill] sm:$0xff] %v10700_v42  ;;  %v10708_v21 = vsel %vm9433_vm1, %v1689_v36, %v1694_v30  ;;  %v10712_v56 = vsel %vm9433_vm1, %v1697_v25, %v1702_v51  ;;  %v2759_v59 = vcombine.low %v9848_v54, %v9857_v45  ;;  %v7911_v30 = vcombine.high %v9867_v0, %v9871_v48 }
  0xd5   : > { %12914 = vst [vmem:[#allocation174_spill] sm:$0xff] %v10708_v21  ;;  %12915 = vst [vmem:[#allocation175_spill] sm:$0xff] %v10712_v56  ;;  %v10720_v3 = vsel %vm9433_vm1, %v1705_v16, %v1710_v13  ;;  %v2272_v44 = vcombine.low %v10700_v42, %v10708_v21  ;;  %v10725_v36 = vrot.slane %v2270_v20, %v9405_v10 }
  0xd6   : > { %12916 = vst [vmem:[#allocation176_spill] sm:$0xff] %v10720_v3  ;;  %v2273_v25 = vcombine.low %v10712_v56, %v10720_v3  ;;  %v10732_v51 = vrot.slane %v2271_v18, %v9405_v10  ;;  %v2762_v34 = vcombine.low %v9882_v1, %v9890_v19  ;;  %v10737_v16 = vrot.slane %v2759_v59, %v9405_v10  ;;  %v12936_v3 = vld [vmem:[#allocation10_spill] sm:$0xff] }
  0xd7   : > { %12917 = vst [vmem:[#allocation177_spill] sm:$0xff] %v10725_v36  ;;  %v10740_v13 = vrot.slane %v2272_v44, %v9405_v10  ;;  %v10743_v20 = vrot.slane %v7911_v30, %v9405_v10  ;;  %v5640_v21 = vcombine.low %v9895_v26, %v9871_v48  ;;  %v10749_v56 = vcombine.high %v10646_v4, %v10646_v4 }
  0xd8   : > { %12918 = vst [vmem:[#allocation178_spill] sm:$0xff] %v10732_v51  ;;  %v10752_v18 = vrot.slane %v2273_v25, %v9405_v10  ;;  %v2302_v59 = vcombine.low %v10725_v36, %v10732_v51  ;;  %v10757_v42 = vrot.slane %v2762_v34, %v9405_v10  ;;  %v10761_v44 = vcombine.high %v10658_v39, %v10658_v39 }
  0xd9   : > { %12919 = vst [vmem:[#allocation179_spill] sm:$0xff] %v10740_v13  ;;  %12920 = vst [vmem:[#allocation180_spill] sm:$0xff] %v10743_v20  ;;  %v5647_v30 = vrot.slane %v5640_v21, %v9405_v10  ;;  %v1713_v26 = vshrl.u32 %v10658_v39, 16  ;;  %v1718_v22 = vshll.u32 %v10749_v56, 16  ;;  %v1721_v47 = vshrl.u32 %v10749_v56, 16 }
  0xda   : > { %12921 = vst [vmem:[#allocation181_spill] sm:$0xff] %v10749_v56  ;;  %12922 = vst [vmem:[#allocation182_spill] sm:$0xff] %v10752_v18  ;;  %v2303_v25 = vcombine.low %v10740_v13, %v10752_v18  ;;  %v2310_v45 = vrot.slane %v2302_v59, %v9405_v10  ;;  %v2792_v34 = vcombine.low %v10743_v20, %v10757_v42  ;;  %v1726_v51 = vshll.u32 %v10761_v44, 16  ;;  %v12929_v20 = vld [vmem:[#allocation73_spill] sm:$0xff]  ;;  %v12933_v59 = vld [vmem:[#allocation6_spill] sm:$0xff] }
  0xdb   : > { %12923 = vst [vmem:[#allocation183_spill] sm:$0xff] %v10757_v42  ;;  %v5648_v36 = vcombine.low %v10737_v16, %v5647_v30  ;;  %v10776_v21 = vsel %vm9433_vm1, %v1713_v26, %v1718_v22  ;;  %v2809_v22 = vcombine.low %v9965_v63, %v9971_v23  ;;  %v12927_v26 = vld [vmem:[#allocation71_spill] sm:$0xff]  ;;  %v2811_v24 = vcombine.low %v12929_v20, %v9997_v8 }
  0xdc   : > { %12924 = vst [vmem:[#allocation184_spill] sm:$0xff] %v10776_v21  ;;  %v2317_v54 = vrot.slane %v2303_v25, %v9405_v10  ;;  %v10780_v31 = vrot.slane %v2792_v34, %v9405_v10  ;;  %v10784_v18 = vsel %vm9433_vm1, %v1721_v47, %v1726_v51  ;;  %v12928_v25 = vld [vmem:[#allocation70_spill] sm:$0xff]  ;;  %v12935_v8 = vld [vmem:[#allocation7_spill] sm:$0xff] }
  0xdd   : > { %12926 = vst [vmem:[#allocation186_spill] sm:$0xff] %v10784_v18  ;;  %v5655_v13 = vrot.slane %v5648_v36, %v9405_v10  ;;  %v2319_v30 = vcombine.low %v10776_v21, %v10784_v18  ;;  %v2810_v34 = vcombine.low %v12928_v25, %v12927_v26  ;;  %v7996_v36 = vcombine.high %v9882_v1, %v9890_v19  ;;  %v12932_v25 = vld [vmem:[#allocation8_spill] sm:$0xff]  ;;  %v12938_v26 = vld [vmem:[#allocation77_spill] sm:$0xff] }
  0xde   : > { %12925 = vst [vmem:[#allocation185_spill] sm:$0xff] %v10780_v31  ;;  %v2318_v42 = vcombine.low %v2310_v45, %v2317_v54  ;;  %v10805_v54 = vrot.slane %v2809_v22, %v9405_v10  ;;  %v10811_v23 = vrot.slane %v2811_v24, %v9405_v10  ;;  %v7908_v22 = vcombine.high %v12933_v59, %v12932_v25  ;;  %v12937_v18 = vld [vmem:[#allocation12_spill] sm:$0xff]  ;;  %v12939_v1 = vld [vmem:[#allocation85_spill] sm:$0xff] }
  0xdf   : > { %v5656_v47 = vcombine.low %v5655_v13, %v10780_v31  ;;  %v10799_v51 = vrot.slane %v2319_v30, %v9405_v10  ;;  %v10808_v45 = vrot.slane %v2810_v34, %v9405_v10  ;;  %v2514_v13 = vcombine.low %v12933_v59, %v12932_v25  ;;  %v12934_v34 = vld [vmem:[#allocation11_spill] sm:$0xff]  ;;  %v12940_v25 = vld [vmem:[#allocation84_spill] sm:$0xff] }
  0xe0   : > { %8367 = vmatmul.mubr.msk.bf16.gmra.mrb[44].mxu1 %vm2334_vm2, %v2318_v42  ;;  %12931 = vst [vmem:[#allocation187_spill] sm:$0xff] %v10811_v23  ;;  %v5664_v30 = vrot.slane %v7996_v36, %v9405_v10  ;;  %v2517_v36 = vcombine.low %v12937_v18, %v12936_v3  ;;  %v7912_v20 = vcombine.high %v12938_v26, %v10060_v52 }
  0xe1   : > { %12930 = vst [vmem:[#allocation70_spill] sm:$0xff] %v10799_v51  ;;  %8609 = vmatmul.mubr.msk.bf16.gmra.mrb[16].mxu0 %vm2334_vm2, %v5656_v47  ;;  %8370 = vmatprep.mubr.msk.bf16.mxu1 %vm9306_vm3, %v12789_v27  ;;  %v2333_v42 = vrot.slane %v10799_v51, %v9405_v10  ;;  %v2841_v24 = vcombine.low %v10808_v45, %v10811_v23 }
  0xe2   : > { %8612 = vmatprep.mubr.msk.bf16.mxu0 %vm9306_vm3, %v12789_v27  ;;  %v2516_v47 = vcombine.low %v12935_v8, %v12934_v34  ;;  %v5665_v21 = vcombine.low %v5664_v30, %v10805_v54  ;;  %v2524_v19 = vrot.slane %v2514_v13, %v9405_v10  ;;  %v2531_v63 = vrot.slane %v7908_v22, %v9405_v10  ;;  %v12941_v13 = vld [vmem:[#allocation75_spill] sm:$0xff] }
  0xe3   : > { %v10836_v51 = vrot.slane %v2841_v24, %v9405_v10  ;;  %v2859_v34 = vcombine.low %v12940_v25, %v12939_v1  ;;  %v2545_v8 = vrot.slane %v2517_v36, %v9405_v10  ;;  %v10845_v18 = vrot.slane %v7912_v20, %v9405_v10 }
  0xe4   : > { %v2538_v59 = vrot.slane %v2516_v47, %v9405_v10  ;;  %v5672_v30 = vrot.slane %v5665_v21, %v9405_v10  ;;  %v5674_v3 = vcombine.low %v12941_v13, %v10060_v52  ;;  %v2546_v31 = vcombine.low %v2524_v19, %v2531_v63 }
  0xe5   : > { %v10850_v24 = vrot.slane %v2859_v34, %v9405_v10  ;;  %v7997_v22 = vcombine.high %v12940_v25, %v12939_v1  ;;  %v2566_v47 = vcombine.low %v9501_v6, %v9514_v15  ;;  %v2906_v20 = vcombine.low %v10137_v58, %v10184_v40 }
  0xe6   : > { %v5673_v21 = vcombine.low %v5672_v30, %v10836_v51  ;;  %v2547_v23 = vcombine.low %v2538_v59, %v2545_v8  ;;  %v5682_v36 = vrot.slane %v5674_v3, %v9405_v10  ;;  %v2554_v19 = vrot.slane %v2546_v31, %v9405_v10 }
  0xe7   : > { %v5689_v63 = vrot.slane %v7997_v22, %v9405_v10  ;;  %v10864_v34 = vrot.slane %v2566_v47, %v9405_v10  ;;  %v2907_v13 = vcombine.low %v10188_v29, %v10198_v43  ;;  %v2908_v31 = vcombine.low %v10208_v9, %v10215_v50  ;;  %v7928_v47 = vld [vmem:[%s12457_s1 + $0x4] sm:$0x3] }
  0xe8   : > { %8371 = vmatmul.mubr.msk.bf16.gmra.mrb[48].mxu1 %vm2334_vm2, %v2333_v42  ;;  %v2561_v8 = vrot.slane %v2547_v23, %v9405_v10  ;;  %v5690_v40 = vcombine.low %v5682_v36, %v10845_v18  ;;  %v10879_v42 = vrot.slane %v2906_v20, %v9405_v10  ;;  %v5707_v36 = vcombine.low %v10229_v60, %v10218_v7 }
  0xe9   : > { %8613 = vmatmul.mubr.msk.bf16.gmra.mrb[20].mxu0 %vm2334_vm2, %v5673_v21  ;;  %8376 = vmatprep.mubr.msk.bf16.mxu1 %vm9306_vm3, %v12789_v27  ;;  %v5691_v3 = vcombine.low %v10850_v24, %v5689_v63  ;;  %v2596_v59 = vcombine.low %v10177_v62, %v10864_v34  ;;  %v10885_v23 = vrot.slane %v2907_v13, %v9405_v10  ;;  %v12942_v62 = vld [vmem:[#allocation24_spill] sm:$0xff]  ;;  %v12943_v63 = vld [vmem:[#allocation26_spill] sm:$0xff]  ;;  %v3940_v50 = vsel %vm2374_vm0, %v7928_v47, 0 }
  0xea   : > { %8616 = vmatprep.mubr.msk.bf16.mxu0 %vm9306_vm3, %v12789_v27  ;;  %v5698_v29 = vrot.slane %v5690_v40, %v9405_v10  ;;  %v2562_v30 = vcombine.low %v2554_v19, %v2561_v8  ;;  %v10892_v21 = vrot.slane %v2908_v31, %v9405_v10  ;;  %v2614_v13 = vcombine.low %v12943_v63, %v12942_v62 }
  0xeb   : > { %v5705_v22 = vrot.slane %v5691_v3, %v9405_v10  ;;  %v2938_v20 = vcombine.low %v10879_v42, %v10885_v23  ;;  %v7913_v19 = vcombine.high %v10201_v61, %v10218_v7  ;;  %v2956_v8 = vcombine.low %v10342_v53, %v10352_v35 }
  0xec   : > { %v5714_v3 = vrot.slane %v5707_v36, %v9405_v10  ;;  %v2958_v31 = vcombine.low %v10361_v32, %v10365_v17  ;;  %v2610_v60 = vrot.slane %v2596_v59, %v9405_v10  ;;  %v10910_v43 = vrot.slane %v2614_v13, %v9405_v10 }
  0xed   : > { %v5706_v40 = vcombine.low %v5698_v29, %v5705_v22  ;;  %v10915_v58 = vrot.slane %v7913_v19, %v9405_v10  ;;  %v10918_v29 = vrot.slane %v2956_v8, %v9405_v10  ;;  %v7998_v17 = vcombine.high %v10342_v53, %v10352_v35 }
  0xee   : > { %v5715_v9 = vcombine.low %v10892_v21, %v5714_v3  ;;  %v10926_v59 = vrot.slane %v2938_v20, %v9405_v10  ;;  %v2645_v36 = vcombine.low %v10910_v43, %v10339_v55  ;;  %v2663_v13 = vcombine.low %v9691_v41, %v9701_v49  ;;  %v12944_v20 = vld [vmem:[#allocation95_spill] sm:$0xff]  ;;  %v12946_v41 = vld [vmem:[#allocation145_spill] sm:$0xff] }
  0xef   : > { %v5731_v47 = vrot.slane %v7998_v17, %v9405_v10  ;;  %v2611_v19 = vcombine.low %v12944_v20, %v2610_v60  ;;  %v2987_v8 = vcombine.low %v10915_v58, %v10918_v29  ;;  %v7914_v17 = vcombine.high %v10489_v2, %v10500_v5  ;;  %v7956_v20 = vld.sshfl [vmem:[%s9403_s5 + $0x70] sm:$0x33 pattern:$0x75316420] }
  0xf0   : > { %8377 = vmatmul.mubr.msk.bf16.vlgmr.msra.gmra.mrb[0].mxu1 %vm2334_vm2, %v2562_v30  ;;  %v10929_v30 = vrot.slane %v2958_v31, %v9405_v10  ;;  %v5722_v22 = vrot.slane %v5715_v9, %v9405_v10  ;;  %v12945_v9 = vld [vmem:[#allocation139_spill] sm:$0xff]  ;;  %v5741_v60 = vcombine.low %v12946_v41, %v10500_v5  ;;  %v2659_v35 = vrot.slane %v2645_v36, %v9405_v10 }
  0xf1   : > { %8617 = vmatmul.mubr.msk.bf16.gmra.mrb[24].mxu0 %vm2334_vm2, %v5706_v40  ;;  %8380 = vmatprep.mubr.msk.bf16.mxu1 %vm9306_vm3, %v12789_v27  ;;  %v3005_v40 = vcombine.low %v12945_v9, %v10497_v38  ;;  %v10956_v32 = vrot.slane %v2663_v13, %v9405_v10  ;;  %v10973_v36 = vrot.slane %v7914_v17, %v9405_v10  ;;  %v12948_v38 = vld [vmem:[#allocation137_spill] sm:$0xff]  ;;  %v12950_v9 = vld [vmem:[#allocation42_spill] sm:$0xff] }
  0xf2   : > { %8620 = vmatprep.mubr.msk.bf16.mxu0 %vm9306_vm3, %v12789_v27  ;;  %8429 = vmatpush3.bf16.msra.mxu1 %v3940_v50  ;;  %v3004_v50 = vcombine.low %v10383_v11, %v10480_v46  ;;  %v5723_v3 = vcombine.low %v10926_v59, %v5722_v22  ;;  %v5732_v31 = vcombine.low %v5731_v47, %v10929_v30  ;;  %v12949_v46 = vld [vmem:[#allocation46_spill] sm:$0xff] }
  0xf3   : > { %8482 = vmatprep.subr.bf16.mxu1 %v12789_v27  ;;  %v10960_v11 = vrot.slane %v2987_v8, %v9405_v10  ;;  %v10966_v47 = vrot.slane %v3005_v40, %v9405_v10  ;;  %v5748_v13 = vrot.slane %v5741_v60, %v9405_v10  ;;  %v7957_v8 = vld.sshfl [vmem:[%s9403_s5 + $0x74] sm:$0x33 pattern:$0x75316420]  ;;  %v2711_v53 = vcombine.low %v12950_v9, %v12949_v46 }
  0xf4   : > { %v10963_v22 = vrot.slane %v3004_v50, %v9405_v10  ;;  %v5739_v41 = vrot.slane %v5732_v31, %v9405_v10  ;;  %v12947_v50 = vld [vmem:[#allocation121_spill] sm:$0xff]  ;;  %v3053_v31 = vcombine.low %v10509_v57, %v10630_v28  ;;  %v3055_v60 = vcombine.low %v10635_v14, %v10639_v37 }
  0xf5   : > { %v2660_v40 = vcombine.low %v12947_v50, %v2659_v35  ;;  %v3056_v1 = vcombine.low %v10655_v33, %v10646_v4  ;;  %v7999_v35 = vcombine.high %v10509_v57, %v10630_v28  ;;  %v5749_v25 = vcombine.low %v5748_v13, %v10973_v36 }
  0xf6   : > { %v3036_v17 = vcombine.low %v10963_v22, %v10966_v47  ;;  %v5740_v50 = vcombine.low %v10960_v11, %v5739_v41  ;;  %v4136_v46 = vcombine.high %v7957_v8, %v7957_v8  ;;  %v10997_v49 = vrot.slane %v7956_v20, %v9405_v10 }
  0xf7   : > { %v2727_v37 = vrot.slane %v2711_v53, %v9405_v10  ;;  %v11005_v33 = vrot.slane %v3053_v31, %v9405_v10  ;;  %v11012_v13 = vrot.slane %v3055_v60, %v9405_v10  ;;  %v5756_v53 = vrot.slane %v5749_v25, %v9405_v10  ;;  %v12953_v60 = vld [vmem:[#allocation141_spill] sm:$0xff] }
  0xf8   : > { %8381 = vmatmul.mubr.msk.bf16.gmra.mrb[4].mxu1 %vm2334_vm2, %v2611_v19  ;;  %v4112_v19 = vcombine.high %v7956_v20, %v7956_v20  ;;  %v11009_v41 = vrot.slane %v3036_v17, %v9405_v10  ;;  %v11015_v20 = vrot.slane %v3056_v1, %v9405_v10  ;;  %v12952_v1 = vld [vmem:[#allocation158_spill] sm:$0xff]  ;;  %v2760_v17 = vcombine.low %v9867_v0, %v9871_v48 }
  0xf9   : > { %8621 = vmatmul.mubr.msk.bf16.gmra.mrb[28].mxu0 %vm2334_vm2, %v5723_v3  ;;  %8384 = vmatprep.mubr.msk.bf16.mxu1 %vm9306_vm3, %v12789_v27  ;;  %v2694_v3 = vcombine.low %v10956_v32, %v12948_v38  ;;  %v2742_v31 = vcombine.low %v12952_v1, %v2727_v37 }
  0xfa   : > { %8624 = vmatprep.mubr.msk.bf16.mxu0 %vm9306_vm3, %v12789_v27  ;;  %v11000_v9 = vrot.slane %v4112_v19, %v9405_v10  ;;  %v5765_v19 = vrot.slane %v7999_v35, %v9405_v10 }
  0xfb   : > { %v2708_v62 = vrot.slane %v2694_v3, %v9405_v10  ;;  %v11026_v3 = vrot.slane %v4136_v46, %v9405_v10  ;;  %v5757_v46 = vcombine.low %v11009_v41, %v5756_v53 }
  0xfc   : > { %v5766_v25 = vcombine.low %v11005_v33, %v5765_v19  ;;  %v5775_v4 = vcombine.low %v10761_v44, %v11000_v9  ;;  %v8000_v14 = vcombine.high %v10997_v49, %v11000_v9  ;;  %v12954_v44 = vld [vmem:[#allocation66_spill] sm:$0xff] }
  0xfd   : > { %12951 = vst [vmem:[#allocation6_spill] sm:$0xff] %v11026_v3  ;;  %v2709_v35 = vcombine.low %v12953_v60, %v2708_v62  ;;  %v2750_v62 = vrot.slane %v2742_v31, %v9405_v10  ;;  %v2776_v60 = vrot.slane %v2760_v17, %v9405_v10 }
  0xfe   : > { %v5773_v53 = vrot.slane %v5766_v25, %v9405_v10  ;;  %v5784_v31 = vrot.slane %v5775_v4, %v9405_v10  ;;  %v11063_v17 = vrot.slane %v8000_v14, %v9405_v10  ;;  %v6119_v25 = vcombine.low %v12948_v38, %v12952_v1  ;;  %v12958_v14 = vld [vmem:[#allocation160_spill] sm:$0xff] }
  0xff   : > { %v2758_v57 = vcombine.low %v2750_v62, %v10642_v12  ;;  %v2791_v4 = vcombine.low %v10737_v16, %v2776_v60 }
 0x100   : > { %8385 = vmatmul.mubr.msk.bf16.gmra.mrb[8].mxu1 %vm2334_vm2, %v2660_v40  ;;  %v11023_v40 = vrot.slane %v7957_v8, %v9405_v10  ;;  %v3102_v8 = vcombine.low %v10658_v39, %v10749_v56  ;;  %v12955_v39 = vld [vmem:[#allocation63_spill] sm:$0xff] }
 0x101   : > { %8625 = vmatmul.mubr.msk.bf16.gmra.mrb[32].mxu0 %vm2334_vm2, %v5740_v50  ;;  %8388 = vmatprep.mubr.msk.bf16.mxu1 %vm9306_vm3, %v12789_v27  ;;  %v3086_v50 = vcombine.low %v11012_v13, %v11015_v20  ;;  %v2808_v28 = vcombine.low %v12955_v39, %v12954_v44  ;;  %v6136_v39 = vcombine.low %v12958_v14, %v10737_v16 }
 0x102   : > { %8628 = vmatprep.mubr.msk.bf16.mxu0 %vm9306_vm3, %v12789_v27  ;;  %v5777_v0 = vcombine.low %v11023_v40, %v11026_v3  ;;  %v11054_v56 = vrot.slane %v3102_v8, %v9405_v10  ;;  %v12957_v8 = vld [vmem:[#allocation159_spill] sm:$0xff]  ;;  %v11081_v44 = vrot.slane %v6119_v25, %v9405_v10 }
 0x103   : > { %v11050_v19 = vrot.slane %v3086_v50, %v9405_v10  ;;  %v2857_v50 = vcombine.low %v12938_v26, %v10060_v52  ;;  %v12959_v26 = vld [vmem:[#allocation180_spill] sm:$0xff]  ;;  %v11092_v1 = vrot.slane %v6136_v39, %v9405_v10  ;;  %v12960_v25 = vld [vmem:[#allocation183_spill] sm:$0xff] }
 0x104   : > { %v6137_v52 = vcombine.low %v2776_v60, %v12959_v26  ;;  %v2799_v60 = vrot.slane %v2791_v4, %v9405_v10 }
 0x105   : > { %v5774_v38 = vcombine.low %v5773_v53, %v11050_v19  ;;  %v12961_v53 = vld [vmem:[#allocation88_spill] sm:$0xff] }
 0x106   : > { %v11098_v62 = vrot.slane %v6137_v52, %v9405_v10  ;;  %v12963_v52 = vld [vmem:[#allocation187_spill] sm:$0xff] }
 0x108   : > { %8389 = vmatmul.mubr.msk.bf16.gmra.mrb[12].mxu1 %vm2334_vm2, %v2709_v35  ;;  %v11066_v35 = vrot.slane %v5777_v0, %v9405_v10  ;;  %v2818_v0 = vrot.slane %v2808_v28, %v9405_v10  ;;  %v2867_v28 = vrot.slane %v2857_v50, %v9405_v10 }
 0x109   : > { %8629 = vmatmul.mubr.msk.bf16.gmra.mrb[36].mxu0 %vm2334_vm2, %v5757_v46  ;;  %8392 = vmatprep.mubr.msk.bf16.mxu1 %vm9306_vm3, %v12789_v27  ;;  %v6120_v46 = vcombine.low %v2727_v37, %v12957_v8  ;;  %v5799_v37 = vcombine.low %v11054_v56, %v5784_v31  ;;  %v12962_v31 = vld [vmem:[#allocation86_spill] sm:$0xff] }
 0x10a   : > { %12956 = vst [vmem:[#allocation75_spill] sm:$0xff] %v11066_v35  ;;  %8632 = vmatprep.mubr.msk.bf16.mxu0 %vm9306_vm3, %v12789_v27  ;;  %v5800_v12 = vcombine.low %v11063_v17, %v11066_v35  ;;  %v6153_v26 = vcombine.low %v12960_v25, %v2818_v0  ;;  %v2860_v8 = vcombine.low %v12962_v31, %v12961_v53  ;;  %v12965_v35 = vld [vmem:[#allocation117_spill] sm:$0xff]  ;;  %v12966_v31 = vld [vmem:[#allocation119_spill] sm:$0xff] }
 0x10b   : > { %v11084_v48 = vrot.slane %v6120_v46, %v9405_v10  ;;  %v6154_v46 = vcombine.low %v10805_v54, %v10808_v45  ;;  %v6170_v14 = vcombine.low %v12963_v52, %v2867_v28  ;;  %v6171_v25 = vcombine.low %v10845_v18, %v10850_v24 }
 0x10c   : > { %v11110_v50 = vrot.slane %v6153_v26, %v9405_v10  ;;  %v5807_v45 = vrot.slane %v5799_v37, %v9405_v10  ;;  %v2888_v39 = vrot.slane %v2860_v8, %v9405_v10  ;;  %v2840_v16 = vcombine.low %v2818_v0, %v10805_v54 }
 0x10d   : > { %v11121_v4 = vrot.slane %v6154_v46, %v9405_v10  ;;  %v11126_v26 = vrot.slane %v6170_v14, %v9405_v10  ;;  %v11129_v52 = vrot.slane %v6171_v25, %v9405_v10  ;;  %v2909_v53 = vcombine.low %v10201_v61, %v10218_v7 }
 0x10e   : > { %v2957_v63 = vcombine.low %v12966_v31, %v12965_v35  ;;  %v6188_v8 = vcombine.low %v10885_v23, %v10892_v21  ;;  %v2848_v0 = vrot.slane %v2840_v16, %v9405_v10 }
 0x110   : > { %8393 = vmatmul.mubr.msk.bf16.gmra.mrb[16].mxu1 %vm2334_vm2, %v2758_v57  ;;  %v5814_v57 = vrot.slane %v5800_v12, %v9405_v10  ;;  %v12964_v12 = vld [vmem:[#allocation185_spill] sm:$0xff]  ;;  %v11151_v54 = vrot.slane %v6188_v8, %v9405_v10  ;;  %v11161_v23 = vrot.slane %v2957_v63, %v9405_v10  ;;  %v2890_v8 = vcombine.low %v10850_v24, %v2888_v39 }
 0x111   : > { %8633 = vmatmul.mubr.msk.bf16.gmra.mrb[40].mxu0 %vm2334_vm2, %v5774_v38  ;;  %8396 = vmatprep.mubr.msk.bf16.mxu1 %vm9306_vm3, %v12789_v27  ;;  %v8001_v38 = vcombine.high %v11023_v40, %v11026_v3  ;;  %v2807_v46 = vcombine.low %v2799_v60, %v12964_v12  ;;  %v6187_v3 = vcombine.low %v2888_v39, %v10879_v42 }
 0x112   : > { %8636 = vmatprep.mubr.msk.bf16.mxu0 %vm9306_vm3, %v12789_v27  ;;  %v5815_v25 = vcombine.low %v5807_v45, %v5814_v57  ;;  %v2937_v60 = vrot.slane %v2909_v53, %v9405_v10  ;;  %v12967_v45 = vld [vmem:[#allocation113_spill] sm:$0xff]  ;;  %v12968_v57 = vld [vmem:[#allocation115_spill] sm:$0xff]  ;;  %v6205_v63 = vcombine.low %v10918_v29, %v11161_v23  ;;  %v12970_v29 = vld [vmem:[#allocation162_spill] sm:$0xff]  ;;  %v6221_v39 = vcombine.low %v10929_v30, %v10963_v22 }
 0x113   : > { %v11148_v37 = vrot.slane %v6187_v3, %v9405_v10  ;;  %v5823_v42 = vrot.slane %v8001_v38, %v9405_v10  ;;  %v6085_v53 = vcombine.low %v10864_v34, %v12967_v45  ;;  %v6086_v12 = vcombine.low %v12968_v57, %v10910_v43  ;;  %v12969_v3 = vld [vmem:[#allocation163_spill] sm:$0xff] }
 0x114   : > { %v6204_v16 = vcombine.low %v2937_v60, %v10915_v58  ;;  %v3006_v38 = vcombine.low %v10489_v2, %v10500_v5  ;;  %v11184_v45 = vrot.slane %v6205_v63, %v9405_v10  ;;  %v3054_v14 = vcombine.low %v12970_v29, %v12969_v3 }
 0x115   : > { %v5830_v34 = vrot.slane %v5823_v42, %v9405_v10  ;;  %v6093_v43 = vrot.slane %v6085_v53, %v9405_v10  ;;  %v11205_v42 = vrot.slane %v6221_v39, %v9405_v10  ;;  %v2939_v63 = vcombine.low %v10892_v21, %v2937_v60 }
 0x116   : > { %v11180_v58 = vrot.slane %v6204_v16, %v9405_v10  ;;  %v3028_v57 = vrot.slane %v3006_v38, %v9405_v10  ;;  %v3070_v16 = vrot.slane %v3054_v14, %v9405_v10  ;;  %v8038_v38 = vld [vmem:[%s12457_s1 + $0xe] sm:$0x3] }
 0x118   : > { %8397 = vmatmul.mubr.msk.bf16.gmra.mrb[20].mxu1 %vm2334_vm2, %v2807_v46  ;;  %v2856_v46 = vcombine.low %v2848_v0, %v10836_v51  ;;  %v6100_v51 = vrot.slane %v6086_v12, %v9405_v10  ;;  %v6222_v0 = vcombine.low %v10966_v47, %v3028_v57  ;;  %v6238_v47 = vcombine.low %v10973_v36, %v11005_v33 }
 0x119   : > { %8637 = vmatmul.mubr.msk.bf16.gmra.mrb[44].mxu0 %vm2334_vm2, %v5815_v25  ;;  %8400 = vmatprep.mubr.msk.bf16.mxu1 %vm9306_vm3, %v12789_v27  ;;  %v2889_v25 = vcombine.low %v2867_v28, %v10845_v18  ;;  %v6220_v18 = vcombine.low %v11180_v58, %v11184_v45  ;;  %v2904_v28 = vrot.slane %v2890_v8, %v9405_v10  ;;  %v12972_v8 = vld [vmem:[#allocation135_spill] sm:$0xff]  ;;  %v13037_v45 = vld [vmem:[#allocation86_spill] sm:$0xff] }
 0x11a   : > { %8640 = vmatprep.mubr.msk.bf16.mxu0 %vm9306_vm3, %v12789_v27  ;;  %v11209_v53 = vrot.slane %v6222_v0, %v9405_v10  ;;  %v6101_v22 = vcombine.low %v6093_v43, %v6100_v51  ;;  %v6103_v14 = vcombine.low %v12972_v8, %v10956_v32  ;;  %v6239_v43 = vcombine.low %v3070_v16, %v11012_v13 }
 0x11b   : > { %v2897_v24 = vrot.slane %v2889_v25, %v9405_v10  ;;  %v11225_v51 = vrot.slane %v6238_v47, %v9405_v10  ;;  %v6255_v32 = vcombine.low %v10997_v49, %v11000_v9  ;;  %v6263_v0 = vcombine.low %v11015_v20, %v11054_v56 }
 0x11c   : > { %v11229_v21 = vrot.slane %v6239_v43, %v9405_v10  ;;  %v6117_v60 = vrot.slane %v6103_v14, %v9405_v10  ;;  %v12976_v43 = vld [vmem:[#allocation30_spill] sm:$0xff] }
 0x11d   : > { %v2905_v12 = vcombine.low %v2897_v24, %v2904_v28  ;;  %v6906_v24 = vsel %vm2374_vm0, %v8038_v38, 0  ;;  %v6262_v39 = vrot.slane %v6255_v32, %v9405_v10  ;;  %v11253_v47 = vrot.slane %v6263_v0, %v9405_v10 }
 0x11f   : > { %v6264_v38 = vcombine.low %v6262_v39, %v11063_v17  ;;  %v12973_v17 = vld [vmem:[#allocation25_spill] sm:$0xff] }
 0x120   : > { %8401 = vmatmul.mubr.msk.bf16.gmra.mrb[24].mxu1 %vm2334_vm2, %v2856_v46  ;;  %v12971_v46 = vld [vmem:[#allocation134_spill] sm:$0xff] }
 0x121   : > { %8641 = vmatmul.mubr.msk.bf16.gmra.mrb[48].mxu0 %vm2334_vm2, %v5830_v34  ;;  %8404 = vmatprep.mubr.msk.bf16.mxu1 %vm9306_vm3, %v12789_v27  ;;  %v6102_v25 = vcombine.low %v10339_v55, %v12971_v46  ;;  %v2953_v55 = vrot.slane %v2939_v63, %v9405_v10  ;;  %v11256_v46 = vrot.slane %v6264_v38, %v9405_v10 }
 0x122   : > { %8646 = vmatprep.mubr.msk.bf16.mxu0 %vm9306_vm3, %v12789_v27  ;;  %v12983_v38 = vcombine.low %v11092_v1, %v11098_v62  ;;  %v12989_v62 = vld [vmem:[#allocation7_spill] sm:$0xff] }
 0x123   : > { %v6110_v13 = vrot.slane %v6102_v25, %v9405_v10 }
 0x125   : > { %v6118_v63 = vcombine.low %v6110_v13, %v6117_v60  ;;  %v3085_v60 = vcombine.low %v11005_v33, %v3070_v16  ;;  %v12985_v16 = vld [vmem:[#allocation17_spill] sm:$0xff] }
 0x127   : > { %v3093_v39 = vrot.slane %v3085_v60, %v9405_v10 }
 0x128   : > { %8405 = vmatmul.mubr.msk.bf16.gmra.mrb[28].mxu1 %vm2334_vm2, %v2905_v12  ;;  %v2954_v12 = vcombine.low %v10926_v59, %v2953_v55 }
 0x129   : > { %8647 = vmatmul.mubr.msk.bf16.vlgmr.msra.gmra.mrb[0].mxu0 %vm2334_vm2, %v6101_v22  ;;  %8408 = vmatprep.mubr.msk.bf16.mxu1 %vm9306_vm3, %v12789_v27  ;;  %v2988_v22 = vcombine.low %v11161_v23, %v10929_v30  ;;  %v3037_v30 = vcombine.low %v3028_v57, %v10973_v36  ;;  %v12974_v23 = vld [vmem:[#allocation29_spill] sm:$0xff] }
 0x12a   : > { %8699 = vmatpush3.bf16.msra.mxu0 %v6906_v24  ;;  %8650 = vmatprep.mubr.msk.bf16.mxu0 %vm9306_vm3, %v12789_v27  ;;  %v12975_v8 = vcombine.low %v12973_v17, %v12974_v23  ;;  %v12977_v24 = vld [vmem:[#allocation32_spill] sm:$0xff]  ;;  %v12990_v17 = vld [vmem:[#allocation14_spill] sm:$0xff] }
 0x12b   : > { %8752 = vmatprep.subr.bf16.mxu0 %v12789_v27  ;;  %v3002_v20 = vrot.slane %v2988_v22, %v9405_v10  ;;  %v12978_v55 = vcombine.low %v12976_v43, %v12977_v24  ;;  %v3051_v13 = vrot.slane %v3037_v30, %v9405_v10  ;;  %v12988_v30 = vld [vmem:[#allocation8_spill] sm:$0xff]  ;;  %v3298_v23 = vcombine.low %v12990_v17, %v12989_v62  ;;  %v12992_v43 = vld [vmem:[#allocation11_spill] sm:$0xff]  ;;  %v12997_v17 = vld [vmem:[#allocation26_spill] sm:$0xff] }
 0x12c   : > { %v11273_v14 = vrot.slane %v12975_v8, %v9405_v10  ;;  %v12991_v8 = vld [vmem:[#allocation12_spill] sm:$0xff] }
 0x12d   : > { %v3003_v59 = vcombine.low %v10960_v11, %v3002_v20  ;;  %v11279_v32 = vrot.slane %v12978_v55, %v9405_v10  ;;  %v12979_v11 = vcombine.low %v11081_v44, %v11084_v48  ;;  %v3052_v57 = vcombine.low %v11009_v41, %v3051_v13  ;;  %v12980_v48 = vld [vmem:[#allocation15_spill] sm:$0xff]  ;;  %v12981_v44 = vld [vmem:[#allocation10_spill] sm:$0xff]  ;;  %v12986_v20 = vld [vmem:[#allocation16_spill] sm:$0xff] }
 0x12e   : > { %v4154_v0 = vcombine.low %v12981_v44, %v12980_v48  ;;  %v7929_v33 = vcombine.high %v12981_v44, %v12980_v48  ;;  %v12984_v41 = vld [vmem:[#allocation18_spill] sm:$0xff]  ;;  %v3299_v24 = vcombine.low %v12992_v43, %v12991_v8  ;;  %v3101_v55 = vcombine.low %v3093_v39, %v11050_v19  ;;  %v12999_v43 = vld [vmem:[#allocation27_spill] sm:$0xff] }
 0x12f   : > { %v3314_v44 = vrot.slane %v3298_v23, %v9405_v10  ;;  %v12993_v39 = vcombine.low %v11110_v50, %v11121_v4  ;;  %v12998_v23 = vld [vmem:[#allocation23_spill] sm:$0xff] }
 0x130   : > { %8409 = vmatmul.mubr.msk.bf16.gmra.mrb[32].mxu1 %vm2334_vm2, %v2954_v12  ;;  %v12982_v12 = vld [vmem:[#allocation19_spill] sm:$0xff]  ;;  %v4162_v13 = vrot.slane %v4154_v0, %v9405_v10  ;;  %v3396_v8 = vcombine.low %v12998_v23, %v12997_v17 }
 0x131   : > { %8651 = vmatmul.mubr.msk.bf16.gmra.mrb[4].mxu0 %vm2334_vm2, %v6118_v63  ;;  %8412 = vmatprep.mubr.msk.bf16.mxu1 %vm9306_vm3, %v12789_v27  ;;  %v4155_v22 = vcombine.low %v12982_v12, %v9501_v6  ;;  %v3347_v63 = vcombine.low %v12985_v16, %v12984_v41  ;;  %v3300_v6 = vcombine.low %v12986_v20, %v12980_v48 }
 0x132   : > { %8654 = vmatprep.mubr.msk.bf16.mxu0 %vm9306_vm3, %v12789_v27  ;;  %v3321_v12 = vrot.slane %v3299_v24, %v9405_v10 }
 0x133   : > { %v3363_v60 = vrot.slane %v3347_v63, %v9405_v10  ;;  %v3116_v63 = vrot.slane %v11054_v56, %v9405_v10 }
 0x138   : > { %8413 = vmatmul.mubr.msk.bf16.gmra.mrb[36].mxu1 %vm2334_vm2, %v3003_v59  ;;  %v12987_v59 = vld [vmem:[#allocation9_spill] sm:$0xff] }
 0x139   : > { %8655 = vmatmul.mubr.msk.bf16.gmra.mrb[8].mxu0 %vm2334_vm2, %v12979_v11  ;;  %8416 = vmatprep.mubr.msk.bf16.mxu1 %vm9306_vm3, %v12789_v27  ;;  %v3297_v1 = vcombine.low %v12988_v30, %v12987_v59  ;;  %v4169_v11 = vrot.slane %v4155_v22, %v9405_v10  ;;  %v12995_v30 = vld [vmem:[#allocation22_spill] sm:$0xff] }
 0x13a   : > { %8658 = vmatprep.mubr.msk.bf16.mxu0 %vm9306_vm3, %v12789_v27 }
 0x13b   : > { %v3307_v48 = vrot.slane %v3297_v1, %v9405_v10  ;;  %v4171_v19 = vcombine.low %v3363_v60, %v4169_v11  ;;  %v12996_v1 = vld [vmem:[#allocation21_spill] sm:$0xff] }
 0x13c   : > { %v3395_v62 = vcombine.low %v12996_v1, %v12995_v30  ;;  %v13005_v1 = vld [vmem:[#allocation40_spill] sm:$0xff] }
 0x13d   : > { %v3329_v0 = vcombine.low %v3307_v48, %v3314_v44  ;;  %v11349_v4 = vrot.slane %v4171_v19, %v9405_v10  ;;  %v13002_v48 = vld [vmem:[#allocation33_spill] sm:$0xff]  ;;  %v13003_v44 = vld [vmem:[#allocation31_spill] sm:$0xff] }
 0x13e   : > { %v3405_v19 = vrot.slane %v3395_v62, %v9405_v10  ;;  %v13006_v62 = vld [vmem:[#allocation39_spill] sm:$0xff] }
 0x13f   : > { %v3337_v56 = vrot.slane %v3329_v0, %v9405_v10  ;;  %v3447_v17 = vcombine.low %v13006_v62, %v13005_v1  ;;  %v13014_v1 = vld [vmem:[#allocation59_spill] sm:$0xff] }
 0x140   : > { %8417 = vmatmul.mubr.msk.bf16.gmra.mrb[40].mxu1 %vm2334_vm2, %v3052_v57  ;;  %v3356_v57 = vrot.slane %v7929_v33, %v9405_v10  ;;  %v7930_v33 = vcombine.high %v12985_v16, %v12984_v41  ;;  %v13000_v41 = vld [vmem:[#allocation28_spill] sm:$0xff] }
 0x141   : > { %8659 = vmatmul.mubr.msk.bf16.gmra.mrb[12].mxu0 %vm2334_vm2, %v12983_v38  ;;  %8420 = vmatprep.mubr.msk.bf16.mxu1 %vm9306_vm3, %v12789_v27  ;;  %v3328_v38 = vrot.slane %v3300_v6, %v9405_v10  ;;  %v12994_v6 = vld [vmem:[#allocation20_spill] sm:$0xff]  ;;  %v3397_v16 = vcombine.low %v13000_v41, %v12999_v43 }
 0x142   : > { %8662 = vmatprep.mubr.msk.bf16.mxu0 %vm9306_vm3, %v12789_v27  ;;  %v4170_v20 = vcombine.low %v4162_v13, %v3356_v57  ;;  %v3349_v59 = vcombine.low %v9514_v15, %v12994_v6  ;;  %v3370_v15 = vrot.slane %v7930_v33, %v9405_v10  ;;  %v13001_v13 = vld [vmem:[#allocation24_spill] sm:$0xff] }
 0x143   : > { %v3330_v22 = vcombine.low %v3321_v12, %v3328_v38  ;;  %v7931_v11 = vcombine.high %v13001_v13, %v12999_v43  ;;  %v3444_v12 = vcombine.low %v13003_v44, %v13002_v48  ;;  %v3419_v0 = vrot.slane %v3397_v16, %v9405_v10  ;;  %v8016_v38 = vld.sshfl [vmem:[%s9403_s5 + $0x7c] sm:$0x33 pattern:$0x75316420] }
 0x144   : > { %v11346_v50 = vrot.slane %v4170_v20, %v9405_v10  ;;  %v13004_v20 = vcombine.low %v11126_v26, %v11129_v52  ;;  %v7958_v26 = vld [vmem:[%s12457_s1 + $0x6] sm:$0x3]  ;;  %v4187_v52 = vcombine.low %v13001_v13, %v12999_v43 }
 0x145   : > { %v3344_v24 = vrot.slane %v3330_v22, %v9405_v10  ;;  %v3378_v22 = vcombine.low %v3356_v57, %v3363_v60  ;;  %v11385_v30 = vrot.slane %v7931_v11, %v9405_v10  ;;  %v11390_v23 = vrot.slane %v3444_v12, %v9405_v10  ;;  %v13007_v57 = vld [vmem:[#allocation42_spill] sm:$0xff]  ;;  %v13008_v60 = vld [vmem:[#allocation45_spill] sm:$0xff] }
 0x146   : > { %v4194_v41 = vrot.slane %v4187_v52, %v9405_v10  ;;  %v13012_v12 = vld [vmem:[#allocation58_spill] sm:$0xff] }
 0x147   : > { %v3345_v33 = vcombine.low %v3337_v56, %v3344_v24  ;;  %v4541_v56 = vsel %vm2374_vm0, %v7958_v26, 0  ;;  %v7932_v24 = vcombine.high %v13003_v44, %v13002_v48  ;;  %v3386_v48 = vrot.slane %v3378_v22, %v9405_v10 }
 0x148   : > { %8421 = vmatmul.mubr.msk.bf16.gmra.mrb[44].mxu1 %vm2334_vm2, %v3101_v55  ;;  %v3377_v55 = vrot.slane %v3349_v59, %v9405_v10  ;;  %v13016_v26 = vcombine.low %v11148_v37, %v11151_v54 }
 0x149   : > { %8663 = vmatmul.mubr.msk.bf16.gmra.mrb[16].mxu0 %vm2334_vm2, %v12993_v39  ;;  %8424 = vmatprep.mubr.msk.bf16.mxu1 %vm9306_vm3, %v12789_v27  ;;  %v3412_v39 = vrot.slane %v3396_v8, %v9405_v10  ;;  %v3493_v8 = vcombine.low %v13008_v60, %v13007_v57  ;;  %v11424_v60 = vrot.slane %v3447_v17, %v9405_v10 }
 0x14a   : > { %8666 = vmatprep.mubr.msk.bf16.mxu0 %vm9306_vm3, %v12789_v27  ;;  %v3379_v59 = vcombine.low %v3370_v15, %v3377_v55  ;;  %v13010_v15 = vld [vmem:[#allocation38_spill] sm:$0xff]  ;;  %v11435_v54 = vrot.slane %v7932_v24, %v9405_v10  ;;  %v13020_v24 = vld [vmem:[#allocation68_spill] sm:$0xff] }
 0x14b   : > { %v7071_v6 = vcombine.low %v3412_v39, %v3419_v0  ;;  %v4196_v57 = vcombine.low %v3412_v39, %v4194_v41  ;;  %13017 = vst [vmem:[#allocation145_spill] sm:$0xff] %v11424_v60  ;;  %v11427_v41 = vrot.slane %v3493_v8, %v9405_v10  ;;  %v3427_v37 = vcombine.low %v3405_v19, %v3412_v39 }
 0x14c   : > { %v3393_v44 = vrot.slane %v3379_v59, %v9405_v10  ;;  %13019 = vst [vmem:[#allocation137_spill] sm:$0xff] %v11435_v54 }
 0x14d   : > { %v11399_v43 = vrot.slane %v7071_v6, %v9405_v10  ;;  %13018 = vst [vmem:[#allocation121_spill] sm:$0xff] %v11427_v41 }
 0x14e   : > { %v3394_v39 = vcombine.low %v3386_v48, %v3393_v44  ;;  %v13025_v48 = vld [vmem:[#allocation49_spill] sm:$0xff] }
 0x14f   : > { %13009 = vst [vmem:[#allocation95_spill] sm:$0xff] %v11399_v43 }
 0x150   : > { %8425 = vmatmul.mubr.msk.bf16.gmra.mrb[48].mxu1 %vm2334_vm2, %v3116_v63  ;;  %v4195_v63 = vcombine.low %v3377_v55, %v3405_v19  ;;  %v13011_v55 = vld [vmem:[#allocation37_spill] sm:$0xff] }
 0x151   : > { %8667 = vmatmul.mubr.msk.bf16.gmra.mrb[20].mxu0 %vm2334_vm2, %v13004_v20  ;;  %8430 = vmatprep.mubr.msk.bf16.mxu1 %vm9306_vm3, %v12789_v27  ;;  %v3446_v13 = vcombine.low %v13011_v55, %v13010_v15  ;;  %v13013_v20 = vld [vmem:[#allocation57_spill] sm:$0xff]  ;;  %v13021_v15 = vld [vmem:[#allocation66_spill] sm:$0xff] }
 0x152   : > { %8670 = vmatprep.mubr.msk.bf16.mxu0 %vm9306_vm3, %v12789_v27  ;;  %v11396_v16 = vrot.slane %v4195_v63, %v9405_v10  ;;  %v3543_v52 = vcombine.low %v13013_v20, %v13012_v12  ;;  %v13015_v63 = vld [vmem:[#allocation60_spill] sm:$0xff]  ;;  %v7935_v55 = vcombine.high %v13021_v15, %v13020_v24  ;;  %v13023_v12 = vld [vmem:[#allocation71_spill] sm:$0xff] }
 0x153   : > { %v3544_v62 = vcombine.low %v13015_v63, %v13014_v1  ;;  %v11438_v22 = vrot.slane %v3446_v13, %v9405_v10  ;;  %v13022_v13 = vld [vmem:[#allocation73_spill] sm:$0xff]  ;;  %v3476_v63 = vcombine.low %v11390_v23, %v11435_v54 }
 0x154   : > { %v11441_v59 = vrot.slane %v3543_v52, %v9405_v10  ;;  %v3593_v20 = vcombine.low %v13023_v12, %v13022_v13  ;;  %v8015_v52 = vld.sshfl [vmem:[%s9403_s5 + $0x78] sm:$0x33 pattern:$0x75316420]  ;;  %v11469_v19 = vrot.slane %v7935_v55, %v9405_v10 }
 0x155   : > { %v11444_v17 = vrot.slane %v3544_v62, %v9405_v10  ;;  %v3477_v62 = vcombine.low %v11438_v22, %v11424_v60  ;;  %v6043_v6 = vcombine.high %v8015_v52, %v8015_v52  ;;  %v3484_v55 = vrot.slane %v3476_v63, %v9405_v10 }
 0x156   : > { %v11472_v1 = vrot.slane %v3593_v20, %v9405_v10 }
 0x157   : > { %v3491_v20 = vrot.slane %v3477_v62, %v9405_v10  ;;  %v11498_v36 = vrot.slane %v6043_v6, %v9405_v10  ;;  %v6067_v62 = vcombine.high %v8016_v38, %v8016_v38 }
 0x158   : > { %8431 = vmatmul.mubr.msk.bf16.vlgmr.msra.gmra.mrb[0].mxu1 %vm2334_vm2, %v3345_v33  ;;  %v11430_v33 = vrot.slane %v4196_v57, %v9405_v10  ;;  %v13024_v57 = vld [vmem:[#allocation50_spill] sm:$0xff] }
 0x159   : > { %8671 = vmatmul.mubr.msk.bf16.gmra.mrb[24].mxu0 %vm2334_vm2, %v13016_v26  ;;  %8434 = vmatprep.mubr.msk.bf16.mxu1 %vm9306_vm3, %v12789_v27  ;;  %v3494_v44 = vcombine.low %v13025_v48, %v13024_v57  ;;  %v13027_v48 = vld [vmem:[#allocation51_spill] sm:$0xff]  ;;  %13031 = vst [vmem:[#allocation159_spill] sm:$0xff] %v11498_v36  ;;  %v6549_v34 = vshrl.u32 %v11498_v36, 16 }
 0x15a   : > { %8674 = vmatprep.mubr.msk.bf16.mxu0 %vm9306_vm3, %v12789_v27  ;;  %8483 = vmatpush3.bf16.msra.mxu1 %v4541_v56  ;;  %v3428_v56 = vcombine.low %v3419_v0, %v11385_v30  ;;  %v3435_v0 = vrot.slane %v3427_v37, %v9405_v10  ;;  %v13026_v37 = vld [vmem:[#allocation46_spill] sm:$0xff] }
 0x15b   : > { %8806 = vmatprep.subr.bf16.mxu1 %v12789_v27  ;;  %v11489_v58 = vrot.slane %v3494_v44, %v9405_v10  ;;  %v3492_v44 = vcombine.low %v3484_v55, %v3491_v20  ;;  %v13036_v55 = vld [vmem:[#allocation83_spill] sm:$0xff] }
 0x15c   : > { %v3442_v26 = vrot.slane %v3428_v56, %v9405_v10  ;;  %v13028_v56 = vld [vmem:[#allocation48_spill] sm:$0xff] }
 0x15d   : > { %v3496_v11 = vcombine.low %v13028_v56, %v13027_v48  ;;  %13029 = vst [vmem:[#allocation158_spill] sm:$0xff] %v11489_v58  ;;  %v3525_v28 = vcombine.low %v11427_v41, %v11489_v58  ;;  %v13039_v58 = vcombine.low %v11205_v42, %v11209_v53 }
 0x15e   : > { %v3443_v8 = vcombine.low %v3435_v0, %v3442_v26  ;;  %v11512_v0 = vcombine.high %v11023_v40, %v11023_v40  ;;  %v11517_v26 = vrot.slane %v8016_v38, %v9405_v10 }
 0x15f   : > { %v11504_v63 = vrot.slane %v3496_v11, %v9405_v10  ;;  %v6059_v11 = vcombine.high %v11498_v36, %v11498_v36 }
 0x160   : > { %8435 = vmatmul.mubr.msk.bf16.gmra.mrb[4].mxu1 %vm2334_vm2, %v3394_v39  ;;  %v7933_v39 = vcombine.high %v13026_v37, %v13024_v57  ;;  %13033 = vst [vmem:[#allocation180_spill] sm:$0xff] %v11512_v0  ;;  %13034 = vst [vmem:[#allocation183_spill] sm:$0xff] %v11517_v26 }
 0x161   : > { %8675 = vmatmul.mubr.msk.bf16.gmra.mrb[28].mxu0 %vm2334_vm2, %v6220_v18  ;;  %8438 = vmatprep.mubr.msk.bf16.mxu1 %vm9306_vm3, %v12789_v27  ;;  %v11494_v18 = vrot.slane %v8015_v52, %v9405_v10  ;;  %13032 = vst [vmem:[#allocation160_spill] sm:$0xff] %v11504_v63  ;;  %v7934_v52 = vcombine.high %v13028_v56, %v13027_v48  ;;  %v13038_v48 = vld [vmem:[#allocation85_spill] sm:$0xff]  ;;  %v6562_v42 = vshll.u32 %v6059_v11, 16  ;;  %v6565_v53 = vshrl.u32 %v6059_v11, 16 }
 0x162   : > { %8678 = vmatprep.mubr.msk.bf16.mxu0 %vm9306_vm3, %v12789_v27  ;;  %v11501_v25 = vrot.slane %v7933_v39, %v9405_v10  ;;  %v13035_v39 = vld [vmem:[#allocation84_spill] sm:$0xff]  ;;  %v3642_v56 = vcombine.low %v13038_v48, %v13037_v45  ;;  %v13040_v45 = vld [vmem:[#allocation63_spill] sm:$0xff]  ;;  %v13041_v48 = vld [vmem:[#allocation61_spill] sm:$0xff] }
 0x163   : > { %13030 = vst [vmem:[#allocation141_spill] sm:$0xff] %v11494_v18  ;;  %v6058_v6 = vcombine.high %v11494_v18, %v11494_v18  ;;  %v3641_v20 = vcombine.low %v13036_v55, %v13035_v39  ;;  %v3545_v43 = vcombine.low %v13041_v48, %v13040_v45  ;;  %v6280_v54 = vcombine.low %v11512_v0, %v11494_v18 }
 0x164   : > { %v3526_v38 = vcombine.low %v11501_v25, %v11504_v63  ;;  %v11553_v41 = vrot.slane %v3642_v56, %v9405_v10  ;;  %v11566_v56 = vrot.slane %v7934_v52, %v9405_v10 }
 0x165   : > { %v6554_v39 = vshll.u32 %v6058_v6, 16  ;;  %v6557_v55 = vshrl.u32 %v6058_v6, 16  ;;  %v11550_v63 = vrot.slane %v3641_v20, %v9405_v10  ;;  %v6281_v60 = vcombine.low %v11498_v36, %v6058_v6 }
 0x166   : > { %13043 = vst [vmem:[#allocation187_spill] sm:$0xff] %v11566_v56  ;;  %v3533_v6 = vrot.slane %v3525_v28, %v9405_v10 }
 0x167   : > { %v6556_v61 = vsel %vm9433_vm1, %v6549_v34, %v6554_v39  ;;  %v6564_v45 = vsel %vm9433_vm1, %v6557_v55, %v6562_v42  ;;  %v6282_v34 = vcombine.low %v6059_v11, %v11517_v26  ;;  %v3540_v11 = vrot.slane %v3526_v38, %v9405_v10  ;;  %v13046_v38 = vld [vmem:[#allocation100_spill] sm:$0xff] }
 0x168   : > { %8439 = vmatmul.mubr.msk.bf16.gmra.mrb[8].mxu1 %vm2334_vm2, %v3443_v8  ;;  %v11536_v8 = vrot.slane %v6067_v62, %v9405_v10  ;;  %v6573_v62 = vshrl.u32 %v11517_v26, 16  ;;  %v6804_v18 = vcombine.low %v6556_v61, %v6564_v45  ;;  %v11575_v42 = vrot.slane %v3545_v43, %v9405_v10 }
 0x169   : > { %8679 = vmatmul.mubr.msk.bf16.gmra.mrb[32].mxu0 %vm2334_vm2, %v13039_v58  ;;  %8442 = vmatprep.mubr.msk.bf16.mxu1 %vm9306_vm3, %v12789_v27  ;;  %v6570_v58 = vshll.u32 %v11517_v26, 16  ;;  %v6296_v28 = vrot.slane %v6281_v60, %v9405_v10  ;;  %v13169_v2 = vcombine.low %v11550_v63, %v11553_v41 }
 0x16a   : > { %8682 = vmatprep.mubr.msk.bf16.mxu0 %vm9306_vm3, %v12789_v27  ;;  %v6578_v15 = vshll.u32 %v11536_v8, 16  ;;  %v11569_v55 = vrot.slane %v6804_v18, %v9405_v10  ;;  %v6289_v18 = vrot.slane %v6280_v54, %v9405_v10  ;;  %v3541_v54 = vcombine.low %v3533_v6, %v3540_v11 }
 0x16b   : > { %v6572_v48 = vsel %vm9433_vm1, %v6565_v53, %v6570_v58  ;;  %v3575_v60 = vcombine.low %v11444_v17, %v11575_v42  ;;  %v3692_v53 = vcombine.low %v10218_v7, %v13046_v38  ;;  %v13047_v58 = vld [vmem:[#allocation116_spill] sm:$0xff]  ;;  %v13054_v11 = vcombine.low %v11253_v47, %v11256_v46  ;;  %v13057_v38 = vld [vmem:[#allocation89_spill] sm:$0xff] }
 0x16c   : > { %v6580_v39 = vsel %vm9433_vm1, %v6573_v62, %v6578_v15  ;;  %v13044_v15 = vcombine.low %v11225_v51, %v11229_v21  ;;  %v3574_v51 = vcombine.low %v11566_v56, %v11441_v59  ;;  %v13045_v21 = vld [vmem:[#allocation72_spill] sm:$0xff]  ;;  %v13048_v62 = vld [vmem:[#allocation114_spill] sm:$0xff] }
 0x16d   : > { %v6805_v0 = vcombine.low %v6572_v48, %v6580_v39  ;;  %v3591_v52 = vcombine.low %v13045_v21, %v13020_v24  ;;  %v3738_v45 = vcombine.low %v13048_v62, %v13047_v58  ;;  %v13049_v48 = vld [vmem:[#allocation75_spill] sm:$0xff]  ;;  %v11616_v7 = vrot.slane %v3692_v53, %v9405_v10  ;;  %v13059_v62 = vld [vmem:[#allocation120_spill] sm:$0xff] }
 0x16e   : > { %v13058_v53 = vld [vmem:[#allocation87_spill] sm:$0xff] }
 0x16f   : > { %v11578_v61 = vrot.slane %v6805_v0, %v9405_v10  ;;  %v7936_v0 = vcombine.high %v13023_v12, %v13022_v13  ;;  %v3582_v13 = vrot.slane %v3574_v51, %v9405_v10  ;;  %v3589_v12 = vrot.slane %v3575_v60, %v9405_v10  ;;  %13052 = vst [vmem:[#allocation113_spill] sm:$0xff] %v11616_v7 }
 0x170   : > { %8443 = vmatmul.mubr.msk.bf16.gmra.mrb[12].mxu1 %vm2334_vm2, %v3492_v44  ;;  %v6303_v44 = vrot.slane %v6282_v34, %v9405_v10  ;;  %v6304_v34 = vcombine.low %v13049_v48, %v6289_v18  ;;  %v11619_v6 = vrot.slane %v3738_v45, %v9405_v10  ;;  %v3643_v58 = vcombine.low %v13058_v53, %v13057_v38  ;;  %v13060_v48 = vld [vmem:[#allocation139_spill] sm:$0xff]  ;;  %v13066_v53 = vld [vmem:[#allocation98_spill] sm:$0xff] }
 0x171   : > { %8683 = vmatmul.mubr.msk.bf16.gmra.mrb[36].mxu0 %vm2334_vm2, %v13044_v15  ;;  %8446 = vmatprep.mubr.msk.bf16.mxu1 %vm9306_vm3, %v12789_v27  ;;  %v11607_v15 = vrot.slane %v3591_v52, %v9405_v10  ;;  %v11610_v21 = vrot.slane %v7936_v0, %v9405_v10  ;;  %v13055_v52 = vld [vmem:[#allocation81_spill] sm:$0xff]  ;;  %v13056_v0 = vld [vmem:[#allocation80_spill] sm:$0xff]  ;;  %v3590_v60 = vcombine.low %v3582_v13, %v3589_v12 }
 0x172   : > { %8686 = vmatprep.mubr.msk.bf16.mxu0 %vm9306_vm3, %v12789_v27  ;;  %v6305_v39 = vcombine.low %v6296_v28, %v6303_v44  ;;  %13053 = vst [vmem:[#allocation115_spill] sm:$0xff] %v11619_v6  ;;  %v6312_v18 = vrot.slane %v6304_v34, %v9405_v10  ;;  %v11631_v44 = vcombine.high %v11517_v26, %v11517_v26  ;;  %v13061_v34 = vld [vmem:[#allocation138_spill] sm:$0xff] }
 0x173   : > { %13050 = vst [vmem:[#allocation185_spill] sm:$0xff] %v11607_v15  ;;  %13051 = vst [vmem:[#allocation119_spill] sm:$0xff] %v11610_v21  ;;  %v3623_v47 = vcombine.low %v11607_v15, %v11469_v19  ;;  %v3624_v46 = vcombine.low %v11472_v1, %v11610_v21  ;;  %v7939_v45 = vcombine.high %v12965_v35, %v13059_v62  ;;  %v13069_v26 = vld [vmem:[#allocation146_spill] sm:$0xff] }
 0x174   : > { %v6319_v28 = vrot.slane %v6305_v39, %v9405_v10  ;;  %v3787_v39 = vcombine.low %v13061_v34, %v13060_v48  ;;  %v6321_v51 = vcombine.low %v11536_v8, %v11631_v44  ;;  %v11658_v13 = vrot.slane %v3643_v58, %v9405_v10  ;;  %v13067_v58 = vld [vmem:[#allocation96_spill] sm:$0xff] }
 0x175   : > { %v3631_v20 = vrot.slane %v3623_v47, %v9405_v10  ;;  %v3638_v43 = vrot.slane %v3624_v46, %v9405_v10  ;;  %v11661_v12 = vrot.slane %v7939_v45, %v9405_v10  ;;  %v3690_v45 = vcombine.low %v13067_v58, %v13066_v53 }
 0x176   : > { %13062 = vst [vmem:[#allocation162_spill] sm:$0xff] %v11658_v13 }
 0x177   : > { %13063 = vst [vmem:[#allocation134_spill] sm:$0xff] %v11661_v12  ;;  %v3639_v46 = vcombine.low %v3631_v20, %v3638_v43  ;;  %v13070_v20 = vld [vmem:[#allocation164_spill] sm:$0xff]  ;;  %v11694_v35 = vrot.slane %v3690_v45, %v9405_v10 }
 0x178   : > { %8447 = vmatmul.mubr.msk.bf16.gmra.mrb[16].mxu1 %vm2334_vm2, %v3541_v54  ;;  %v3640_v54 = vcombine.low %v13056_v0, %v13055_v52  ;;  %v3836_v43 = vcombine.low %v13070_v20, %v12970_v29  ;;  %v13077_v20 = vld [vmem:[#allocation34_spill] sm:$0xff] }
 0x179   : > { %8687 = vmatmul.mubr.msk.bf16.gmra.mrb[40].mxu0 %vm2334_vm2, %v13054_v11  ;;  %8450 = vmatprep.mubr.msk.bf16.mxu1 %vm9306_vm3, %v12789_v27  ;;  %v6320_v11 = vcombine.low %v6312_v18, %v6319_v28  ;;  %v11664_v18 = vrot.slane %v3787_v39, %v9405_v10  ;;  %v6328_v28 = vrot.slane %v6321_v51, %v9405_v10 }
 0x17a   : > { %8690 = vmatprep.mubr.msk.bf16.mxu0 %vm9306_vm3, %v12789_v27  ;;  %v11654_v52 = vrot.slane %v3640_v54, %v9405_v10  ;;  %v13065_v54 = vld [vmem:[#allocation88_spill] sm:$0xff]  ;;  %v3673_v39 = vcombine.low %v11553_v41, %v11658_v13  ;;  %v7938_v51 = vcombine.high %v13067_v58, %v13066_v53  ;;  %13071 = vst [vmem:[#allocation25_spill] sm:$0xff] %v11694_v35  ;;  %v13079_v13 = vld [vmem:[#allocation43_spill] sm:$0xff] }
 0x17b   : > { %13064 = vst [vmem:[#allocation135_spill] sm:$0xff] %v11664_v18  ;;  %v6335_v47 = vrot.slane %v6328_v28, %v9405_v10  ;;  %v11705_v29 = vrot.slane %v3836_v43, %v9405_v10  ;;  %v13078_v28 = vld [vmem:[#allocation44_spill] sm:$0xff] }
 0x17c   : > { %v3672_v0 = vcombine.low %v11654_v52, %v11550_v63  ;;  %v3687_v53 = vrot.slane %v3673_v39, %v9405_v10  ;;  %v11699_v58 = vrot.slane %v7938_v51, %v9405_v10  ;;  %v13075_v39 = vld [vmem:[#allocation122_spill] sm:$0xff] }
 0x17d   : > { %v3740_v51 = vcombine.low %v13075_v39, %v13059_v62  ;;  %v13083_v39 = vld [vmem:[#allocation52_spill] sm:$0xff] }
 0x17e   : > { %v3680_v15 = vrot.slane %v3672_v0, %v9405_v10  ;;  %13072 = vst [vmem:[#allocation29_spill] sm:$0xff] %v11699_v58 }
 0x180   : > { %8451 = vmatmul.mubr.msk.bf16.gmra.mrb[20].mxu1 %vm2334_vm2, %v3590_v60  ;;  %v7937_v60 = vcombine.high %v13065_v54, %v13057_v38  ;;  %v3688_v0 = vcombine.low %v3680_v15, %v3687_v53 }
 0x181   : > { %8691 = vmatmul.mubr.msk.bf16.gmra.mrb[44].mxu0 %vm2334_vm2, %v6320_v11  ;;  %8454 = vmatprep.mubr.msk.bf16.mxu1 %vm9306_vm3, %v12789_v27  ;;  %v13068_v11 = vld [vmem:[#allocation144_spill] sm:$0xff]  ;;  %v13170_v63 = vld [vmem:[#allocation25_spill] sm:$0xff] }
 0x182   : > { %8694 = vmatprep.mubr.msk.bf16.mxu0 %vm9306_vm3, %v12789_v27  ;;  %v3790_v21 = vcombine.low %v13069_v26, %v13068_v11  ;;  %v11691_v56 = vrot.slane %v7937_v60, %v9405_v10  ;;  %v13074_v60 = vld [vmem:[#allocation118_spill] sm:$0xff]  ;;  %v13076_v11 = vld [vmem:[#allocation41_spill] sm:$0xff] }
 0x183   : > { %v3739_v45 = vcombine.low %v13074_v60, %v12966_v31  ;;  %v6616_v43 = vcombine.low %v13077_v20, %v13076_v11  ;;  %v11737_v31 = vrot.slane %v3740_v51, %v9405_v10  ;;  %v13081_v60 = vcombine.low %v11273_v14, %v11279_v32  ;;  %v13085_v11 = vld [vmem:[#allocation55_spill] sm:$0xff]  ;;  %v13086_v20 = vld [vmem:[#allocation54_spill] sm:$0xff] }
 0x184   : > { %v11702_v26 = vrot.slane %v3790_v21, %v9405_v10  ;;  %v8052_v21 = vld [vmem:[%s12457_s1 + $0x10] sm:$0x3] }
 0x185   : > { %v7274_v15 = vsel %vm2374_vm0, %v8052_v21, 0  ;;  %13080 = vst [vmem:[#allocation32_spill] sm:$0xff] %v11737_v31  ;;  %v3771_v32 = vcombine.low %v11737_v31, %v11661_v12  ;;  %v13082_v21 = vld [vmem:[#allocation143_spill] sm:$0xff]  ;;  %v13097_v31 = vld [vmem:[#allocation93_spill] sm:$0xff]  ;;  %vm7586_vm0 = vcmask 1043456  }
 0x186   : > { %13073 = vst [vmem:[#allocation30_spill] sm:$0xff] %v11702_v26 }
 0x188   : > { %8455 = vmatmul.mubr.msk.bf16.gmra.mrb[24].mxu1 %vm2334_vm2, %v3639_v46  ;;  %v3721_v46 = vcombine.low %v11691_v56, %v11694_v35  ;;  %v6617_v35 = vcombine.low %v13079_v13, %v13078_v28  ;;  %v6624_v13 = vrot.slane %v6616_v43, %v9405_v10  ;;  %v6634_v43 = vcombine.low %v13086_v20, %v13085_v11  ;;  %v13095_v20 = vld [vmem:[#allocation67_spill] sm:$0xff] }
 0x189   : > { %8695 = vmatmul.mubr.msk.bf16.gmra.mrb[48].mxu0 %vm2334_vm2, %v6335_v47  ;;  %8458 = vmatprep.mubr.msk.bf16.mxu1 %vm9306_vm3, %v12789_v27  ;;  %v3722_v47 = vcombine.low %v11699_v58, %v11616_v7  ;;  %v11734_v7 = vrot.slane %v3739_v45, %v9405_v10 }
 0x18a   : > { %8700 = vmatprep.mubr.msk.bf16.mxu0 %vm9306_vm3, %v12789_v27  ;;  %v3729_v53 = vrot.slane %v3721_v46, %v9405_v10  ;;  %v6631_v28 = vrot.slane %v6617_v35, %v9405_v10  ;;  %v7940_v46 = vcombine.high %v13061_v34, %v13060_v48  ;;  %v13084_v35 = vld [vmem:[#allocation47_spill] sm:$0xff]  ;;  %v3785_v34 = vrot.slane %v3771_v32, %v9405_v10 }
 0x18b   : > { %v3736_v58 = vrot.slane %v3722_v47, %v9405_v10  ;;  %v3770_v14 = vcombine.low %v11619_v6, %v11734_v7  ;;  %v3789_v47 = vcombine.low %v10500_v5, %v13082_v21  ;;  %v6633_v51 = vcombine.low %v13084_v35, %v13083_v39  ;;  %v13091_v21 = vld [vmem:[#allocation168_spill] sm:$0xff] }
 0x18c   : > { %v6632_v45 = vcombine.low %v6624_v13, %v6631_v28  ;;  %v13089_v13 = vld [vmem:[#allocation165_spill] sm:$0xff]  ;;  %v13090_v28 = vld [vmem:[#allocation167_spill] sm:$0xff]  ;;  %v13093_v35 = vld [vmem:[#allocation64_spill] sm:$0xff] }
 0x18d   : > { %v3778_v48 = vrot.slane %v3770_v14, %v9405_v10  ;;  %v6641_v5 = vrot.slane %v6633_v51, %v9405_v10  ;;  %v7941_v32 = vcombine.high %v12969_v3, %v13089_v13  ;;  %v13094_v51 = vld [vmem:[#allocation62_spill] sm:$0xff] }
 0x18e   : > { %v6650_v11 = vcombine.low %v13094_v51, %v13093_v35  ;;  %v13106_v35 = vld [vmem:[#allocation106_spill] sm:$0xff]  ;;  %v13107_v51 = vld [vmem:[#allocation107_spill] sm:$0xff] }
 0x18f   : > { %v13108_v6 = vcombine.low %v13106_v35, %v13107_v51 }
 0x190   : > { %8459 = vmatmul.mubr.msk.bf16.gmra.mrb[28].mxu1 %vm2334_vm2, %v3688_v0  ;;  %v3737_v0 = vcombine.low %v3729_v53, %v3736_v58  ;;  %v11768_v58 = vrot.slane %v3789_v47, %v9405_v10  ;;  %v6648_v53 = vrot.slane %v6634_v43, %v9405_v10  ;;  %v13092_v47 = vld [vmem:[#allocation166_spill] sm:$0xff]  ;;  %v13096_v43 = vld [vmem:[#allocation65_spill] sm:$0xff] }
 0x191   : > { %8701 = vmatmul.mubr.msk.bf16.vlgmr.msra.gmra.mrb[0].mxu0 %vm2334_vm2, %v13081_v60  ;;  %8462 = vmatprep.mubr.msk.bf16.mxu1 %vm9306_vm3, %v12789_v27 }
 0x192   : > { %8753 = vmatpush3.bf16.msra.mxu0 %v7274_v15  ;;  %8704 = vmatprep.mubr.msk.bf16.mxu0 %vm9306_vm3, %v12789_v27  ;;  %v11762_v15 = vrot.slane %v7940_v46, %v9405_v10  ;;  %13088 = vst [vmem:[#allocation10_spill] sm:$0xff] %v11768_v58  ;;  %v3837_v46 = vcombine.low %v13090_v28, %v13089_v13  ;;  %v13098_v28 = vld [vmem:[#allocation101_spill] sm:$0xff]  ;;  %v13103_v13 = vld [vmem:[#allocation104_spill] sm:$0xff] }
 0x193   : > { %v3820_v14 = vcombine.low %v11768_v58, %v11702_v26  ;;  %v6649_v39 = vcombine.low %v6641_v5, %v6648_v53  ;;  %v13100_v26 = vld [vmem:[#allocation102_spill] sm:$0xff]  ;;  %v13104_v58 = vld [vmem:[#allocation105_spill] sm:$0xff] }
 0x194   : > { %13087 = vst [vmem:[#allocation15_spill] sm:$0xff] %v11762_v15  ;;  %v3819_v60 = vcombine.low %v11664_v18, %v11762_v15  ;;  %v6651_v15 = vcombine.low %v13096_v43, %v13095_v20  ;;  %v13101_v18 = vld [vmem:[#allocation103_spill] sm:$0xff]  ;;  %v13105_v5 = vcombine.low %v13103_v13, %v13104_v58  ;;  %v5138_v20 = vrot.slane %v13108_v6, %v9405_v10 }
 0x195   : > { %v13102_v12 = vcombine.low %v13100_v26, %v13101_v18  ;;  %v11808_v43 = vrot.slane %v3837_v46, %v9405_v10  ;;  %v3834_v18 = vrot.slane %v3820_v14, %v9405_v10  ;;  %v6658_v6 = vrot.slane %v6650_v11, %v9405_v10  ;;  %v13111_v11 = vld [vmem:[#allocation69_spill] sm:$0xff] }
 0x196   : > { %v5131_v53 = vrot.slane %v13105_v5, %v9405_v10  ;;  %v6665_v58 = vrot.slane %v6651_v15, %v9405_v10  ;;  %v13110_v15 = vld [vmem:[#allocation76_spill] sm:$0xff] }
 0x197   : > { %v5124_v3 = vrot.slane %v13102_v12, %v9405_v10  ;;  %13109 = vst [vmem:[#allocation19_spill] sm:$0xff] %v11808_v43  ;;  %v11814_v12 = vrot.slane %v7941_v32, %v9405_v10  ;;  %v3868_v46 = vcombine.low %v11705_v29, %v11808_v43 }
 0x198   : > { %8463 = vmatmul.mubr.msk.bf16.gmra.mrb[32].mxu1 %vm2334_vm2, %v3737_v0  ;;  %v3786_v0 = vcombine.low %v3778_v48, %v3785_v34  ;;  %v13099_v48 = vcombine.low %v13097_v31, %v13098_v28  ;;  %v3827_v31 = vrot.slane %v3819_v60, %v9405_v10  ;;  %v5140_v13 = vcombine.low %v5131_v53, %v5138_v20 }
 0x199   : > { %8705 = vmatmul.mubr.msk.bf16.gmra.mrb[4].mxu0 %vm2334_vm2, %v6632_v45  ;;  %8466 = vmatprep.mubr.msk.bf16.mxu1 %vm9306_vm3, %v12789_v27  ;;  %v3839_v45 = vcombine.low %v13092_v47, %v13091_v21  ;;  %v6667_v28 = vcombine.low %v13111_v11, %v13110_v15  ;;  %v3876_v53 = vrot.slane %v3868_v46, %v9405_v10  ;;  %v13116_v46 = vld [vmem:[#allocation92_spill] sm:$0xff] }
 0x19a   : > { %8708 = vmatprep.mubr.msk.bf16.mxu0 %vm9306_vm3, %v12789_v27  ;;  %v5117_v34 = vrot.slane %v13099_v48, %v9405_v10  ;;  %v13112_v48 = vld [vmem:[#allocation79_spill] sm:$0xff] }
 0x19b   : > { %v11817_v26 = vrot.slane %v3839_v45, %v9405_v10  ;;  %v11834_v45 = vrot.slane %v5140_v13, %v9405_v10  ;;  %v6675_v51 = vrot.slane %v6667_v28, %v9405_v10  ;;  %v13119_v28 = vld [vmem:[#allocation109_spill] sm:$0xff] }
 0x19c   : > { %v5139_v60 = vcombine.low %v5117_v34, %v5124_v3  ;;  %v13113_v3 = vld [vmem:[#allocation78_spill] sm:$0xff] }
 0x19d   : > { %v3869_v14 = vcombine.low %v11814_v12, %v11817_v26  ;;  %v6668_v34 = vcombine.low %v13113_v3, %v13112_v48  ;;  %v13120_v48 = vld [vmem:[#allocation94_spill] sm:$0xff] }
 0x19e   : > { %v11831_v32 = vrot.slane %v5139_v60, %v9405_v10  ;;  %v13115_v60 = vld [vmem:[#allocation82_spill] sm:$0xff]  ;;  %v6701_v3 = vcombine.low %v13120_v48, %v13119_v28 }
 0x19f   : > { %v3883_v35 = vrot.slane %v3869_v14, %v9405_v10  ;;  %v6682_v20 = vrot.slane %v6668_v34, %v9405_v10  ;;  %v13121_v34 = vld [vmem:[#allocation111_spill] sm:$0xff] }
 0x1a0   : > { %8467 = vmatmul.mubr.msk.bf16.gmra.mrb[36].mxu1 %vm2334_vm2, %v3786_v0  ;;  %v3835_v0 = vcombine.low %v3827_v31, %v3834_v18  ;;  %v7942_v18 = vcombine.high %v13092_v47, %v13091_v21 }
 0x1a1   : > { %8709 = vmatmul.mubr.msk.bf16.gmra.mrb[8].mxu0 %vm2334_vm2, %v6649_v39  ;;  %8470 = vmatprep.mubr.msk.bf16.mxu1 %vm9306_vm3, %v12789_v27  ;;  %v6666_v39 = vcombine.low %v6658_v6, %v6665_v58  ;;  %v3884_v31 = vcombine.low %v3876_v53, %v3883_v35  ;;  %v6683_v6 = vcombine.low %v6675_v51, %v6682_v20  ;;  %v13114_v58 = vld [vmem:[#allocation90_spill] sm:$0xff]  ;;  %v4706_v51 = vshrl.u32 %v10997_v49, 16 }
 0x1a2   : > { %8712 = vmatprep.mubr.msk.bf16.mxu0 %vm9306_vm3, %v12789_v27  ;;  %v6684_v13 = vcombine.low %v13115_v60, %v13114_v58  ;;  %v13122_v53 = vld [vmem:[#allocation110_spill] sm:$0xff]  ;;  %v4711_v20 = vshll.u32 %v11000_v9, 16  ;;  %v13123_v58 = vld [vmem:[#allocation131_spill] sm:$0xff]  ;;  %v13124_v60 = vld [vmem:[#allocation112_spill] sm:$0xff] }
 0x1a3   : > { %v6702_v35 = vcombine.low %v13122_v53, %v13121_v34 }
 0x1a4   : > { %v6692_v15 = vrot.slane %v6684_v13, %v9405_v10  ;;  %v6718_v13 = vcombine.low %v13124_v60, %v13123_v58  ;;  %v13136_v60 = vld [vmem:[#allocation5_spill] sm:$0xff] }
 0x1a6   : > { %v6726_v34 = vrot.slane %v6718_v13, %v9405_v10  ;;  %v13137_v13 = vld [vmem:[#allocation155_spill] sm:$0xff] }
 0x1a8   : > { %8471 = vmatmul.mubr.msk.bf16.gmra.mrb[40].mxu1 %vm2334_vm2, %v3835_v0  ;;  %v13117_v0 = vld [vmem:[#allocation91_spill] sm:$0xff] }
 0x1a9   : > { %8713 = vmatmul.mubr.msk.bf16.gmra.mrb[12].mxu0 %vm2334_vm2, %v6666_v39  ;;  %8474 = vmatprep.mubr.msk.bf16.mxu1 %vm9306_vm3, %v12789_v27  ;;  %v6685_v14 = vcombine.low %v13117_v0, %v13116_v46  ;;  %v11860_v39 = vrot.slane %v7942_v18, %v9405_v10  ;;  %v6716_v18 = vrot.slane %v6702_v35, %v9405_v10  ;;  %v13125_v46 = vld [vmem:[#allocation133_spill] sm:$0xff]  ;;  %v13126_v0 = vld [vmem:[#allocation132_spill] sm:$0xff] }
 0x1aa   : > { %8716 = vmatprep.mubr.msk.bf16.mxu0 %vm9306_vm3, %v12789_v27 }
 0x1ab   : > { %13118 = vst [vmem:[#allocation18_spill] sm:$0xff] %v11860_v39  ;;  %v6699_v21 = vrot.slane %v6685_v14, %v9405_v10  ;;  %v3899_v47 = vrot.slane %v11860_v39, %v9405_v10  ;;  %v6719_v14 = vcombine.low %v13126_v0, %v13125_v46  ;;  %v13138_v46 = vld [vmem:[#allocation136_spill] sm:$0xff] }
 0x1ac   : > { %v6735_v0 = vcombine.low %v13138_v46, %v13137_v13 }
 0x1ad   : > { %v6700_v11 = vcombine.low %v6692_v15, %v6699_v21  ;;  %v13127_v15 = vld [vmem:[#allocation36_spill] sm:$0xff]  ;;  %v13128_v21 = vld [vmem:[#allocation35_spill] sm:$0xff]  ;;  %v6733_v53 = vrot.slane %v6719_v14, %v9405_v10  ;;  %v13139_v14 = vld [vmem:[#allocation157_spill] sm:$0xff] }
 0x1b0   : > { %8475 = vmatmul.mubr.msk.bf16.gmra.mrb[44].mxu1 %vm2334_vm2, %v3884_v31  ;;  %v6709_v31 = vrot.slane %v6701_v3, %v9405_v10  ;;  %v13130_v3 = vcombine.low %v11346_v50, %v11349_v4  ;;  %v11913_v50 = vcombine.high %v11000_v9, %v11000_v9  ;;  %v13131_v4 = vld [vmem:[#allocation176_spill] sm:$0xff] }
 0x1b1   : > { %8717 = vmatmul.mubr.msk.bf16.gmra.mrb[16].mxu0 %vm2334_vm2, %v6683_v6  ;;  %8478 = vmatprep.mubr.msk.bf16.mxu1 %vm9306_vm3, %v12789_v27  ;;  %v11887_v6 = vsel %vm9433_vm1, %v4706_v51, %v4711_v20  ;;  %v11906_v51 = vcombine.high %v10997_v49, %v10997_v49  ;;  %v13132_v20 = vld [vmem:[#allocation184_spill] sm:$0xff] }
 0x1b2   : > { %8720 = vmatprep.mubr.msk.bf16.mxu0 %vm9306_vm3, %v12789_v27  ;;  %v6717_v48 = vcombine.low %v6709_v31, %v6716_v18  ;;  %v13133_v31 = vcombine.low %v13131_v4, %v13132_v20  ;;  %v4735_v4 = vshll.u32 %v11023_v40, 16  ;;  %v4730_v13 = vshrl.u32 %v11913_v50, 16 }
 0x1b3   : > { %v4719_v20 = vshll.u32 %v11906_v51, 16 }
 0x1b4   : > { %v11919_v18 = vrot.slane %v13133_v31, %v9405_v10  ;;  %v4722_v31 = vshrl.u32 %v11906_v51, 16 }
 0x1b6   : > { %13134 = vst [vmem:[#allocation17_spill] sm:$0xff] %v11919_v18 }
 0x1b8   : > { %8479 = vmatmul.mubr.msk.bf16.gmra.mrb[48].mxu1 %vm2334_vm2, %v3899_v47  ;;  %v4212_v47 = vcombine.low %v13128_v21, %v13127_v15  ;;  %v13140_v15 = vld [vmem:[#allocation156_spill] sm:$0xff] }
 0x1b9   : > { %8721 = vmatmul.mubr.msk.bf16.gmra.mrb[20].mxu0 %vm2334_vm2, %v6700_v11  ;;  %8484 = vmatprep.mubr.msk.bf16.mxu1 %vm9306_vm3, %v12789_v27  ;;  %v13129_v11 = vld [vmem:[#allocation186_spill] sm:$0xff]  ;;  %v6736_v21 = vcombine.low %v13140_v15, %v13139_v14 }
 0x1ba   : > { %8724 = vmatprep.mubr.msk.bf16.mxu0 %vm9306_vm3, %v12789_v27  ;;  %v5304_v28 = vcombine.low %v13129_v11, %v11887_v6  ;;  %v4219_v35 = vrot.slane %v4212_v47, %v9405_v10  ;;  %v4237_v47 = vcombine.low %v13026_v37, %v13024_v57  ;;  %v6743_v57 = vrot.slane %v6735_v0, %v9405_v10 }
 0x1bb   : > { %v6750_v37 = vrot.slane %v6736_v21, %v9405_v10 }
 0x1bc   : > { %v11922_v58 = vrot.slane %v5304_v28, %v9405_v10  ;;  %v4221_v28 = vcombine.low %v4219_v35, %v11438_v22  ;;  %v13142_v35 = vcombine.low %v11385_v30, %v11390_v23  ;;  %v11969_v30 = vsel %vm9433_vm1, %v4730_v13, %v4735_v4  ;;  %v13145_v23 = vld [vmem:[#allocation6_spill] sm:$0xff]  ;;  %v13151_v4 = vld [vmem:[#allocation56_spill] sm:$0xff]  ;;  %v13152_v13 = vld [vmem:[#allocation53_spill] sm:$0xff] }
 0x1bd   : > { %13144 = vst [vmem:[#allocation8_spill] sm:$0xff] %v11969_v30  ;;  %v11975_v15 = vcombine.high %v13145_v23, %v13145_v23  ;;  %v6751_v21 = vcombine.low %v6743_v57, %v6750_v37  ;;  %v4738_v57 = vshrl.u32 %v11023_v40, 16  ;;  %v4743_v37 = vshll.u32 %v13145_v23, 16 }
 0x1be   : > { %13135 = vst [vmem:[#allocation16_spill] sm:$0xff] %v11922_v58  ;;  %v11953_v46 = vrot.slane %v13142_v35, %v9405_v10  ;;  %v4235_v14 = vrot.slane %v4221_v28, %v9405_v10  ;;  %v13148_v28 = vld [vmem:[#allocation161_spill] sm:$0xff]  ;;  %v4262_v35 = vcombine.low %v13152_v13, %v13151_v4  ;;  %v6546_v13 = vshll.u32 %v11498_v36, 16 }
 0x1bf   : > { %13146 = vst [vmem:[#allocation7_spill] sm:$0xff] %v11975_v15  ;;  %v13156_v58 = vld [vmem:[#allocation121_spill] sm:$0xff] }
 0x1c0   : > { %8485 = vmatmul.mubr.msk.bf16.vlgmr.msra.gmra.mrb[0].mxu1 %vm2334_vm2, %v13130_v3  ;;  %v4714_v3 = vshrl.u32 %v11000_v9, 16 }
 0x1c1   : > { %8725 = vmatmul.mubr.msk.bf16.gmra.mrb[24].mxu0 %vm2334_vm2, %v6717_v48  ;;  %8488 = vmatprep.mubr.msk.bf16.mxu1 %vm9306_vm3, %v12789_v27  ;;  %v6734_v48 = vcombine.low %v6726_v34, %v6733_v53  ;;  %v4244_v34 = vrot.slane %v4237_v47, %v9405_v10  ;;  %v13141_v53 = vcombine.low %v11396_v16, %v11430_v33 }
 0x1c2   : > { %8728 = vmatprep.mubr.msk.bf16.mxu0 %vm9306_vm3, %v12789_v27  ;;  %8807 = vmatpush3.bf16.msra.mxu1 %v13136_v60  ;;  %v4727_v60 = vshll.u32 %v11913_v50, 16  ;;  %v11961_v0 = vsel %vm9433_vm1, %v4714_v3, %v4719_v20  ;;  %v13149_v20 = vld [vmem:[#allocation179_spill] sm:$0xff] }
 0x1c3   : > { %13143 = vst [vmem:[#allocation9_spill] sm:$0xff] %v11961_v0  ;;  %v4246_v47 = vcombine.low %v4244_v34, %v11501_v25  ;;  %v6769_v11 = vcombine.low %v11887_v6, %v11961_v0  ;;  %v4746_v34 = vshrl.u32 %v13145_v23, 16  ;;  %v13155_v6 = vld [vmem:[#allocation145_spill] sm:$0xff]  ;;  %v4269_v0 = vrot.slane %v4262_v35, %v9405_v10  ;;  %v13160_v35 = vld [vmem:[#allocation182_spill] sm:$0xff] }
 0x1c4   : > { %v11965_v33 = vsel %vm9433_vm1, %v4722_v31, %v4727_v60  ;;  %v13150_v31 = vld [vmem:[#allocation178_spill] sm:$0xff]  ;;  %v13157_v18 = vcombine.low %v13155_v6, %v13156_v58 }
 0x1c5   : > { %v6753_v60 = vcombine.low %v13150_v31, %v13149_v20  ;;  %v6770_v5 = vcombine.low %v11965_v33, %v11969_v30  ;;  %v13154_v31 = vld [vmem:[#allocation141_spill] sm:$0xff]  ;;  %v4260_v43 = vrot.slane %v4246_v47, %v9405_v10  ;;  %v13158_v47 = vld [vmem:[#allocation160_spill] sm:$0xff] }
 0x1c6   : > { %v6541_v4 = vshrl.u32 %v13154_v31, 16  ;;  %v12002_v39 = vrot.slane %v13157_v18, %v9405_v10  ;;  %v12017_v18 = vsel %vm9433_vm1, %v4738_v57, %v4743_v37  ;;  %v13161_v57 = vld [vmem:[#allocation66_spill] sm:$0xff] }
 0x1c7   : > { %v6767_v31 = vrot.slane %v6753_v60, %v9405_v10  ;;  %v13159_v60 = vld [vmem:[#allocation70_spill] sm:$0xff]  ;;  %v4287_v37 = vcombine.low %v13161_v57, %v13020_v24 }
 0x1c8   : > { %8489 = vmatmul.mubr.msk.bf16.gmra.mrb[4].mxu1 %vm2334_vm2, %v13141_v53  ;;  %v4236_v53 = vcombine.low %v11953_v46, %v4235_v14  ;;  %v4759_v14 = vshll.u32 %v11975_v15, 16  ;;  %v6784_v15 = vrot.slane %v6770_v5, %v9405_v10  ;;  %v4261_v5 = vcombine.low %v12002_v39, %v4260_v43 }
 0x1c9   : > { %8729 = vmatmul.mubr.msk.bf16.gmra.mrb[28].mxu0 %vm2334_vm2, %v6734_v48  ;;  %8492 = vmatprep.mubr.msk.bf16.mxu1 %vm9306_vm3, %v12789_v27  ;;  %v13147_v48 = vld [vmem:[#allocation177_spill] sm:$0xff]  ;;  %v6785_v6 = vcombine.low %v13160_v35, %v13159_v60  ;;  %v13162_v43 = vcombine.low %v11441_v59, %v11444_v17  ;;  %v4294_v24 = vrot.slane %v4287_v37, %v9405_v10  ;;  %v6581_v60 = vshrl.u32 %v11536_v8, 16 }
 0x1ca   : > { %8732 = vmatprep.mubr.msk.bf16.mxu0 %vm9306_vm3, %v12789_v27  ;;  %v6752_v3 = vcombine.low %v13148_v28, %v13147_v48  ;;  %v13153_v48 = vld [vmem:[#allocation180_spill] sm:$0xff]  ;;  %v6539_v59 = vcombine.high %v11536_v8, %v11536_v8  ;;  %v6586_v35 = vshll.u32 %v11631_v44, 16 }
 0x1cb   : > { %v4751_v28 = vshll.u32 %v13153_v48, 16  ;;  %v4754_v20 = vshrl.u32 %v13153_v48, 16 }
 0x1cc   : > { %v6760_v30 = vrot.slane %v6752_v3, %v9405_v10  ;;  %v4270_v3 = vcombine.low %v13158_v47, %v4269_v0  ;;  %v12044_v0 = vrot.slane %v13162_v43, %v9405_v10  ;;  %v6594_v57 = vshll.u32 %v6539_v59, 16 }
 0x1cd   : > { %v12021_v58 = vsel %vm9433_vm1, %v4746_v34, %v4751_v28 }
 0x1ce   : > { %v6768_v36 = vcombine.low %v6760_v30, %v6767_v31  ;;  %v6802_v28 = vcombine.low %v12017_v18, %v12021_v58 }
 0x1d0   : > { %8493 = vmatmul.mubr.msk.bf16.gmra.mrb[8].mxu1 %vm2334_vm2, %v4236_v53  ;;  %v6777_v53 = vrot.slane %v6769_v11, %v9405_v10  ;;  %v6548_v11 = vsel %vm9433_vm1, %v6541_v4, %v6546_v13  ;;  %v6793_v4 = vrot.slane %v6785_v6, %v9405_v10  ;;  %v4295_v13 = vcombine.low %v11575_v42, %v4294_v24 }
 0x1d1   : > { %8733 = vmatmul.mubr.msk.bf16.gmra.mrb[32].mxu0 %vm2334_vm2, %v6751_v21  ;;  %8496 = vmatprep.mubr.msk.bf16.mxu1 %vm9306_vm3, %v12789_v27  ;;  %v12025_v21 = vsel %vm9433_vm1, %v4754_v20, %v4759_v14  ;;  %v4278_v14 = vrot.slane %v4270_v3, %v9405_v10  ;;  %v6589_v6 = vshrl.u32 %v11631_v44, 16 }
 0x1d2   : > { %8736 = vmatprep.mubr.msk.bf16.mxu0 %vm9306_vm3, %v12789_v27  ;;  %v6786_v34 = vcombine.low %v6777_v53, %v6784_v15  ;;  %v6803_v20 = vcombine.low %v12025_v21, %v6548_v11  ;;  %v6812_v15 = vrot.slane %v6802_v28, %v9405_v10  ;;  %v13164_v53 = vld [vmem:[#allocation74_spill] sm:$0xff]  ;;  %v4303_v37 = vrot.slane %v4295_v13, %v9405_v10 }
 0x1d3   : > { %v4286_v17 = vcombine.low %v4278_v14, %v12044_v0  ;;  %v13166_v14 = vcombine.low %v11569_v55, %v11578_v61  ;;  %v12100_v13 = vrot.slane %v13169_v2, %v9405_v10  ;;  %v13181_v2 = vld [vmem:[#allocation165_spill] sm:$0xff] }
 0x1d4   : > { %v6800_v30 = vrot.slane %v6786_v34, %v9405_v10  ;;  %v6819_v31 = vrot.slane %v6803_v20, %v9405_v10  ;;  %v13165_v34 = vcombine.low %v11469_v19, %v11472_v1  ;;  %v6588_v19 = vsel %vm9433_vm1, %v6581_v60, %v6586_v35 }
 0x1d5   : > { %v6849_v43 = vrot.slane %v13166_v14, %v9405_v10  ;;  %v6596_v1 = vsel %vm9433_vm1, %v6589_v6, %v6594_v57  ;;  %v13174_v14 = vld [vmem:[#allocation137_spill] sm:$0xff] }
 0x1d6   : > { %v6834_v3 = vcombine.low %v6812_v15, %v6819_v31  ;;  %v12071_v28 = vrot.slane %v13165_v34, %v9405_v10  ;;  %v13167_v15 = vld [vmem:[#allocation97_spill] sm:$0xff]  ;;  %v13168_v31 = vld [vmem:[#allocation99_spill] sm:$0xff]  ;;  %v6851_v59 = vcombine.low %v6588_v19, %v6596_v1 }
 0x1d7   : > { %v4338_v55 = vcombine.low %v13168_v31, %v13167_v15  ;;  %v13175_v1 = vld [vmem:[#allocation113_spill] sm:$0xff]  ;;  %v13178_v31 = vld [vmem:[#allocation95_spill] sm:$0xff] }
 0x1d8   : > { %8497 = vmatmul.mubr.msk.bf16.gmra.mrb[12].mxu1 %vm2334_vm2, %v4261_v5  ;;  %v6801_v5 = vcombine.low %v6793_v4, %v6800_v30  ;;  %v6842_v44 = vrot.slane %v6834_v3, %v9405_v10  ;;  %v4311_v4 = vcombine.low %v4303_v37, %v12071_v28  ;;  %v4337_v30 = vcombine.low %v13065_v54, %v13057_v38  ;;  %v13172_v37 = vld [vmem:[#allocation140_spill] sm:$0xff] }
 0x1d9   : > { %8737 = vmatmul.mubr.msk.bf16.gmra.mrb[36].mxu0 %vm2334_vm2, %v6768_v36  ;;  %8500 = vmatprep.mubr.msk.bf16.mxu1 %vm9306_vm3, %v12789_v27  ;;  %v13163_v36 = vld [vmem:[#allocation77_spill] sm:$0xff]  ;;  %v6858_v38 = vrot.slane %v6851_v59, %v9405_v10 }
 0x1da   : > { %8740 = vmatprep.mubr.msk.bf16.mxu0 %vm9306_vm3, %v12789_v27  ;;  %v4312_v11 = vcombine.low %v13164_v53, %v13163_v36  ;;  %v6850_v61 = vcombine.low %v6842_v44, %v6849_v43  ;;  %v4345_v36 = vrot.slane %v4337_v30, %v9405_v10  ;;  %v4352_v53 = vrot.slane %v4338_v55, %v9405_v10 }
 0x1db   : > { %v6865_v60 = vrot.slane %v6858_v38, %v9405_v10  ;;  %v7080_v43 = vcombine.low %v13174_v14, %v11438_v22  ;;  %v13179_v55 = vcombine.low %v11396_v16, %v13178_v31  ;;  %v13183_v16 = vld [vmem:[#allocation158_spill] sm:$0xff] }
 0x1dc   : > { %v4319_v20 = vrot.slane %v4312_v11, %v9405_v10  ;;  %v4353_v41 = vcombine.low %v4345_v36, %v11691_v56  ;;  %v4354_v11 = vcombine.low %v13170_v63, %v4352_v53  ;;  %v13182_v36 = vld [vmem:[#allocation163_spill] sm:$0xff] }
 0x1dd   : > { %v7087_v22 = vrot.slane %v7080_v43, %v9405_v10  ;;  %v4420_v53 = vcombine.low %v13182_v36, %v13181_v2  ;;  %v13189_v43 = vld [vmem:[#allocation30_spill] sm:$0xff] }
 0x1de   : > { %v4320_v24 = vcombine.low %v4319_v20, %v11654_v52  ;;  %v4361_v35 = vrot.slane %v4353_v41, %v9405_v10  ;;  %v4368_v6 = vrot.slane %v4354_v11, %v9405_v10  ;;  %v13184_v41 = vld [vmem:[#allocation134_spill] sm:$0xff]  ;;  %v13185_v11 = vld [vmem:[#allocation135_spill] sm:$0xff] }
 0x1df   : > { %v7088_v38 = vcombine.low %v11953_v46, %v7087_v22 }
 0x1e0   : > { %8501 = vmatmul.mubr.msk.bf16.gmra.mrb[16].mxu1 %vm2334_vm2, %v4286_v17  ;;  %v4328_v17 = vrot.slane %v4320_v24, %v9405_v10  ;;  %v4369_v20 = vcombine.low %v4361_v35, %v4368_v6  ;;  %v4427_v35 = vrot.slane %v4420_v53, %v9405_v10 }
 0x1e1   : > { %8741 = vmatmul.mubr.msk.bf16.gmra.mrb[40].mxu0 %vm2334_vm2, %v6801_v5  ;;  %8504 = vmatprep.mubr.msk.bf16.mxu1 %vm9306_vm3, %v12789_v27  ;;  %v13171_v5 = vld [vmem:[#allocation117_spill] sm:$0xff] }
 0x1e2   : > { %8744 = vmatprep.mubr.msk.bf16.mxu0 %vm9306_vm3, %v12789_v27  ;;  %v4336_v54 = vcombine.low %v4328_v17, %v12100_v13  ;;  %v4370_v3 = vcombine.low %v13171_v5, %v13059_v62  ;;  %v13173_v62 = vld [vmem:[#allocation142_spill] sm:$0xff]  ;;  %v13186_v5 = vcombine.low %v13184_v41, %v13185_v11  ;;  %v4429_v6 = vcombine.low %v4427_v35, %v11814_v12 }
 0x1e3   : > { %v4395_v34 = vcombine.low %v13173_v62, %v13172_v37  ;;  %v4446_v62 = vcombine.low %v11000_v9, %v11906_v51  ;;  %v13198_v41 = vld [vmem:[#allocation126_spill] sm:$0xff] }
 0x1e4   : > { %v4377_v57 = vrot.slane %v4370_v3, %v9405_v10  ;;  %v12159_v3 = vrot.slane %v13186_v5, %v9405_v10  ;;  %v13199_v5 = vld [vmem:[#allocation129_spill] sm:$0xff] }
 0x1e5   : > { %v4402_v19 = vrot.slane %v4395_v34, %v9405_v10  ;;  %v4447_v34 = vcombine.low %v11913_v50, %v11023_v40  ;;  %v4461_v51 = vrot.slane %v4446_v62, %v9405_v10 }
 0x1e6   : > { %v4379_v44 = vcombine.low %v11734_v7, %v4377_v57  ;;  %v13187_v57 = vld [vmem:[#allocation181_spill] sm:$0xff] }
 0x1e7   : > { %v4445_v37 = vcombine.low %v13187_v57, %v10997_v49  ;;  %v4443_v49 = vrot.slane %v4429_v6, %v9405_v10  ;;  %v4468_v40 = vrot.slane %v4447_v34, %v9405_v10  ;;  %v13201_v6 = vld [vmem:[#allocation162_spill] sm:$0xff] }
 0x1e8   : > { %8505 = vmatmul.mubr.msk.bf16.gmra.mrb[20].mxu1 %vm2334_vm2, %v4311_v4  ;;  %v13176_v4 = vld [vmem:[#allocation115_spill] sm:$0xff]  ;;  %v4393_v15 = vrot.slane %v4379_v44, %v9405_v10  ;;  %v7125_v57 = vcombine.low %v13201_v6, %v11691_v56 }
 0x1e9   : > { %8745 = vmatmul.mubr.msk.bf16.gmra.mrb[44].mxu0 %vm2334_vm2, %v6850_v61  ;;  %8508 = vmatprep.mubr.msk.bf16.mxu1 %vm9306_vm3, %v12789_v27  ;;  %v13177_v24 = vcombine.low %v13175_v1, %v13176_v4  ;;  %v13180_v61 = vld [vmem:[#allocation10_spill] sm:$0xff]  ;;  %v13188_v44 = vld [vmem:[#allocation187_spill] sm:$0xff]  ;;  %v4454_v9 = vrot.slane %v4445_v37, %v9405_v10  ;;  %v13202_v37 = vld [vmem:[#allocation29_spill] sm:$0xff] }
 0x1ea   : > { %8748 = vmatprep.mubr.msk.bf16.mxu0 %vm9306_vm3, %v12789_v27  ;;  %v4404_v59 = vcombine.low %v4402_v19, %v13180_v61  ;;  %v7098_v14 = vcombine.low %v13158_v47, %v13188_v44  ;;  %v13190_v19 = vcombine.low %v13189_v43, %v11705_v29  ;;  %v4470_v47 = vcombine.low %v4461_v51, %v4468_v40  ;;  %v13205_v51 = vld [vmem:[#allocation149_spill] sm:$0xff]  ;;  %v13206_v40 = vld [vmem:[#allocation148_spill] sm:$0xff] }
 0x1eb   : > { %v12136_v30 = vrot.slane %v13177_v24, %v9405_v10  ;;  %v4469_v50 = vcombine.low %v11817_v26, %v4454_v9  ;;  %v13191_v24 = vld [vmem:[#allocation185_spill] sm:$0xff]  ;;  %v7126_v62 = vcombine.low %v13170_v63, %v13202_v37  ;;  %v7133_v56 = vrot.slane %v7125_v57, %v9405_v10  ;;  %v13221_v37 = vld [vmem:[#allocation15_spill] sm:$0xff] }
 0x1ec   : > { %v12185_v1 = vrot.slane %v13190_v19, %v9405_v10  ;;  %v13203_v19 = vld [vmem:[#allocation147_spill] sm:$0xff] }
 0x1ed   : > { %v4394_v17 = vcombine.low %v12136_v30, %v4393_v15  ;;  %v7107_v15 = vcombine.low %v11575_v42, %v13191_v24  ;;  %v4477_v31 = vrot.slane %v4469_v50, %v9405_v10  ;;  %v4486_v42 = vcombine.low %v13145_v23, %v13153_v48  ;;  %v13193_v23 = vld [vmem:[#allocation123_spill] sm:$0xff]  ;;  %v13194_v48 = vld [vmem:[#allocation108_spill] sm:$0xff]  ;;  %v13208_v50 = vld [vmem:[#allocation150_spill] sm:$0xff] }
 0x1ee   : > { %v4444_v29 = vcombine.low %v12185_v1, %v4443_v49  ;;  %v13204_v49 = vld [vmem:[#allocation130_spill] sm:$0xff]  ;;  %v13210_v24 = vld [vmem:[#allocation152_spill] sm:$0xff] }
 0x1ef   : > { %v7114_v22 = vrot.slane %v7107_v15, %v9405_v10  ;;  %v12222_v36 = vrot.slane %v4486_v42, %v9405_v10  ;;  %v5205_v9 = vcombine.low %v13204_v49, %v13203_v19  ;;  %v13222_v19 = vld [vmem:[#allocation9_spill] sm:$0xff] }
 0x1f0   : > { %8509 = vmatmul.mubr.msk.bf16.gmra.mrb[24].mxu1 %vm2334_vm2, %v4336_v54  ;;  %v7089_v54 = vcombine.low %v13183_v16, %v11501_v25  ;;  %v5305_v49 = vcombine.low %v13222_v19, %v11965_v33 }
 0x1f1   : > { %8749 = vmatmul.mubr.msk.bf16.gmra.mrb[48].mxu0 %vm2334_vm2, %v6865_v60  ;;  %8512 = vmatprep.mubr.msk.bf16.mxu1 %vm9306_vm3, %v12789_v27  ;;  %v4418_v60 = vrot.slane %v4404_v59, %v9405_v10  ;;  %v7115_v59 = vcombine.low %v7114_v22, %v12071_v28  ;;  %v5156_v28 = vcombine.low %v13194_v48, %v13193_v23  ;;  %v13211_v22 = vld [vmem:[#allocation32_spill] sm:$0xff] }
 0x1f2   : > { %8754 = vmatprep.mubr.msk.bf16.mxu0 %vm9306_vm3, %v12789_v27  ;;  %v7096_v46 = vrot.slane %v7089_v54, %v9405_v10  ;;  %v13197_v54 = vld [vmem:[#allocation127_spill] sm:$0xff]  ;;  %v13212_v48 = vcombine.low %v11831_v32, %v11834_v45  ;;  %v13216_v32 = vld [vmem:[#allocation170_spill] sm:$0xff] }
 0x1f3   : > { %v4419_v25 = vcombine.low %v12159_v3, %v4418_v60  ;;  %v5158_v11 = vcombine.low %v13198_v41, %v13197_v54  ;;  %v13200_v60 = vld [vmem:[#allocation128_spill] sm:$0xff]  ;;  %v5166_v34 = vrot.slane %v5156_v28, %v9405_v10  ;;  %v13214_v54 = vld [vmem:[#allocation154_spill] sm:$0xff] }
 0x1f4   : > { %v5159_v35 = vcombine.low %v13200_v60, %v13199_v5  ;;  %v13217_v5 = vld [vmem:[#allocation173_spill] sm:$0xff]  ;;  %v13218_v60 = vld [vmem:[#allocation172_spill] sm:$0xff] }
 0x1f5   : > { %v5180_v44 = vrot.slane %v5158_v11, %v9405_v10  ;;  %v13215_v11 = vld [vmem:[#allocation171_spill] sm:$0xff] }
 0x1f6   : > { %v5255_v45 = vcombine.low %v13216_v32, %v13215_v11 }
 0x1f8   : > { %8513 = vmatmul.mubr.msk.bf16.gmra.mrb[28].mxu1 %vm2334_vm2, %v4369_v20  ;;  %v7097_v20 = vcombine.low %v12002_v39, %v7096_v46  ;;  %v7105_v39 = vrot.slane %v7098_v14, %v9405_v10  ;;  %v4500_v46 = vrot.slane %v12222_v36, %v9405_v10  ;;  %v5187_v14 = vrot.slane %v5159_v35, %v9405_v10 }
 0x1f9   : > { %8755 = vmatmul.mubr.msk.bf16.vlgmr.msra.gmra.mrb[0].mxu0 %vm2334_vm2, %v13179_v55  ;;  %8516 = vmatprep.mubr.msk.bf16.mxu1 %vm9306_vm3, %v12789_v27  ;;  %v12206_v55 = vrot.slane %v4470_v47, %v9405_v10  ;;  %v5256_v35 = vcombine.low %v13218_v60, %v13217_v5 }
 0x1fa   : > { %8758 = vmatprep.mubr.msk.bf16.mxu0 %vm9306_vm3, %v12789_v27  ;;  %v7106_v4 = vcombine.low %v7105_v39, %v12044_v0  ;;  %v5189_v43 = vcombine.low %v5180_v44, %v5187_v14  ;;  %v5206_v39 = vcombine.low %v13206_v40, %v13205_v51  ;;  %v5271_v14 = vrot.slane %v5255_v45, %v9405_v10 }
 0x1fb   : > { %v4485_v0 = vcombine.low %v4477_v31, %v12206_v55 }
 0x200   : > { %8517 = vmatmul.mubr.msk.bf16.gmra.mrb[32].mxu1 %vm2334_vm2, %v4394_v17  ;;  %v13192_v17 = vld [vmem:[#allocation119_spill] sm:$0xff] }
 0x201   : > { %8759 = vmatmul.mubr.msk.bf16.gmra.mrb[4].mxu0 %vm2334_vm2, %v7088_v38  ;;  %8520 = vmatprep.mubr.msk.bf16.mxu1 %vm9306_vm3, %v12789_v27  ;;  %v7116_v2 = vcombine.low %v13192_v17, %v11654_v52  ;;  %v13195_v38 = vld [vmem:[#allocation125_spill] sm:$0xff]  ;;  %v13196_v52 = vld [vmem:[#allocation124_spill] sm:$0xff]  ;;  %v5215_v17 = vrot.slane %v5205_v9, %v9405_v10 }
 0x202   : > { %8762 = vmatprep.mubr.msk.bf16.mxu0 %vm9306_vm3, %v12789_v27  ;;  %v5157_v16 = vcombine.low %v13196_v52, %v13195_v38  ;;  %v13223_v9 = vld [vmem:[#allocation8_spill] sm:$0xff] }
 0x203   : > { %v7123_v53 = vrot.slane %v7116_v2, %v9405_v10  ;;  %v5222_v2 = vrot.slane %v5206_v39, %v9405_v10  ;;  %v5306_v51 = vcombine.low %v13223_v9, %v12017_v18  ;;  %v13224_v39 = vld [vmem:[#allocation19_spill] sm:$0xff] }
 0x205   : > { %v5237_v38 = vcombine.low %v5215_v17, %v5222_v2  ;;  %v13229_v2 = vld [vmem:[#allocation183_spill] sm:$0xff] }
 0x208   : > { %8521 = vmatmul.mubr.msk.bf16.gmra.mrb[36].mxu1 %vm2334_vm2, %v4419_v25  ;;  %v7124_v25 = vcombine.low %v7123_v53, %v12100_v13  ;;  %v7140_v13 = vrot.slane %v7126_v62, %v9405_v10  ;;  %v7151_v62 = vcombine.low %v13221_v37, %v13180_v61 }
 0x209   : > { %8763 = vmatmul.mubr.msk.bf16.gmra.mrb[8].mxu0 %vm2334_vm2, %v7097_v20  ;;  %8524 = vmatprep.mubr.msk.bf16.mxu1 %vm9306_vm3, %v12789_v27  ;;  %v5173_v20 = vrot.slane %v5157_v16, %v9405_v10  ;;  %v13213_v16 = vld [vmem:[#allocation169_spill] sm:$0xff] }
 0x20a   : > { %8766 = vmatprep.mubr.msk.bf16.mxu0 %vm9306_vm3, %v12789_v27  ;;  %v7141_v31 = vcombine.low %v7133_v56, %v7140_v13  ;;  %v5254_v41 = vcombine.low %v13214_v54, %v13213_v16  ;;  %v5278_v56 = vrot.slane %v5256_v35, %v9405_v10 }
 0x20b   : > { %v5188_v63 = vcombine.low %v5166_v34, %v5173_v20  ;;  %v5245_v34 = vrot.slane %v5237_v38, %v9405_v10 }
 0x20c   : > { %v5264_v44 = vrot.slane %v5254_v41, %v9405_v10  ;;  %v5352_v41 = vcombine.low %v12021_v58, %v12025_v21 }
 0x20d   : > { %v5196_v42 = vrot.slane %v5188_v63, %v9405_v10 }
 0x20e   : > { %v5286_v63 = vcombine.low %v5264_v44, %v5271_v14  ;;  %v5359_v5 = vrot.slane %v5352_v41, %v9405_v10 }
 0x210   : > { %8525 = vmatmul.mubr.msk.bf16.gmra.mrb[40].mxu1 %vm2334_vm2, %v4444_v29  ;;  %v13207_v29 = vld [vmem:[#allocation151_spill] sm:$0xff]  ;;  %v5366_v58 = vrot.slane %v5359_v5, %v9405_v10 }
 0x211   : > { %8767 = vmatmul.mubr.msk.bf16.gmra.mrb[12].mxu0 %vm2334_vm2, %v7106_v4  ;;  %8528 = vmatprep.mubr.msk.bf16.mxu1 %vm9306_vm3, %v12789_v27  ;;  %v5207_v47 = vcombine.low %v13208_v50, %v13207_v29  ;;  %v13209_v4 = vld [vmem:[#allocation153_spill] sm:$0xff]  ;;  %v7160_v29 = vcombine.low %v13224_v39, %v11814_v12  ;;  %v5294_v50 = vrot.slane %v5286_v63, %v9405_v10 }
 0x212   : > { %8770 = vmatprep.mubr.msk.bf16.mxu0 %vm9306_vm3, %v12789_v27  ;;  %v5208_v15 = vcombine.low %v13210_v24, %v13209_v4  ;;  %v5327_v4 = vrot.slane %v5305_v49, %v9405_v10  ;;  %v5334_v24 = vrot.slane %v5306_v51, %v9405_v10 }
 0x213   : > { %v5229_v53 = vrot.slane %v5207_v47, %v9405_v10  ;;  %v7167_v33 = vrot.slane %v7160_v29, %v9405_v10 }
 0x214   : > { %v5236_v23 = vrot.slane %v5208_v15, %v9405_v10  ;;  %v5336_v18 = vcombine.low %v5327_v4, %v5334_v24 }
 0x216   : > { %v5238_v52 = vcombine.low %v5229_v53, %v5236_v23  ;;  %v7180_v53 = vcombine.low %v13229_v2, %v11536_v8  ;;  %v13230_v23 = vld [vmem:[#allocation17_spill] sm:$0xff] }
 0x218   : > { %8529 = vmatmul.mubr.msk.bf16.gmra.mrb[44].mxu1 %vm2334_vm2, %v4485_v0  ;;  %v7142_v0 = vcombine.low %v11734_v7, %v13211_v22  ;;  %v5252_v20 = vrot.slane %v5238_v52, %v9405_v10  ;;  %v13226_v22 = vld [vmem:[#allocation159_spill] sm:$0xff]  ;;  %v7201_v16 = vrot.slane %v7180_v53, %v9405_v10 }
 0x219   : > { %8771 = vmatmul.mubr.msk.bf16.gmra.mrb[16].mxu0 %vm2334_vm2, %v7115_v59  ;;  %8532 = vmatprep.mubr.msk.bf16.mxu1 %vm9306_vm3, %v12789_v27  ;;  %v5203_v59 = vrot.slane %v5189_v43, %v9405_v10 }
 0x21a   : > { %8774 = vmatprep.mubr.msk.bf16.mxu0 %vm9306_vm3, %v12789_v27  ;;  %v7149_v7 = vrot.slane %v7142_v0, %v9405_v10  ;;  %v5253_v61 = vcombine.low %v5245_v34, %v5252_v20  ;;  %v13227_v0 = vld [vmem:[#allocation7_spill] sm:$0xff] }
 0x21b   : > { %v5204_v28 = vcombine.low %v5196_v42, %v5203_v59  ;;  %v7178_v42 = vcombine.low %v13227_v0, %v13226_v22  ;;  %v13228_v59 = vld [vmem:[#allocation141_spill] sm:$0xff] }
 0x21c   : > { %v7150_v57 = vcombine.low %v12136_v30, %v7149_v7  ;;  %v7158_v30 = vrot.slane %v7151_v62, %v9405_v10  ;;  %v8053_v17 = vcombine.high %v13228_v59, %v13226_v22 }
 0x21d   : > { %v7187_v38 = vrot.slane %v7178_v42, %v9405_v10 }
 0x21e   : > { %v7159_v40 = vcombine.low %v12159_v3, %v7158_v30  ;;  %v13225_v3 = vld [vmem:[#allocation18_spill] sm:$0xff]  ;;  %v7194_v52 = vrot.slane %v8053_v17, %v9405_v10 }
 0x21f   : > { %v7169_v15 = vcombine.low %v11817_v26, %v13225_v3  ;;  %v5350_v26 = vrot.slane %v5336_v18, %v9405_v10  ;;  %v7202_v32 = vcombine.low %v12222_v36, %v7187_v38 }
 0x220   : > { %8533 = vmatmul.mubr.msk.bf16.gmra.mrb[48].mxu1 %vm2334_vm2, %v4500_v46  ;;  %v13219_v46 = vld [vmem:[#allocation175_spill] sm:$0xff]  ;;  %v7203_v45 = vcombine.low %v7194_v52, %v7201_v16 }
 0x221   : > { %8775 = vmatmul.mubr.msk.bf16.gmra.mrb[20].mxu0 %vm2334_vm2, %v7124_v25  ;;  %8566 = vmatprep.mubr.msk.bf16.mxu1 %vm9306_vm3, %v12789_v27  ;;  %v13220_v25 = vld [vmem:[#allocation174_spill] sm:$0xff]  ;;  %v7210_v60 = vrot.slane %v7202_v32, %v9405_v10 }
 0x222   : > { %8778 = vmatprep.mubr.msk.bf16.mxu0 %vm9306_vm3, %v12789_v27  ;;  %v5257_v6 = vcombine.low %v13220_v25, %v13219_v46  ;;  %v7217_v35 = vrot.slane %v7203_v45, %v9405_v10 }
 0x224   : > { %v5285_v13 = vrot.slane %v5257_v6, %v9405_v10  ;;  %v7218_v21 = vcombine.low %v7210_v60, %v7217_v35 }
 0x226   : > { %v5287_v43 = vcombine.low %v5278_v56, %v5285_v13 }
 0x228   : > { %8567 = vmatmul.mubr.msk.bf16.vlgmr.msra.gmra.mrb[28].mxu1 %vm2334_vm2, %v13212_v48  ;;  %v5301_v47 = vrot.slane %v5287_v43, %v9405_v10  ;;  %v13231_v48 = vld [vmem:[#allocation16_spill] sm:$0xff] }
 0x229   : > { %8779 = vmatmul.mubr.msk.bf16.gmra.mrb[24].mxu0 %vm2334_vm2, %v7141_v31  ;;  %8570 = vmatprep.mubr.msk.bf16.mxu1 %vm9306_vm3, %v12789_v27  ;;  %v7168_v31 = vcombine.low %v12185_v1, %v7167_v33  ;;  %v13232_v7 = vcombine.low %v13230_v23, %v13231_v48  ;;  %v7176_v1 = vrot.slane %v7169_v15, %v9405_v10 }
 0x22a   : > { %8782 = vmatprep.mubr.msk.bf16.mxu0 %vm9306_vm3, %v12789_v27  ;;  %v5302_v12 = vcombine.low %v5294_v50, %v5301_v47 }
 0x22b   : > { %v7177_v11 = vcombine.low %v7176_v1, %v12206_v55  ;;  %v8054_v55 = vcombine.high %v13229_v2, %v11536_v8 }
 0x22d   : > { %v7226_v36 = vrot.slane %v8054_v55, %v9405_v10 }
 0x22f   : > { %v7233_v46 = vrot.slane %v7226_v36, %v9405_v10 }
 0x230   : > { %8571 = vmatmul.mubr.msk.bf16.gmra.mrb[32].mxu1 %vm2334_vm2, %v5204_v28  ;;  %v5343_v28 = vrot.slane %v13232_v7, %v9405_v10 }
 0x231   : > { %8783 = vmatmul.mubr.msk.bf16.gmra.mrb[28].mxu0 %vm2334_vm2, %v7150_v57  ;;  %8574 = vmatprep.mubr.msk.bf16.mxu1 %vm9306_vm3, %v12789_v27 }
 0x232   : > { %8786 = vmatprep.mubr.msk.bf16.mxu0 %vm9306_vm3, %v12789_v27  ;;  %v5351_v54 = vcombine.low %v5343_v28, %v5350_v26 }
 0x238   : > { %8575 = vmatmul.mubr.msk.bf16.gmra.mrb[36].mxu1 %vm2334_vm2, %v5253_v61 }
 0x239   : > { %8787 = vmatmul.mubr.msk.bf16.gmra.mrb[32].mxu0 %vm2334_vm2, %v7159_v40  ;;  %8578 = vmatprep.mubr.msk.bf16.mxu1 %vm9306_vm3, %v12789_v27 }
 0x23a   : > { %8790 = vmatprep.mubr.msk.bf16.mxu0 %vm9306_vm3, %v12789_v27 }
 0x240   : > { %8579 = vmatmul.mubr.msk.bf16.gmra.mrb[40].mxu1 %vm2334_vm2, %v5302_v12 }
 0x241   : > { %8791 = vmatmul.mubr.msk.bf16.gmra.mrb[36].mxu0 %vm2334_vm2, %v7168_v31  ;;  %8582 = vmatprep.mubr.msk.bf16.mxu1 %vm9306_vm3, %v12789_v27 }
 0x242   : > { %8794 = vmatprep.mubr.msk.bf16.mxu0 %vm9306_vm3, %v12789_v27 }
 0x248   : > { %8583 = vmatmul.mubr.msk.bf16.gmra.mrb[44].mxu1 %vm2334_vm2, %v5351_v54 }
 0x249   : > { %8795 = vmatmul.mubr.msk.bf16.gmra.mrb[40].mxu0 %vm2334_vm2, %v7177_v11  ;;  %8586 = vmatprep.mubr.msk.bf16.mxu1 %vm9306_vm3, %v12789_v27 }
 0x24a   : > { %8798 = vmatprep.mubr.msk.bf16.mxu0 %vm9306_vm3, %v12789_v27 }
 0x250   : > { %8587 = vmatmul.mubr.msk.bf16.gmra.mrb[48].mxu1 %vm2334_vm2, %v5366_v58 }
 0x251   : > { %8799 = vmatmul.mubr.msk.bf16.gmra.mrb[44].mxu0 %vm2334_vm2, %v7218_v21 }
 0x252   : > { %8802 = vmatprep.mubr.msk.bf16.mxu0 %vm9306_vm3, %v12789_v27  ;;  %vm7651_vm3 = vcmask 1040384  }
 0x259   : > { %8803 = vmatmul.mubr.msk.bf16.gmra.mrb[48].mxu0 %vm2334_vm2, %v7233_v46 }
 0x293   : > { %v4577_v25 = vpop.f32.mrb[0].mxu1 }
 0x294   : > { %v8486_v6 = vpop.f32.mrb[1].mxu1 }
 0x295   : > { %v4580_v57 = vpop.f32.mrb[2].mxu1 }
 0x296   : > { %v8487_v37 = vpop.f32.mrb[3].mxu1 }
 0x29b   : > { %v4585_v62 = vpop.f32.mrb[4].mxu1 }
 0x29c   : > { %v8490_v34 = vpop.f32.mrb[5].mxu1 }
 0x29d   : > { %v4588_v8 = vpop.f32.mrb[6].mxu1 }
 0x29e   : > { %v8491_v20 = vpop.f32.mrb[7].mxu1 }
 0x2a3   : > { %v4593_v44 = vpop.f32.mrb[8].mxu1 }
 0x2a4   : > { %v8494_v14 = vpop.f32.mrb[9].mxu1 }
 0x2a5   : > { %v4596_v56 = vpop.f32.mrb[10].mxu1 }
 0x2a6   : > { %v8495_v13 = vpop.f32.mrb[11].mxu1 }
 0x2ab   : > { %v4601_v30 = vpop.f32.mrb[12].mxu1 }
 0x2ac   : > { %v8498_v61 = vpop.f32.mrb[13].mxu1 }
 0x2ad   : > { %v4604_v27 = vpop.f32.mrb[14].mxu1 }
 0x2ae   : > { %v8499_v63 = vpop.f32.mrb[15].mxu1 }
 0x2b3   : > { %v12372_v10 = vpop.f32.mrb[16].mxu1 }
 0x2b4   : > { %v8502_v43 = vpop.f32.mrb[17].mxu1 }
 0x2b5   : > { %v12374_v19 = vpop.f32.mrb[18].mxu1 }
 0x2b6   : > { %v8503_v49 = vpop.f32.mrb[19].mxu1 }
 0x2bb   : > { %v12376_v9 = vpop.f32.mrb[20].mxu1 }
 0x2bc   : > { %v8506_v51 = vpop.f32.mrb[21].mxu1 }
 0x2bd   : > { %v12378_v40 = vpop.f32.mrb[22].mxu1 }
 0x2be   : > { %v8507_v39 = vpop.f32.mrb[23].mxu1 }
 0x2c3   : > { %v12380_v29 = vpop.f32.mrb[24].mxu1 }
 0x2c4   : > { %v8510_v50 = vpop.f32.mrb[25].mxu1 }
 0x2c5   : > { %v12382_v47 = vpop.f32.mrb[26].mxu1 }
 0x2c6   : > { %v8511_v4 = vpop.f32.mrb[27].mxu1 }
 0x2cc   : > { %v7310_v24 = vpop.f32.mrb[0].mxu0 }
 0x2cd   : > { %v8808_v33 = vadd.f32 %v7310_v24, %v4577_v25  ;;  %v8756_v12 = vpop.f32.mrb[1].mxu0 }
 0x2ce   : > { %v7313_v18 = vpop.f32.mrb[2].mxu0 }
 0x2cf   : > { %v8809_v3 = vadd.f32 %v7313_v18, %v4580_v57  ;;  %v8757_v15 = vpop.f32.mrb[3].mxu0  ;;  %v7595_v31 = vmul.f32 %v8808_v33, %v8808_v33 }
 0x2d1   : > { %v8126_v22 = vpack.c.bf16 %v8809_v3, %v8808_v33  ;;  %v7563_v0 = vadd.f32 %v8809_v3, %v8808_v33  ;;  %v7596_v42 = vmul.f32 %v8809_v3, %v8809_v3 }
 0x2d3   : > { %8127 = vst [vmem:[%s12388_s6] sm:$0xff] %v8126_v22   ;;  %v7620_v59 = vadd.f32 %v7596_v42, %v7595_v31 }
 0x2d4   : > { %v7318_v17 = vpop.f32.mrb[4].mxu0 }
 0x2d5   : > { %v8810_v2 = vadd.f32 %v7318_v17, %v4585_v62  ;;  %v8760_v53 = vpop.f32.mrb[5].mxu0 }
 0x2d6   : > { %v7321_v23 = vpop.f32.mrb[6].mxu0 }
 0x2d7   : > { %v7564_v48 = vadd.f32 %v8810_v2, %v7563_v0  ;;  %v7597_v7 = vmul.f32 %v8810_v2, %v8810_v2  ;;  %v8811_v28 = vadd.f32 %v7321_v23, %v4588_v8  ;;  %v8761_v26 = vpop.f32.mrb[7].mxu0 }
 0x2d9   : > { %v7621_v1 = vadd.f32 %v7620_v59, %v7597_v7  ;;  %v8131_v38 = vpack.c.bf16 %v8811_v28, %v8810_v2  ;;  %v7565_v52 = vadd.f32 %v8811_v28, %v7564_v48  ;;  %v7598_v16 = vmul.f32 %v8811_v28, %v8811_v28 }
 0x2db   : > { %8183 = vst [vmem:[%s12388_s6 + $0x8] sm:$0xff] %v8131_v38   ;;  %v7622_v54 = vadd.f32 %v7621_v1, %v7598_v16 }
 0x2dc   : > { %v7326_v41 = vpop.f32.mrb[8].mxu0 }
 0x2dd   : > { %v8812_v11 = vadd.f32 %v7326_v41, %v4593_v44  ;;  %v8764_v32 = vpop.f32.mrb[9].mxu0 }
 0x2de   : > { %v7329_v45 = vpop.f32.mrb[10].mxu0 }
 0x2df   : > { %v7566_v5 = vadd.f32 %v8812_v11, %v7565_v52  ;;  %v7599_v60 = vmul.f32 %v8812_v11, %v8812_v11  ;;  %v8813_v35 = vadd.f32 %v7329_v45, %v4596_v56  ;;  %v8765_v58 = vpop.f32.mrb[11].mxu0 }
 0x2e1   : > { %v7623_v21 = vadd.f32 %v7622_v54, %v7599_v60  ;;  %v8136_v55 = vpack.c.bf16 %v8813_v35, %v8812_v11  ;;  %v7567_v36 = vadd.f32 %v8813_v35, %v7566_v5  ;;  %v7600_v46 = vmul.f32 %v8813_v35, %v8813_v35 }
 0x2e3   : > { %8184 = vst [vmem:[%s12388_s6 + $0x10] sm:$0xff] %v8136_v55   ;;  %v7624_v25 = vadd.f32 %v7623_v21, %v7600_v46 }
 0x2e4   : > { %v7334_v6 = vpop.f32.mrb[12].mxu0 }
 0x2e5   : > { %v8814_v57 = vadd.f32 %v7334_v6, %v4601_v30  ;;  %v8768_v37 = vpop.f32.mrb[13].mxu0 }
 0x2e6   : > { %v7337_v62 = vpop.f32.mrb[14].mxu0 }
 0x2e7   : > { %v7568_v34 = vadd.f32 %v8814_v57, %v7567_v36  ;;  %v7601_v8 = vmul.f32 %v8814_v57, %v8814_v57  ;;  %v8815_v20 = vadd.f32 %v7337_v62, %v4604_v27  ;;  %v8769_v44 = vpop.f32.mrb[15].mxu0 }
 0x2e9   : > { %v7625_v14 = vadd.f32 %v7624_v25, %v7601_v8  ;;  %v8141_v13 = vpack.c.bf16 %v8815_v20, %v8814_v57  ;;  %v7569_v61 = vadd.f32 %v8815_v20, %v7568_v34  ;;  %v7602_v56 = vmul.f32 %v8815_v20, %v8815_v20 }
 0x2eb   : > { %8185 = vst [vmem:[%s12388_s6 + $0x18] sm:$0xff] %v8141_v13   ;;  %v7626_v63 = vadd.f32 %v7625_v14, %v7602_v56 }
 0x2ec   : > { %v7342_v43 = vpop.f32.mrb[16].mxu0 }
 0x2ed   : > { %v8816_v49 = vadd.f32 %v7342_v43, %v12372_v10  ;;  %v8772_v51 = vpop.f32.mrb[17].mxu0 }
 0x2ee   : > { %v7345_v39 = vpop.f32.mrb[18].mxu0 }
 0x2ef   : > { %v7570_v50 = vadd.f32 %v8816_v49, %v7569_v61  ;;  %v7603_v30 = vmul.f32 %v8816_v49, %v8816_v49  ;;  %v8817_v4 = vadd.f32 %v7345_v39, %v12374_v19  ;;  %v8773_v24 = vpop.f32.mrb[19].mxu0 }
 0x2f1   : > { %v7627_v33 = vadd.f32 %v7626_v63, %v7603_v30  ;;  %v8146_v27 = vpack.c.bf16 %v8817_v4, %v8816_v49  ;;  %v7571_v12 = vadd.f32 %v8817_v4, %v7570_v50  ;;  %v7604_v18 = vmul.f32 %v8817_v4, %v8817_v4 }
 0x2f3   : > { %8186 = vst [vmem:[%s12388_s6 + $0x20] sm:$0xff] %v8146_v27   ;;  %v7628_v3 = vadd.f32 %v7627_v33, %v7604_v18 }
 0x2f4   : > { %v7350_v15 = vpop.f32.mrb[20].mxu0 }
 0x2f5   : > { %v8818_v31 = vadd.f32 %v7350_v15, %v12376_v9  ;;  %v8776_v22 = vpop.f32.mrb[21].mxu0 }
 0x2f6   : > { %v7353_v0 = vpop.f32.mrb[22].mxu0 }
 0x2f7   : > { %v7572_v10 = vadd.f32 %v8818_v31, %v7571_v12  ;;  %v7605_v42 = vmul.f32 %v8818_v31, %v8818_v31  ;;  %v8819_v59 = vadd.f32 %v7353_v0, %v12378_v40  ;;  %v8777_v17 = vpop.f32.mrb[23].mxu0 }
 0x2f9   : > { %v7629_v2 = vadd.f32 %v7628_v3, %v7605_v42  ;;  %v8151_v19 = vpack.c.bf16 %v8819_v59, %v8818_v31  ;;  %v7573_v53 = vadd.f32 %v8819_v59, %v7572_v10  ;;  %v7606_v23 = vmul.f32 %v8819_v59, %v8819_v59 }
 0x2fb   : > { %8187 = vst [vmem:[%s12388_s6 + $0x28] sm:$0xff] %v8151_v19   ;;  %v7630_v48 = vadd.f32 %v7629_v2, %v7606_v23  ;;  %v5499_v7 = vpop.f32.mrb[28].mxu1 }
 0x2fc   : > { %v7358_v28 = vpop.f32.mrb[24].mxu0  ;;  %v8568_v26 = vpop.f32.mrb[29].mxu1 }
 0x2fd   : > { %v8820_v1 = vadd.f32 %v7358_v28, %v12380_v29  ;;  %v8780_v9 = vpop.f32.mrb[25].mxu0  ;;  %v5502_v38 = vpop.f32.mrb[30].mxu1 }
 0x2fe   : > { %v7361_v52 = vpop.f32.mrb[26].mxu0  ;;  %v8569_v16 = vpop.f32.mrb[31].mxu1 }
 0x2ff   : > { %v7574_v54 = vadd.f32 %v8820_v1, %v7573_v53  ;;  %v7607_v41 = vmul.f32 %v8820_v1, %v8820_v1  ;;  %v8821_v40 = vadd.f32 %v7361_v52, %v12382_v47  ;;  %v8781_v11 = vpop.f32.mrb[27].mxu0 }
 0x301   : > { %v7631_v32 = vadd.f32 %v7630_v48, %v7607_v41  ;;  %v8156_v45 = vpack.c.bf16 %v8821_v40, %v8820_v1  ;;  %v7575_v5 = vadd.f32 %v8821_v40, %v7574_v54  ;;  %v7608_v60 = vmul.f32 %v8821_v40, %v8821_v40 }
 0x303   : > { %8188 = vst [vmem:[%s12388_s6 + $0x30] sm:$0xff] %v8156_v45   ;;  %v7632_v35 = vadd.f32 %v7631_v32, %v7608_v60  ;;  %v5507_v58 = vpop.f32.mrb[32].mxu1 }
 0x304   : > { %v7366_v21 = vpop.f32.mrb[28].mxu0  ;;  %v8572_v55 = vpop.f32.mrb[33].mxu1 }
 0x305   : > { %v8822_v29 = vadd.f32 %v7366_v21, %v5499_v7  ;;  %v8784_v36 = vpop.f32.mrb[29].mxu0  ;;  %v5510_v46 = vpop.f32.mrb[34].mxu1 }
 0x306   : > { %v7369_v25 = vpop.f32.mrb[30].mxu0  ;;  %v8573_v6 = vpop.f32.mrb[35].mxu1 }
 0x307   : > { %v7576_v57 = vadd.f32 %v8822_v29, %v7575_v5  ;;  %v7609_v37 = vmul.f32 %v8822_v29, %v8822_v29  ;;  %v8823_v62 = vadd.f32 %v7369_v25, %v5502_v38  ;;  %v8785_v47 = vpop.f32.mrb[31].mxu0 }
 0x309   : > { %v7633_v34 = vadd.f32 %v7632_v35, %v7609_v37  ;;  %v8161_v8 = vpack.c.bf16 %v8823_v62, %v8822_v29  ;;  %v7577_v20 = vadd.f32 %v8823_v62, %v7576_v57  ;;  %v7610_v44 = vmul.f32 %v8823_v62, %v8823_v62 }
 0x30b   : > { %8189 = vst [vmem:[%s12388_s6 + $0x38] sm:$0xff] %v8161_v8   ;;  %v7634_v14 = vadd.f32 %v7633_v34, %v7610_v44  ;;  %v5515_v13 = vpop.f32.mrb[36].mxu1 }
 0x30c   : > { %v7374_v61 = vpop.f32.mrb[32].mxu0  ;;  %v8576_v56 = vpop.f32.mrb[37].mxu1 }
 0x30d   : > { %v8824_v63 = vadd.f32 %v7374_v61, %v5507_v58  ;;  %v8788_v43 = vpop.f32.mrb[33].mxu0  ;;  %v5518_v49 = vpop.f32.mrb[38].mxu1 }
 0x30e   : > { %v7377_v51 = vpop.f32.mrb[34].mxu0  ;;  %v8577_v39 = vpop.f32.mrb[39].mxu1 }
 0x30f   : > { %v7578_v50 = vadd.f32 %v8824_v63, %v7577_v20  ;;  %v7611_v30 = vmul.f32 %v8824_v63, %v8824_v63  ;;  %v8825_v4 = vadd.f32 %v7377_v51, %v5510_v46  ;;  %v8789_v24 = vpop.f32.mrb[35].mxu0 }
 0x311   : > { %v7635_v33 = vadd.f32 %v7634_v14, %v7611_v30  ;;  %v8166_v27 = vpack.c.bf16 %v8825_v4, %v8824_v63  ;;  %v7579_v12 = vadd.f32 %v8825_v4, %v7578_v50  ;;  %v7612_v18 = vmul.f32 %v8825_v4, %v8825_v4 }
 0x313   : > { %8190 = vst [vmem:[%s12388_s6 + $0x40] sm:$0xff] %v8166_v27   ;;  %v7636_v3 = vadd.f32 %v7635_v33, %v7612_v18  ;;  %v5523_v15 = vpop.f32.mrb[40].mxu1 }
 0x314   : > { %v7382_v31 = vpop.f32.mrb[36].mxu0  ;;  %v8580_v22 = vpop.f32.mrb[41].mxu1 }
 0x315   : > { %v8826_v0 = vadd.f32 %v7382_v31, %v5515_v13  ;;  %v8792_v10 = vpop.f32.mrb[37].mxu0  ;;  %v5526_v42 = vpop.f32.mrb[42].mxu1 }
 0x316   : > { %v7385_v59 = vpop.f32.mrb[38].mxu0  ;;  %v8581_v17 = vpop.f32.mrb[43].mxu1 }
 0x317   : > { %v7580_v2 = vadd.f32 %v8826_v0, %v7579_v12  ;;  %v7613_v19 = vmul.f32 %v8826_v0, %v8826_v0  ;;  %v8827_v53 = vadd.f32 %v7385_v59, %v5518_v49  ;;  %v8793_v23 = vpop.f32.mrb[39].mxu0 }
 0x319   : > { %v7637_v48 = vadd.f32 %v7636_v3, %v7613_v19  ;;  %v8171_v7 = vpack.c.bf16 %v8827_v53, %v8826_v0  ;;  %v7581_v28 = vadd.f32 %v8827_v53, %v7580_v2  ;;  %v7614_v26 = vmul.f32 %v8827_v53, %v8827_v53 }
 0x31b   : > { %8191 = vst [vmem:[%s12388_s6 + $0x48] sm:$0xff] %v8171_v7   ;;  %v7638_v1 = vadd.f32 %v7637_v48, %v7614_v26  ;;  %v5531_v9 = vpop.f32.mrb[44].mxu1 }
 0x31c   : > { %v7390_v38 = vpop.f32.mrb[40].mxu0  ;;  %v8584_v52 = vpop.f32.mrb[45].mxu1 }
 0x31d   : > { %v8828_v16 = vadd.f32 %v7390_v38, %v5523_v15  ;;  %v8796_v54 = vpop.f32.mrb[41].mxu0  ;;  %v5534_v41 = vpop.f32.mrb[46].mxu1 }
 0x31e   : > { %v7393_v40 = vpop.f32.mrb[42].mxu0  ;;  %v8585_v11 = vpop.f32.mrb[47].mxu1 }
 0x31f   : > { %v7582_v32 = vadd.f32 %v8828_v16, %v7581_v28  ;;  %v7615_v45 = vmul.f32 %v8828_v16, %v8828_v16  ;;  %v8829_v5 = vadd.f32 %v7393_v40, %v5526_v42  ;;  %v8797_v60 = vpop.f32.mrb[43].mxu0 }
 0x321   : > { %v7639_v35 = vadd.f32 %v7638_v1, %v7615_v45  ;;  %v8176_v58 = vpack.c.bf16 %v8829_v5, %v8828_v16  ;;  %v7583_v21 = vadd.f32 %v8829_v5, %v7582_v32  ;;  %v7616_v55 = vmul.f32 %v8829_v5, %v8829_v5 }
 0x323   : > { %8192 = vst [vmem:[%s12388_s6 + $0x50] sm:$0xff] %v8176_v58   ;;  %v7640_v29 = vadd.f32 %v7639_v35, %v7616_v55  ;;  %v5539_v36 = vpop.f32.mrb[48].mxu1 }
 0x324   : > { %v7398_v46 = vpop.f32.mrb[44].mxu0  ;;  %v8588_v25 = vpop.f32.mrb[49].mxu1 }
 0x325   : > { %v8830_v6 = vadd.f32 %v7398_v46, %v5531_v9  ;;  %v8800_v57 = vpop.f32.mrb[45].mxu0  ;;  %v5542_v37 = vpop.f32.mrb[50].mxu1 }
 0x326   : > { %v7401_v62 = vpop.f32.mrb[46].mxu0  ;;  %v8589_v47 = vpop.f32.mrb[51].mxu1 }
 0x327   : > { %v7584_v34 = vadd.f32 %v8830_v6, %v7583_v21  ;;  %v7617_v8 = vmul.f32 %v8830_v6, %v8830_v6  ;;  %v8831_v20 = vadd.f32 %v7401_v62, %v5534_v41  ;;  %v8801_v44 = vpop.f32.mrb[47].mxu0 }
 0x329   : > { %v7641_v14 = vadd.f32 %v7640_v29, %v7617_v8  ;;  %v8181_v13 = vpack.c.bf16 %v8831_v20, %v8830_v6  ;;  %v7585_v61 = vadd.f32 %v8831_v20, %v7584_v34  ;;  %v7618_v56 = vmul.f32 %v8831_v20, %v8831_v20 }
 0x32b   : > { %8193 = vst [vmem:[%s12388_s6 + $0x58] sm:$0xff] %v8181_v13   ;;  %v7642_v63 = vadd.f32 %v7641_v14, %v7618_v56 }
 0x32c   : > { %v7406_v43 = vpop.f32.mrb[48].mxu0 }
 0x32d   : > { %v8832_v49 = vadd.f32 %v7406_v43, %v5539_v36  ;;  %v8804_v51 = vpop.f32.mrb[49].mxu0 }
 0x32e   : > { %v7409_v39 = vpop.f32.mrb[50].mxu0 }
 0x32f   : > { %v8122_v50 = vpack.c.bf16 %v8832_v49, %v8832_v49  ;;  %v7587_v30 = vsel %vm7586_vm0, %v8832_v49, 0.0  ;;  %v7619_v4 = vmul.f32 %v8832_v49, %v8832_v49  ;;  %v8805_v24 = vpop.f32.mrb[51].mxu0 }
 0x330   : > { %v7588_v33 = vadd.f32 %v7587_v30, %v7585_v61 }
 0x331   : > { %7562 = vst [vmem:[%s12388_s6 + $0x60] sm:$0x3] %v8122_v50  ;;  %v7643_v27 = vsel %vm7586_vm0, %v7619_v4, 0.0 }
 0x332   : > { %v7589_v12 = vrot.slane %v7588_v33, 4  ;;  %v7644_v18 = vadd.f32 %v7643_v27, %v7642_v63 }
 0x334   : > { %v7590_v3 = vadd.f32 %v7589_v12, %v7588_v33  ;;  %v7645_v15 = vrot.slane %v7644_v18, 4 }
 0x336   : > { %v7591_v31 = vrot.slane %v7590_v3, 2  ;;  %v7646_v22 = vadd.f32 %v7645_v15, %v7644_v18 }
 0x338   : > { %v7592_v0 = vadd.f32 %v7591_v31, %v7590_v3  ;;  %v7647_v10 = vrot.slane %v7646_v22, 2 }
 0x33a   : > { %v7593_v42 = vrot.slane %v7592_v0, 1  ;;  %v7648_v59 = vadd.f32 %v7647_v10, %v7646_v22 }
 0x33c   : > { %v7649_v17 = vrot.slane %v7648_v59, 1  ;;  %v7594_v2 = vadd.f32 %v7593_v42, %v7592_v0 }
 0x33e   : > { %v7650_v19 = vadd.f32 %v7649_v17, %v7648_v59 }
 0x340   : > { %v7652_v53 = vsel %vm7651_vm3, %v7594_v2, %v7650_v19 }
 0x341   : > { %7653 = vst [vmem:[%s171_s9] sm:$0x3] %v7652_v53 }
 0x342   : > { %9253 = shalt.err (!%p9250_p3)
}
 0x343   : > { %s9254_s27 = scalar_lea.hbm %s12414_s19, 32  ;;  %s9258_s4 = scalar_lea.hbm %s12459_s3, 64 }
 0x344   : > { %p9255_p4 = scmp.ne.s32.totalorder %s12414_s19, %s9254_s27  ;;  %p9259_p9 = scmp.lt.u32.totalorder %s12414_s19, %s12459_s3 }
 0x345   : > { %p9260_p10 = scmp.lt.u32.totalorder %s9258_s4, %s9254_s27  ;;  %p9262_p12 = scmp.lt.u32.totalorder %s9254_s27, %s12414_s19 }
 0x346   : > { %p9256_p7 = pnand %p9255_p4, %p9366_p5 }
 0x347   : > { %p9261_p11 = por %p9260_p10, %p9259_p9 }
 0x348   : > { %p9257_p8 = pneg %p9256_p7 }
 0x349   : > { %p9263_p13 = por %p9262_p12, %p9261_p11 }
 0x34b   : > { %p9264_p0 = pnand %p9263_p13, %p9257_p8 }
 0x34d   : > { %9267 = shalt.err (!%p9264_p0)
}
 0x34e   : > { %9198 = dma.vmem_to_hbm [thread:$0]  (%p9366_p5), %s12416_s10, 32, %s12414_s19, %s7660_s20  }
 0x34f PF: > { %p9204_p1 = scmp.ge.s32.totalorder %s9302_s15, 2  ;;  %s7696_s28 = sand.u32 1, %s9290_s12  }
 0x350   : > { %s7697_s7 = scalar_lea.sflag [#allocation3], %s7696_s28 }
 0x351   : > { %p9201_p2 = pnand %p9204_p1, %p9370_p6 }
 0x353   : > { %9285 = dma.done.wait (!%p9201_p2), %s7697_s7, 32  }
 0x354   : > { %9287 = vsyncadd (!%p9201_p2), %s7697_s7, 4294967264  ;;  %p14_p3 = scmp.ge.s32.totalorder %s9353_s18, 4   ;;  %s13233_s12 = smov %s9294_s13 }
 0x355   : > { %s13234_s13 = smov %s9298_s14  ;;  %s13235_s14 = smov %s9364_s21 }
 0x356   : > { %s13236_s15 = smov %s9353_s18  ;;  %16 = sbr.rel (!%p14_p3) target bundleno = 3 (0x3), region = 83 }
 0x35d   :  { %7702 = vsyncpa [#allocation3], 1 }
 0x35e   :  { %7704 = vsyncpa [#allocation3 + $0x1], 1 }

</bundles_post_ra>
